<compile_context>
chip_gen: v6e
topology: v6e:2x2x1
jax: 0.10.0
libtpu: 0.0.40
codegen_flags: <defaults>
</compile_context>

<pallas_src>
import jax
import jax.numpy as jnp
from jax import lax
from jax.experimental import pallas as pl
from jax.experimental.pallas import tpu as pltpu


def _round_up(x, m):
    return ((x + m - 1) // m) * m


# --------------------------------------------------------------------------
# kernel
# --------------------------------------------------------------------------
def _bottleneck_kernel(x_ref, w1_ref, w2_ref, w3_ref,
                       b1_ref, b2_ref, b3_ref,
                       o_ref, pad_ref):
    # x_ref: (H, W, Cin) bf16   (batch dim squeezed by BlockSpec)
    H, W, Cin = x_ref.shape
    P = w1_ref.shape[1]                 # planes (unpadded)
    Cout = w3_ref.shape[1]              # planes * 4 (== Cin)
    _, Wp, _ = pad_ref.shape            # (H+2, round_up(W+2, 8), P)

    x2d = x_ref[...].reshape(H * W, Cin)                       # bf16

    # ---- conv1 (1x1, BN-scale folded) + shift + relu ----------------------
    h1 = jnp.dot(x2d, w1_ref[...], preferred_element_type=jnp.float32)
    h1 = jnp.maximum(h1 + b1_ref[...], 0.0)                    # (H*W, P) f32

    # ---- conv2 (3x3, stride=1, pad=1, BN-scale folded) --------------------
    # Assemble the zero-padded h1 image in registers (zero edge columns
    # concatenated in-register, W axis padded to a sublane multiple) and write
    # the whole halo buffer with a single aligned store.
    h1_hw = h1.reshape(H, W, P).astype(pad_ref.dtype)          # bf16
    zc_l = jnp.zeros((H, 1, P), pad_ref.dtype)
    zc_r = jnp.zeros((H, Wp - W - 1, P), pad_ref.dtype)
    rows = jnp.concatenate([zc_l, h1_hw, zc_r], axis=1)        # (H, Wp, P)
    zrow = jnp.zeros((1, Wp, P), pad_ref.dtype)
    pad_ref[...] = jnp.concatenate([zrow, rows, zrow], axis=0)  # (H+2, Wp, P)

    # 9 accumulating taps — no (H*W, 9*P) im2col materialization.
    acc = jnp.zeros((H * W, P), jnp.float32)
    for t in range(9):
        dy, dx = t // 3, t % 3
        win = pad_ref[dy:dy + H, dx:dx + W, :].reshape(H * W, P)    # bf16
        acc = acc + jnp.dot(win, w2_ref[t],
                            preferred_element_type=jnp.float32)
    h2 = jnp.maximum(acc + b2_ref[...], 0.0)                   # (H*W, P) f32

    # ---- conv3 (1x1, BN-scale folded) + shift + residual + relu -----------
    h3 = jnp.dot(h2.astype(w3_ref.dtype), w3_ref[...],
                 preferred_element_type=jnp.float32)
    out = jnp.maximum(h3 + b3_ref[...] + x2d.astype(jnp.float32), 0.0)

    o_ref[...] = out.reshape(H, W, Cout).astype(o_ref.dtype)   # lane-dense Cout


# --------------------------------------------------------------------------
# wrapper (NHWC in / NHWC out, bf16 storage)
# --------------------------------------------------------------------------
def bottleneck_forward_nhwc(x_nhwc, folded_params):
    """x_nhwc: (N, H, W, Cin) bfloat16.  Returns (N, H, W, Cin) bfloat16."""
    w1, w2, w3, b1, b2, b3 = folded_params
    N, H, W, Cin = x_nhwc.shape
    P = w1.shape[1]
    Cout = w3.shape[1]
    assert Cout == Cin, "identity residual requires inplanes == planes*4"
    Wp = _round_up(W + 2, 8)

    # Explicit scoped-VMEM budget: in/out blocks (double-buffered) + weights
    # (single-buffered) + halo scratch + f32 SSA temporaries, with headroom.
    blk_bytes = H * W * Cin * 2                                   # bf16 block
    wgt_bytes = (Cin * P + 9 * P * P + P * Cout) * 2 + (2 * P + Cout) * 4
    scratch_bytes = (H + 2) * Wp * P * 2
    temp_bytes = H * W * (Cin + 4 * P + 2 * Cout) * 4             # f32 temps
    vmem_limit = min(
        2 * (2 * blk_bytes + wgt_bytes + scratch_bytes + temp_bytes) + (8 << 20),
        96 << 20)

    grid_spec = pltpu.PrefetchScalarGridSpec(
        num_scalar_prefetch=0,
        grid=(N,),
        in_specs=[
            pl.BlockSpec((pl.Squeezed(), H, W, Cin), lambda n: (n, 0, 0, 0)),
            # grid-constant weights / biases: whole-array VMEM, no double buffer
            pl.BlockSpec(memory_space=pltpu.MemorySpace.VMEM),   # w1
            pl.BlockSpec(memory_space=pltpu.MemorySpace.VMEM),   # w2 (9,P,P)
            pl.BlockSpec(memory_space=pltpu.MemorySpace.VMEM),   # w3
            pl.BlockSpec(memory_space=pltpu.MemorySpace.VMEM),   # b1
            pl.BlockSpec(memory_space=pltpu.MemorySpace.VMEM),   # b2
            pl.BlockSpec(memory_space=pltpu.MemorySpace.VMEM),   # b3
        ],
        out_specs=pl.BlockSpec((pl.Squeezed(), H, W, Cout),
                               lambda n: (n, 0, 0, 0)),
        scratch_shapes=[pltpu.VMEM((H + 2, Wp, P), jnp.bfloat16)],
    )

    return pl.pallas_call(
        _bottleneck_kernel,
        out_shape=jax.ShapeDtypeStruct((N, H, W, Cout), x_nhwc.dtype),
        grid_spec=grid_spec,
        compiler_params=pltpu.CompilerParams(
            dimension_semantics=("parallel",),
            vmem_limit_bytes=int(vmem_limit)),
    )(x_nhwc, w1, w2, w3, b1, b2, b3)


# --------------------------------------------------------------------------
# parameter construction / BN folding
# --------------------------------------------------------------------------
def make_params(key, inplanes, planes, eps=1e-5):
    """Synthetic 'natural' parameters: conv weights + eval-mode BN stats
    expressed as per-channel scale/shift.

      w1: (inplanes, planes)      conv1 1x1  (Cin, Cout)
      w2: (3, 3, planes, planes)  conv2 3x3  HWIO
      w3: (planes, planes*4)      conv3 1x1  (Cin, Cout)
      s*, b*: (1, C)   scale = gamma/sqrt(var+eps), shift = beta - mean*scale
    """
    cout = planes * 4
    ks = jax.random.split(key, 15)
    w1 = jax.random.normal(ks[0], (inplanes, planes), jnp.float32) * 0.05
    w2 = jax.random.normal(ks[1], (3, 3, planes, planes), jnp.float32) * 0.05
    w3 = jax.random.normal(ks[2], (planes, cout), jnp.float32) * 0.05

    def bn(kg, kb, km, kv, c):
        gamma = 1.0 + 0.1 * jax.random.normal(kg, (c,), jnp.float32)
        beta = 0.1 * jax.random.normal(kb, (c,), jnp.float32)
        mean = 0.1 * jax.random.normal(km, (c,), jnp.float32)
        var = jnp.abs(jax.random.normal(kv, (c,), jnp.float32)) + 0.5
        scale = gamma / jnp.sqrt(var + eps)
        shift = beta - mean * scale
        return scale.reshape(1, c), shift.reshape(1, c)

    s1, b1 = bn(ks[3], ks[4], ks[5], ks[6], planes)
    s2, b2 = bn(ks[7], ks[8], ks[9], ks[10], planes)
    s3, b3 = bn(ks[11], ks[12], ks[13], ks[14], cout)
    return (w1, w2, w3, s1, b1, s2, b2, s3, b3)


def fold_params(params, dtype=jnp.bfloat16):
    """Fold BN scales into conv weights (scale over output channels), reshape
    the 3x3 weight to (tap, in, out) for per-tap dots, cast weights to bf16.
    Shifts stay f32.  Planes are intentionally NOT padded to 128."""
    w1, w2, w3, s1, b1, s2, b2, s3, b3 = params
    P = w1.shape[1]
    w1f = (w1 * s1).astype(dtype)                       # (Cin, P)
    w2f = (w2 * s2[0]).reshape(9, P, P).astype(dtype)   # (dy*3+dx, in, out)
    w3f = (w3 * s3).astype(dtype)                       # (P, Cout)
    return (w1f, w2f, w3f, b1, b2, b3)


# --------------------------------------------------------------------------
# plain-JAX reference (f32, NHWC)
# --------------------------------------------------------------------------
def reference_forward_nhwc(x_nhwc, params):
    (w1, w2, w3, s1, b1, s2, b2, s3, b3) = params
    x = x_nhwc.astype(jnp.float32)
    dn = ("NHWC", "HWIO", "NHWC")

    h = lax.conv_general_dilated(x, w1[None, None], (1, 1), "VALID",
                                 dimension_numbers=dn)
    h = jnp.maximum(h * s1[0] + b1[0], 0.0)
    h = lax.conv_general_dilated(h, w2, (1, 1), [(1, 1), (1, 1)],
                                 dimension_numbers=dn)
    h = jnp.maximum(h * s2[0] + b2[0], 0.0)
    h = lax.conv_general_dilated(h, w3[None, None], (1, 1), "VALID",
                                 dimension_numbers=dn)
    h = h * s3[0] + b3[0]
    return jnp.maximum(h + x, 0.0)


# --------------------------------------------------------------------------
if __name__ == "__main__":
    key = jax.random.PRNGKey(0)
    N, planes, H, W = 2, 32, 16, 16
    inplanes = planes * 4            # required for the identity residual path

    kx, kp = jax.random.split(key)
    x_f32 = jax.random.normal(kx, (N, H, W, inplanes), jnp.float32)  # NHWC
    x_bf16 = x_f32.astype(jnp.bfloat16)
    params = make_params(kp, inplanes, planes)
    folded = fold_params(params)

    out = bottleneck_forward_nhwc(x_bf16, folded)
    out = jax.block_until_ready(out)

    ref = reference_forward_nhwc(x_bf16, params)
    assert out.shape == (N, H, W, inplanes)
    assert jnp.allclose(out.astype(jnp.float32), ref, atol=1e-1, rtol=1e-1), \
        "mismatch vs reference"

    print("KERNEL_OK")
</pallas_src>

<mosaic_0001>
module attributes {stable_mosaic.version = 11 : i64} {
  func.func @_bottleneck_kernel(%arg0: i32, %arg1: memref<1x16x16x128xbf16, #tpu.memory_space<vmem>>, %arg2: memref<128x32xbf16, #tpu.memory_space<vmem>>, %arg3: memref<9x32x32xbf16, #tpu.memory_space<vmem>>, %arg4: memref<32x128xbf16, #tpu.memory_space<vmem>>, %arg5: memref<1x32xf32, #tpu.memory_space<vmem>>, %arg6: memref<1x32xf32, #tpu.memory_space<vmem>>, %arg7: memref<1x128xf32, #tpu.memory_space<vmem>>, %arg8: memref<1x16x16x128xbf16, #tpu.memory_space<vmem>>, %arg9: memref<18x24x32xbf16, #tpu.memory_space<vmem>>) attributes {dimension_semantics = [#tpu.dimension_semantics<parallel>], iteration_bounds = array<i64: 2>, scalar_prefetch = 0 : i64, scratch_operands = 1 : i64, tpu.core_type = #tpu.core_type<tc>, window_params = [{transform_indices = @transform_0, window_bounds = array<i64: 1, 16, 16, 128>}, {pipeline_mode = #tpu.pipeline_mode<synchronous>, transform_indices = @transform_1, window_bounds = array<i64: 128, 32>}, {pipeline_mode = #tpu.pipeline_mode<synchronous>, transform_indices = @transform_2, window_bounds = array<i64: 9, 32, 32>}, {pipeline_mode = #tpu.pipeline_mode<synchronous>, transform_indices = @transform_3, window_bounds = array<i64: 32, 128>}, {pipeline_mode = #tpu.pipeline_mode<synchronous>, transform_indices = @transform_4, window_bounds = array<i64: 1, 32>}, {pipeline_mode = #tpu.pipeline_mode<synchronous>, transform_indices = @transform_5, window_bounds = array<i64: 1, 32>}, {pipeline_mode = #tpu.pipeline_mode<synchronous>, transform_indices = @transform_6, window_bounds = array<i64: 1, 128>}, {transform_indices = @transform_7, window_bounds = array<i64: 1, 16, 16, 128>}]} {
    %c0 = arith.constant 0 : index
    %c0_0 = arith.constant 0 : index
    %c0_1 = arith.constant 0 : index
    %c0_2 = arith.constant 0 : index
    %0 = vector.load %arg1[%c0, %c0_0, %c0_1, %c0_2] : memref<1x16x16x128xbf16, #tpu.memory_space<vmem>>, vector<1x16x16x128xbf16>
    %1 = vector.shape_cast %0 : vector<1x16x16x128xbf16> to vector<16x16x128xbf16>
    %2 = vector.shape_cast %1 : vector<16x16x128xbf16> to vector<256x128xbf16>
    %c0_3 = arith.constant 0 : index
    %c0_4 = arith.constant 0 : index
    %3 = vector.load %arg2[%c0_3, %c0_4] : memref<128x32xbf16, #tpu.memory_space<vmem>>, vector<128x32xbf16>
    %cst = arith.constant dense<0.000000e+00> : vector<256x32xf32>
    %4 = tpu.matmul %2, %3, %cst {dimension_numbers = #tpu.dot_dimension_numbers<[1], [0], [0], [1], [0, 0, 1, 1], [], []>} : vector<256x128xbf16>, vector<128x32xbf16>, vector<256x32xf32> -> vector<256x32xf32>
    %c0_5 = arith.constant 0 : index
    %c0_6 = arith.constant 0 : index
    %5 = vector.load %arg5[%c0_5, %c0_6] : memref<1x32xf32, #tpu.memory_space<vmem>>, vector<1x32xf32>
    %6 = vector.broadcast %5 : vector<1x32xf32> to vector<256x32xf32>
    %7 = arith.addf %4, %6 : vector<256x32xf32>
    %cst_7 = arith.constant 0.000000e+00 : f32
    %8 = vector.broadcast %cst_7 : f32 to vector<256x32xf32>
    %9 = arith.maximumf %7, %8 : vector<256x32xf32>
    %10 = vector.shape_cast %9 : vector<256x32xf32> to vector<16x16x32xf32>
    %11 = arith.truncf %10 : vector<16x16x32xf32> to vector<16x16x32xbf16>
    %cst_8 = arith.constant 0.000000e+00 : bf16
    %12 = vector.broadcast %cst_8 : bf16 to vector<16x1x32xbf16>
    %cst_9 = arith.constant 0.000000e+00 : bf16
    %13 = vector.broadcast %cst_9 : bf16 to vector<16x7x32xbf16>
    %14 = tpu.concatenate %12, %11, %13 in 1 : vector<16x1x32xbf16>, vector<16x16x32xbf16>, vector<16x7x32xbf16> -> vector<16x24x32xbf16>
    %cst_10 = arith.constant 0.000000e+00 : bf16
    %15 = vector.broadcast %cst_10 : bf16 to vector<1x24x32xbf16>
    %16 = tpu.concatenate %15, %14, %15 in 0 : vector<1x24x32xbf16>, vector<16x24x32xbf16>, vector<1x24x32xbf16> -> vector<18x24x32xbf16>
    %c0_11 = arith.constant 0 : index
    %c0_12 = arith.constant 0 : index
    %c0_13 = arith.constant 0 : index
    %17 = vector.load %arg9[%c0_11, %c0_12, %c0_13] : memref<18x24x32xbf16, #tpu.memory_space<vmem>>, vector<18x24x32xbf16>
    tpu.vector_store %arg9[%c0_11, %c0_12, %c0_13], %16 {strides = array<i32>} : memref<18x24x32xbf16, #tpu.memory_space<vmem>>, vector<18x24x32xbf16>,
    %cst_14 = arith.constant 0.000000e+00 : f32
    %18 = vector.broadcast %cst_14 : f32 to vector<256x32xf32>
    %c0_15 = arith.constant 0 : index
    %c0_16 = arith.constant 0 : index
    %c0_17 = arith.constant 0 : index
    %19 = vector.load %arg9[%c0_15, %c0_16, %c0_17] : memref<18x24x32xbf16, #tpu.memory_space<vmem>>, vector<16x16x32xbf16>
    %20 = vector.shape_cast %19 : vector<16x16x32xbf16> to vector<256x32xbf16>
    %c0_18 = arith.constant 0 : index
    %c0_19 = arith.constant 0 : index
    %c0_20 = arith.constant 0 : index
    %21 = vector.load %arg3[%c0_18, %c0_19, %c0_20] : memref<9x32x32xbf16, #tpu.memory_space<vmem>>, vector<1x32x32xbf16>
    %22 = vector.shape_cast %21 : vector<1x32x32xbf16> to vector<32x32xbf16>
    %cst_21 = arith.constant dense<0.000000e+00> : vector<256x32xf32>
    %23 = tpu.matmul %20, %22, %cst_21 {dimension_numbers = #tpu.dot_dimension_numbers<[1], [0], [0], [1], [0, 0, 1, 1], [], []>} : vector<256x32xbf16>, vector<32x32xbf16>, vector<256x32xf32> -> vector<256x32xf32>
    %24 = arith.addf %18, %23 : vector<256x32xf32>
    %c0_22 = arith.constant 0 : index
    %c1 = arith.constant 1 : index
    %c0_23 = arith.constant 0 : index
    %25 = vector.load %arg9[%c0_22, %c1, %c0_23] : memref<18x24x32xbf16, #tpu.memory_space<vmem>>, vector<16x16x32xbf16>
    %26 = vector.shape_cast %25 : vector<16x16x32xbf16> to vector<256x32xbf16>
    %c1_24 = arith.constant 1 : index
    %c0_25 = arith.constant 0 : index
    %c0_26 = arith.constant 0 : index
    %27 = vector.load %arg3[%c1_24, %c0_25, %c0_26] : memref<9x32x32xbf16, #tpu.memory_space<vmem>>, vector<1x32x32xbf16>
    %28 = vector.shape_cast %27 : vector<1x32x32xbf16> to vector<32x32xbf16>
    %cst_27 = arith.constant dense<0.000000e+00> : vector<256x32xf32>
    %29 = tpu.matmul %26, %28, %cst_27 {dimension_numbers = #tpu.dot_dimension_numbers<[1], [0], [0], [1], [0, 0, 1, 1], [], []>} : vector<256x32xbf16>, vector<32x32xbf16>, vector<256x32xf32> -> vector<256x32xf32>
    %30 = arith.addf %24, %29 : vector<256x32xf32>
    %c0_28 = arith.constant 0 : index
    %c2 = arith.constant 2 : index
    %c0_29 = arith.constant 0 : index
    %31 = vector.load %arg9[%c0_28, %c2, %c0_29] : memref<18x24x32xbf16, #tpu.memory_space<vmem>>, vector<16x16x32xbf16>
    %32 = vector.shape_cast %31 : vector<16x16x32xbf16> to vector<256x32xbf16>
    %c2_30 = arith.constant 2 : index
    %c0_31 = arith.constant 0 : index
    %c0_32 = arith.constant 0 : index
    %33 = vector.load %arg3[%c2_30, %c0_31, %c0_32] : memref<9x32x32xbf16, #tpu.memory_space<vmem>>, vector<1x32x32xbf16>
    %34 = vector.shape_cast %33 : vector<1x32x32xbf16> to vector<32x32xbf16>
    %cst_33 = arith.constant dense<0.000000e+00> : vector<256x32xf32>
    %35 = tpu.matmul %32, %34, %cst_33 {dimension_numbers = #tpu.dot_dimension_numbers<[1], [0], [0], [1], [0, 0, 1, 1], [], []>} : vector<256x32xbf16>, vector<32x32xbf16>, vector<256x32xf32> -> vector<256x32xf32>
    %36 = arith.addf %30, %35 : vector<256x32xf32>
    %c1_34 = arith.constant 1 : index
    %c0_35 = arith.constant 0 : index
    %c0_36 = arith.constant 0 : index
    %37 = vector.load %arg9[%c1_34, %c0_35, %c0_36] : memref<18x24x32xbf16, #tpu.memory_space<vmem>>, vector<16x16x32xbf16>
    %38 = vector.shape_cast %37 : vector<16x16x32xbf16> to vector<256x32xbf16>
    %c3 = arith.constant 3 : index
    %c0_37 = arith.constant 0 : index
    %c0_38 = arith.constant 0 : index
    %39 = vector.load %arg3[%c3, %c0_37, %c0_38] : memref<9x32x32xbf16, #tpu.memory_space<vmem>>, vector<1x32x32xbf16>
    %40 = vector.shape_cast %39 : vector<1x32x32xbf16> to vector<32x32xbf16>
    %cst_39 = arith.constant dense<0.000000e+00> : vector<256x32xf32>
    %41 = tpu.matmul %38, %40, %cst_39 {dimension_numbers = #tpu.dot_dimension_numbers<[1], [0], [0], [1], [0, 0, 1, 1], [], []>} : vector<256x32xbf16>, vector<32x32xbf16>, vector<256x32xf32> -> vector<256x32xf32>
    %42 = arith.addf %36, %41 : vector<256x32xf32>
    %c1_40 = arith.constant 1 : index
    %c1_41 = arith.constant 1 : index
    %c0_42 = arith.constant 0 : index
    %43 = vector.load %arg9[%c1_40, %c1_41, %c0_42] : memref<18x24x32xbf16, #tpu.memory_space<vmem>>, vector<16x16x32xbf16>
    %44 = vector.shape_cast %43 : vector<16x16x32xbf16> to vector<256x32xbf16>
    %c4 = arith.constant 4 : index
    %c0_43 = arith.constant 0 : index
    %c0_44 = arith.constant 0 : index
    %45 = vector.load %arg3[%c4, %c0_43, %c0_44] : memref<9x32x32xbf16, #tpu.memory_space<vmem>>, vector<1x32x32xbf16>
    %46 = vector.shape_cast %45 : vector<1x32x32xbf16> to vector<32x32xbf16>
    %cst_45 = arith.constant dense<0.000000e+00> : vector<256x32xf32>
    %47 = tpu.matmul %44, %46, %cst_45 {dimension_numbers = #tpu.dot_dimension_numbers<[1], [0], [0], [1], [0, 0, 1, 1], [], []>} : vector<256x32xbf16>, vector<32x32xbf16>, vector<256x32xf32> -> vector<256x32xf32>
    %48 = arith.addf %42, %47 : vector<256x32xf32>
    %c1_46 = arith.constant 1 : index
    %c2_47 = arith.constant 2 : index
    %c0_48 = arith.constant 0 : index
    %49 = vector.load %arg9[%c1_46, %c2_47, %c0_48] : memref<18x24x32xbf16, #tpu.memory_space<vmem>>, vector<16x16x32xbf16>
    %50 = vector.shape_cast %49 : vector<16x16x32xbf16> to vector<256x32xbf16>
    %c5 = arith.constant 5 : index
    %c0_49 = arith.constant 0 : index
    %c0_50 = arith.constant 0 : index
    %51 = vector.load %arg3[%c5, %c0_49, %c0_50] : memref<9x32x32xbf16, #tpu.memory_space<vmem>>, vector<1x32x32xbf16>
    %52 = vector.shape_cast %51 : vector<1x32x32xbf16> to vector<32x32xbf16>
    %cst_51 = arith.constant dense<0.000000e+00> : vector<256x32xf32>
    %53 = tpu.matmul %50, %52, %cst_51 {dimension_numbers = #tpu.dot_dimension_numbers<[1], [0], [0], [1], [0, 0, 1, 1], [], []>} : vector<256x32xbf16>, vector<32x32xbf16>, vector<256x32xf32> -> vector<256x32xf32>
    %54 = arith.addf %48, %53 : vector<256x32xf32>
    %c2_52 = arith.constant 2 : index
    %c0_53 = arith.constant 0 : index
    %c0_54 = arith.constant 0 : index
    %55 = vector.load %arg9[%c2_52, %c0_53, %c0_54] : memref<18x24x32xbf16, #tpu.memory_space<vmem>>, vector<16x16x32xbf16>
    %56 = vector.shape_cast %55 : vector<16x16x32xbf16> to vector<256x32xbf16>
    %c6 = arith.constant 6 : index
    %c0_55 = arith.constant 0 : index
    %c0_56 = arith.constant 0 : index
    %57 = vector.load %arg3[%c6, %c0_55, %c0_56] : memref<9x32x32xbf16, #tpu.memory_space<vmem>>, vector<1x32x32xbf16>
    %58 = vector.shape_cast %57 : vector<1x32x32xbf16> to vector<32x32xbf16>
    %cst_57 = arith.constant dense<0.000000e+00> : vector<256x32xf32>
    %59 = tpu.matmul %56, %58, %cst_57 {dimension_numbers = #tpu.dot_dimension_numbers<[1], [0], [0], [1], [0, 0, 1, 1], [], []>} : vector<256x32xbf16>, vector<32x32xbf16>, vector<256x32xf32> -> vector<256x32xf32>
    %60 = arith.addf %54, %59 : vector<256x32xf32>
    %c2_58 = arith.constant 2 : index
    %c1_59 = arith.constant 1 : index
    %c0_60 = arith.constant 0 : index
    %61 = vector.load %arg9[%c2_58, %c1_59, %c0_60] : memref<18x24x32xbf16, #tpu.memory_space<vmem>>, vector<16x16x32xbf16>
    %62 = vector.shape_cast %61 : vector<16x16x32xbf16> to vector<256x32xbf16>
    %c7 = arith.constant 7 : index
    %c0_61 = arith.constant 0 : index
    %c0_62 = arith.constant 0 : index
    %63 = vector.load %arg3[%c7, %c0_61, %c0_62] : memref<9x32x32xbf16, #tpu.memory_space<vmem>>, vector<1x32x32xbf16>
    %64 = vector.shape_cast %63 : vector<1x32x32xbf16> to vector<32x32xbf16>
    %cst_63 = arith.constant dense<0.000000e+00> : vector<256x32xf32>
    %65 = tpu.matmul %62, %64, %cst_63 {dimension_numbers = #tpu.dot_dimension_numbers<[1], [0], [0], [1], [0, 0, 1, 1], [], []>} : vector<256x32xbf16>, vector<32x32xbf16>, vector<256x32xf32> -> vector<256x32xf32>
    %66 = arith.addf %60, %65 : vector<256x32xf32>
    %c2_64 = arith.constant 2 : index
    %c2_65 = arith.constant 2 : index
    %c0_66 = arith.constant 0 : index
    %67 = vector.load %arg9[%c2_64, %c2_65, %c0_66] : memref<18x24x32xbf16, #tpu.memory_space<vmem>>, vector<16x16x32xbf16>
    %68 = vector.shape_cast %67 : vector<16x16x32xbf16> to vector<256x32xbf16>
    %c8 = arith.constant 8 : index
    %c0_67 = arith.constant 0 : index
    %c0_68 = arith.constant 0 : index
    %69 = vector.load %arg3[%c8, %c0_67, %c0_68] : memref<9x32x32xbf16, #tpu.memory_space<vmem>>, vector<1x32x32xbf16>
    %70 = vector.shape_cast %69 : vector<1x32x32xbf16> to vector<32x32xbf16>
    %cst_69 = arith.constant dense<0.000000e+00> : vector<256x32xf32>
    %71 = tpu.matmul %68, %70, %cst_69 {dimension_numbers = #tpu.dot_dimension_numbers<[1], [0], [0], [1], [0, 0, 1, 1], [], []>} : vector<256x32xbf16>, vector<32x32xbf16>, vector<256x32xf32> -> vector<256x32xf32>
    %72 = arith.addf %66, %71 : vector<256x32xf32>
    %c0_70 = arith.constant 0 : index
    %c0_71 = arith.constant 0 : index
    %73 = vector.load %arg6[%c0_70, %c0_71] : memref<1x32xf32, #tpu.memory_space<vmem>>, vector<1x32xf32>
    %74 = vector.broadcast %73 : vector<1x32xf32> to vector<256x32xf32>
    %75 = arith.addf %72, %74 : vector<256x32xf32>
    %cst_72 = arith.constant 0.000000e+00 : f32
    %76 = vector.broadcast %cst_72 : f32 to vector<256x32xf32>
    %77 = arith.maximumf %75, %76 : vector<256x32xf32>
    %78 = arith.truncf %77 : vector<256x32xf32> to vector<256x32xbf16>
    %c0_73 = arith.constant 0 : index
    %c0_74 = arith.constant 0 : index
    %79 = vector.load %arg4[%c0_73, %c0_74] : memref<32x128xbf16, #tpu.memory_space<vmem>>, vector<32x128xbf16>
    %cst_75 = arith.constant dense<0.000000e+00> : vector<256x128xf32>
    %80 = tpu.matmul %78, %79, %cst_75 {dimension_numbers = #tpu.dot_dimension_numbers<[1], [0], [0], [1], [0, 0, 1, 1], [], []>} : vector<256x32xbf16>, vector<32x128xbf16>, vector<256x128xf32> -> vector<256x128xf32>
    %c0_76 = arith.constant 0 : index
    %c0_77 = arith.constant 0 : index
    %81 = vector.load %arg7[%c0_76, %c0_77] : memref<1x128xf32, #tpu.memory_space<vmem>>, vector<1x128xf32>
    %82 = vector.broadcast %81 : vector<1x128xf32> to vector<256x128xf32>
    %83 = arith.addf %80, %82 : vector<256x128xf32>
    %84 = arith.extf %2 : vector<256x128xbf16> to vector<256x128xf32>
    %85 = arith.addf %83, %84 : vector<256x128xf32>
    %cst_78 = arith.constant 0.000000e+00 : f32
    %86 = vector.broadcast %cst_78 : f32 to vector<256x128xf32>
    %87 = arith.maximumf %85, %86 : vector<256x128xf32>
    %88 = vector.shape_cast %87 : vector<256x128xf32> to vector<16x16x128xf32>
    %89 = arith.truncf %88 : vector<16x16x128xf32> to vector<16x16x128xbf16>
    %c0_79 = arith.constant 0 : index
    %c0_80 = arith.constant 0 : index
    %c0_81 = arith.constant 0 : index
    %c0_82 = arith.constant 0 : index
    %90 = vector.load %arg8[%c0_79, %c0_80, %c0_81, %c0_82] : memref<1x16x16x128xbf16, #tpu.memory_space<vmem>>, vector<1x16x16x128xbf16>
    %91 = vector.shape_cast %90 : vector<1x16x16x128xbf16> to vector<16x16x128xbf16>
    %92 = vector.shape_cast %89 : vector<16x16x128xbf16> to vector<1x16x16x128xbf16>
    tpu.vector_store %arg8[%c0_79, %c0_80, %c0_81, %c0_82], %92 {strides = array<i32>} : memref<1x16x16x128xbf16, #tpu.memory_space<vmem>>, vector<1x16x16x128xbf16>,
    return
  }
  func.func @transform_0(%arg0: i32) -> (i32, i32, i32, i32) {
    %c0_i32 = arith.constant 0 : i32
    %c0_i32_0 = arith.constant 0 : i32
    %c0_i32_1 = arith.constant 0 : i32
    %c0_i32_2 = arith.constant 0 : i32
    return %arg0, %c0_i32, %c0_i32_0, %c0_i32_1 : i32, i32, i32, i32
  }
  func.func @transform_1(%arg0: i32) -> (i32, i32) {
    %c0_i32 = arith.constant 0 : i32
    %c0_i32_0 = arith.constant 0 : i32
    %c0_i32_1 = arith.constant 0 : i32
    return %c0_i32, %c0_i32_0 : i32, i32
  }
  func.func @transform_2(%arg0: i32) -> (i32, i32, i32) {
    %c0_i32 = arith.constant 0 : i32
    %c0_i32_0 = arith.constant 0 : i32
    %c0_i32_1 = arith.constant 0 : i32
    %c0_i32_2 = arith.constant 0 : i32
    return %c0_i32, %c0_i32_0, %c0_i32_1 : i32, i32, i32
  }
  func.func @transform_3(%arg0: i32) -> (i32, i32) {
    %c0_i32 = arith.constant 0 : i32
    %c0_i32_0 = arith.constant 0 : i32
    %c0_i32_1 = arith.constant 0 : i32
    return %c0_i32, %c0_i32_0 : i32, i32
  }
  func.func @transform_4(%arg0: i32) -> (i32, i32) {
    %c0_i32 = arith.constant 0 : i32
    %c0_i32_0 = arith.constant 0 : i32
    %c0_i32_1 = arith.constant 0 : i32
    return %c0_i32, %c0_i32_0 : i32, i32
  }
  func.func @transform_5(%arg0: i32) -> (i32, i32) {
    %c0_i32 = arith.constant 0 : i32
    %c0_i32_0 = arith.constant 0 : i32
    %c0_i32_1 = arith.constant 0 : i32
    return %c0_i32, %c0_i32_0 : i32, i32
  }
  func.func @transform_6(%arg0: i32) -> (i32, i32) {
    %c0_i32 = arith.constant 0 : i32
    %c0_i32_0 = arith.constant 0 : i32
    %c0_i32_1 = arith.constant 0 : i32
    return %c0_i32, %c0_i32_0 : i32, i32
  }
  func.func @transform_7(%arg0: i32) -> (i32, i32, i32, i32) {
    %c0_i32 = arith.constant 0 : i32
    %c0_i32_0 = arith.constant 0 : i32
    %c0_i32_1 = arith.constant 0 : i32
    %c0_i32_2 = arith.constant 0 : i32
    return %arg0, %c0_i32, %c0_i32_0, %c0_i32_1 : i32, i32, i32, i32
  }
}

</mosaic_0001>

<bundles_post_ra>
// kernel: tpu_custom_call.1
= control target key start
LH: loop header
LB: loop body
LE: loop exit
PB: predicated region body
PF: predicated region fallthrough
CT: control target
= control target key end

     0   :  { %s10827_s0 = inlined_call_operand.hbm [shape: bf16[2,16,16,128], index: 0, kind: input, shape index: {}]   ;;  %s10828_s1 = inlined_call_operand.vmem [shape: bf16[128,32], index: 1, kind: input, shape index: {}]   ;;  %s10829_s2 = inlined_call_operand.hbm [shape: bf16[9,32,32], index: 2, kind: input, shape index: {}]   ;;  %s10830_s3 = inlined_call_operand.vmem [shape: bf16[32,128], index: 3, kind: input, shape index: {}]   ;;  %s10831_s4 = inlined_call_operand.vmem [shape: f32[1,32], index: 4, kind: input, shape index: {}]   ;;  %s10832_s5 = inlined_call_operand.vmem [shape: f32[1,32], index: 5, kind: input, shape index: {}]   ;;  %s10833_s6 = inlined_call_operand.vmem [shape: f32[1,128], index: 6, kind: input, shape index: {}]   ;;  %s10834_s7 = inlined_call_operand.hbm [shape: bf16[2,16,16,128], index: 7, kind: output, shape index: {}]  }
   0x1   :  { %10864 = sst [smem:[#allocation65_spill]] %s10829_s2 }
   0x2   :  { %12 = vsyncpa [#allocation4], 0 }
   0x3   :  { %14 = vsyncpa [#allocation4 + $0x1], 0 }
   0x4   :  { %15 = vsyncpa [#allocation7], 0 }
   0x5   :  { %16 = vsyncpa [#allocation5], 0 }
   0x6   :  { %18 = vsyncpa [#allocation5 + $0x1], 0  ;;  %s8087_s24 = smov 0   ;;  %s8089_s25 = smov 0  }
   0x7   :  { %s8091_s26 = smov 0   ;;  %s8093_s27 = smov 0  }
   0x8 LB: > { %s8108_s28 = sadd.s32 4294967295, %s8037_s27   ;;  %s6476_s29 = sadd.s32 4294967294, %s8037_s27   ;;  %s8037_s27 = sphi %s8093_s27, %s11100_s27   ;;  %s8033_s26 = sphi %s8091_s26, %s11099_s26   ;;  %s8029_s25 = sphi %s8089_s25, %s11098_s25   ;;  %s8025_s24 = sphi %s8087_s24, %s11097_s24  }
   0x9   : > { %p44_p0 = scmp.ne.s32.totalorder %s8029_s25, %s8025_s24  ;;  %p10836_p1 = scmp.eq.s32.totalorder %s8108_s28, 0 }
   0xa   : > { %p200_p3 = scmp.eq.s32.totalorder %s6476_s29, 1  ;;  %p6477_p5 = scmp.ge.s32.totalorder %s8037_s27, 1 }
   0xb   : > { %p8117_p4 = por %p10836_p1, %p44_p0  ;;  %p207_p7 = scmp.lt.s32.totalorder %s8037_s27, 3 }
   0xc   : > { %p8122_p6 = por %p200_p3, %p44_p0  ;;  %s8039_s10 = smov [#allocation6]  }
   0xd   : > { %s10865_s30 = scalar_select %p8117_p4, 1, 0 }
   0xe   : > { %s10866_s8 = scalar_select %p8122_p6, 1, 0 }
   0xf   : > { %p8127_p8 = pnand %p6477_p5, %p207_p7  ;;  %s222_s11 = sshll.u32 %s8039_s10, 4  ;;  %s223_s11 = int_to_ptr.vmem [resolvable:$true] %s222_s11 }
  0x10   : > { %s8141_s13 = sadd.s32 1, %s8037_s27   ;;  %s31_s14 = sadd.s32 1, %s8033_s26 }
  0x11   : > { %s10867_s9 = scalar_select %p8127_p8, 1, 0 }
  0x12   : > { %p7726_p9 = pneg %p8127_p8  ;;  %s28_s15 = ssub.s32 %s8037_s27, %s8141_s13 }
  0x13   : > { %s7926_s16 = scalar_lea.vmem %s223_s11, 2304  ;;  %p7934_p5 = scmp.lt.s32.totalorder %s223_s11, %s223_s11 }
  0x14   : > { %p8136_p11 = pnand %p7726_p9, %p10836_p1  ;;  %p7927_p13 = scmp.ne.s32.totalorder %s223_s11, %s7926_s16 }
  0x15   : > { %p7935_p7 = scmp.lt.s32.totalorder %s7926_s16, %s7926_s16 }
  0x16   : > { %p7917_p12 = pneg %p8136_p11 }
  0x17   : > { %p7936_p10 = por %p7935_p7, %p7934_p5 }
  0x18   : > { %p7929_p0 = pnand %p7927_p13, %p7917_p12 }
  0x1a   : > { %p7930_p3 = pneg %p7929_p0 }
  0x1c   : > { %p7937_p2 = pnand %p7936_p10, %p7930_p3 }
  0x1e   : > { %7940 = shalt.err (!%p7937_p2)
}
  0x1f   : > { %s10835_s17 = smov 64   ;;  %s10837_s18 = smov 4  }
  0x20   : > { %s10869_s2 = sld [smem:[#allocation65_spill]]  ;;  %p29_p2 = scmp.eq.s32.totalorder %s28_s15, 0 }
  0x21   : > { %p38_p9 = scmp.ne.s32.totalorder %s8033_s26, %s8029_s25  ;;  %p39_p10 = scmp.eq.s32.totalorder %s8037_s27, 0 }
  0x22   : > { %p7739_p12 = scmp.lt.s32.totalorder %s8037_s27, 2  ;;  %p10870_p0 = scmp.eq.s32.totalorder %s8108_s28, 1 }
  0x23   : > { %s8161_s21 = scalar_select %p29_p2, %s8033_s26, %s31_s14  }
  0x24   : > { %p40_p13 = por %p39_p10, %p38_p9  ;;  %p8165_p3 = por %p10870_p0, %p38_p9 }
  0x25   : > { %s248_s23 = sand.u32 1, %s8033_s26   ;;  %s6973_s29 = sshll.u32 %s8037_s27, 11 }
  0x26   : > { %7729 = dma.hbm_to_vmem [thread:$0]  (!%p8136_p11), %s10869_s2, 2304, %s223_s11, [#allocation7], %s10835_s17, %s10835_s17, %s10837_s18  }
  0x27   : > { %s10871_s22 = scalar_select %p8165_p3, 1, 0 }
  0x28   : > { %s6480_s10 = sshll.u32 %s248_s23, 7  ;;  %s8174_s19 = scalar_lea.hbm %s10827_s0, %s6973_s29 }
  0x29   : > { %s252_s11 = scalar_lea.vmem [#allocation3], %s6480_s10  ;;  %p8176_p11 = pnand %p7739_p12, %p40_p13 }
  0x2a   : > { %s259_s14 = sshll.u32 %s252_s11, 4  ;;  %s8182_s20 = scalar_lea.sflag [#allocation4], %s248_s23  ;;  %s8180_s14 = int_to_ptr.vmem [resolvable:$true] %s259_s14 }
  0x2b   : > { %s7941_s17 = scalar_lea.hbm %s8174_s19, 2048  ;;  %p7943_p7 = pneg %p8176_p11 }
  0x2c   : > { %p7942_p5 = scmp.ne.s32.totalorder %s8174_s19, %s7941_s17  ;;  %s7946_s10 = scalar_lea.hbm %s10827_s0, 4096 }
  0x2d   : > { %p7947_p10 = scmp.lt.s32.totalorder %s8174_s19, %s10827_s0  ;;  %p7948_p12 = scmp.lt.s32.totalorder %s7946_s10, %s7941_s17 }
  0x2e   : > { %p7944_p2 = pnand %p7943_p7, %p7942_p5 }
  0x2f   : > { %p7949_p13 = por %p7948_p12, %p7947_p10 }
  0x30   : > { %p7945_p9 = pneg %p7944_p2 }
  0x32   : > { %p7950_p0 = pnand %p7949_p13, %p7945_p9 }
  0x34   : > { %7953 = shalt.err (!%p7950_p0)
}
  0x35   : > { %s7954_s23 = scalar_lea.vmem %s8180_s14, 2048  ;;  %s8042_s18 = smov [#allocation3]  }
  0x36   : > { %p7955_p1 = scmp.ne.s32.totalorder %s8180_s14, %s7954_s23  ;;  %s7959_s2 = sshll.u32 %s8042_s18, 4  ;;  %s7960_s2 = int_to_ptr.vmem [resolvable:$false] %s7959_s2 }
  0x37   : > { %s7961_s29 = scalar_lea.vmem %s7960_s2, 4096  ;;  %p7962_p2 = scmp.lt.s32.totalorder %s8180_s14, %s7960_s2 }
  0x38   : > { %p7957_p6 = pnand %p7955_p1, %p7943_p7  ;;  %p7963_p3 = scmp.lt.s32.totalorder %s7961_s29, %s7954_s23 }
  0x3a   : > { %p7958_p5 = pneg %p7957_p6  ;;  %p7964_p4 = por %p7963_p3, %p7962_p2 }
  0x3c   : > { %p7965_p8 = pnand %p7964_p4, %p7958_p5 }
  0x3e   : > { %7968 = shalt.err (!%p7965_p8)
}
  0x3f   : > { %s10873_s17 = smov 4   ;;  %s10874_s12 = smov 64  }
  0x40   : > { %7733 = dma.hbm_to_vmem [thread:$0]  (!%p8176_p11), %s8174_s19, 2048, %s8180_s14, %s8182_s20, %s10874_s12, %s10874_s12, %s10873_s17  }
  0x41   : > { %p10875_p1 = scmp.ne.s32.totalorder %s10867_s9, 0 }
  0x43   : > { %271 = sbr.rel (%p10875_p1) target bundleno = 1148 (0x47c), region = 48 }
  0x48   : > { %s8209_s18 = sand.u32 1, %s8029_s25   ;;  %p10876_p4 = scmp.ne.s32.totalorder %s10865_s30, 0 }
  0x49   : > { %s6484_s2 = sshll.u32 %s8209_s18, 7  ;;  %s274_s10 = scalar_lea.sflag [#allocation4], %s8209_s18 }
  0x4a   : > { %s8215_s15 = scalar_lea.vmem [#allocation3], %s6484_s2 }
  0x4b   : > { %8012 = dma.done.wait (%p10876_p4), %s274_s10, 2048  }
  0x4c   : > { %8014 = vsyncadd (%p10876_p4), %s274_s10, 4294965248  ;;  %p10877_p6 = scmp.eq.s32.totalorder %s8108_s28, 0 }
  0x4e   : > { %8016 = dma.done.wait (%p10877_p6), [#allocation7], 2304   ;;  %p10878_p8 = pmov %p10877_p6 }
  0x4f   : > { %v7780_v0 = vld [vmem:[%s10828_s1 + $0x38] sm:$0xff]   ;;  %v7781_v1 = vld [vmem:[%s10828_s1 + $0x30] sm:$0xff]   ;;  %v7782_v2 = vld [vmem:[%s10828_s1 + $0x28] sm:$0xff]   ;;  %v8043_v24 = vmov 0   ;;  %vm1083_vm0 = vcmask 257024   ;;  %vm1642_vm4 = vcmask 261120  }
  0x50   : > { %8018 = vsyncadd (%p10878_p8), [#allocation7], 4294964992  ;;  %7306 = vmatprep.subr.bf16.mxu0 %v7780_v0  ;;  %v7783_v3 = vld [vmem:[%s10828_s1 + $0x20] sm:$0xff]   ;;  %v313_v4 = vld [vmem:[%s8215_s15] sm:$0xff]   ;;  %v6512_v25 = vcombine.low %v8043_v24, %v8043_v24  ;;  %v6513_v26 = vcombine.high %v8043_v24, %v8043_v24  ;;  %vm1190_vm1 = vsmask.f32 3328 }
  0x51   : > { %7307 = vmatpush3.bf16.msra.mxu0 %v7780_v0  ;;  %7322 = vmatprep.mubr.bf16.mxu0 %v313_v4  ;;  %v7784_v5 = vld [vmem:[%s10828_s1 + $0x18] sm:$0xff]   ;;  %v7785_v6 = vld [vmem:[%s10828_s1 + $0x10] sm:$0xff]   ;;  %v7786_v7 = vld [vmem:[%s10828_s1 + $0x8] sm:$0xff]   ;;  %vm1191_vm2 = vsmask.f32 7440  ;;  %vm865_vm5 = vcmask 1040384  }
  0x52   : > { %7308 = vmatprep.subr.bf16.mxu0 %v7781_v1  ;;  %v7787_v8 = vld [vmem:[%s10828_s1] sm:$0xff]   ;;  %v317_v10 = vld [vmem:[%s8215_s15 + $0x10] sm:$0xff]   ;;  %v319_v11 = vld [vmem:[%s8215_s15 + $0x18] sm:$0xff]   ;;  %1084 = vst.msk [vmem:[#allocation2] sm:$0xf] %vm1083_vm0, %v6512_v25  ;;  %vm2201_vm8 = vcmask 1042432  }
  0x53   : > { %v315_v9 = vld [vmem:[%s8215_s15 + $0x8] sm:$0xff]   ;;  %v321_v12 = vld [vmem:[%s8215_s15 + $0x20] sm:$0xff]   ;;  %v325_v14 = vld [vmem:[%s8215_s15 + $0x30] sm:$0xff]   ;;  %1085 = vst.msk [vmem:[#allocation2 + $0x4] sm:$0xf] %vm1083_vm0, %v6513_v26  ;;  %vm2202_vm9 = vcmask 1046532  }
  0x54   : > { %v323_v13 = vld [vmem:[%s8215_s15 + $0x28] sm:$0xff]   ;;  %v327_v15 = vld [vmem:[%s8215_s15 + $0x38] sm:$0xff]   ;;  %v329_v16 = vld [vmem:[%s8215_s15 + $0x40] sm:$0xff]   ;;  %1086 = vst.msk [vmem:[#allocation2 + $0x8] sm:$0xf] %vm1083_vm0, %v6512_v25  ;;  %s10721_s14 = scalar_lea.vmem [#allocation8], %s6484_s2 }
  0x55   : > { %7309 = vmatpush3.bf16.msra.mxu0 %v7781_v1  ;;  %v331_v17 = vld [vmem:[%s8215_s15 + $0x48] sm:$0xff]   ;;  %v333_v18 = vld [vmem:[%s8215_s15 + $0x50] sm:$0xff]   ;;  %v335_v19 = vld [vmem:[%s8215_s15 + $0x58] sm:$0xff]   ;;  %1135 = vst.msk [vmem:[#allocation2 + $0xcc] sm:$0xf] %vm1083_vm0, %v6512_v25  ;;  %s7006_s2 = sshll.u32 %s8108_s28, 11 }
  0x56   : > { %7310 = vmatprep.subr.bf16.mxu0 %v7782_v2  ;;  %v337_v20 = vld [vmem:[%s8215_s15 + $0x60] sm:$0xff]   ;;  %v339_v21 = vld [vmem:[%s8215_s15 + $0x68] sm:$0xff]   ;;  %v341_v22 = vld [vmem:[%s8215_s15 + $0x70] sm:$0xff]   ;;  %1136 = vst.msk [vmem:[#allocation2 + $0xd0] sm:$0xf] %vm1083_vm0, %v6513_v26  ;;  %s10780_s16 = scalar_lea.hbm %s10834_s7, %s7006_s2  ;;  %s6380_s11 = scalar_lea.sflag [#allocation5], %s8209_s18 }
  0x57   : > { %v343_v23 = vld [vmem:[%s8215_s15 + $0x78] sm:$0xff]   ;;  %1137 = vst.msk [vmem:[#allocation2 + $0xd4] sm:$0xf] %vm1083_vm0, %v6512_v25  ;;  %v7805_v42 = vld [vmem:[#allocation6 + $0x10] sm:$0xff]   ;;  %vm8278_vm3 = vmor %vm1190_vm1, %vm1191_vm2  ;;  %vm866_vm6 = vsmask.f32 256 }
  0x58   : > { %v7804_v33 = vld [vmem:[#allocation6 + $0x18] sm:$0xff]   ;;  %v8287_v50 = vld [vmem:[#allocation6 + $0x28] sm:$0xff]   ;;  %vm8304_vm7 = vmand %vm865_vm5, %vm866_vm6  ;;  %p11094_p11 = scmp.ne.s32.totalorder %s10871_s22, 0  ;;  %s8044_s28 = smov [#allocation8]  }
  0x59   : > { %7311 = vmatpush3.bf16.msra.mxu0 %v7782_v2  ;;  %v1138_v27 = vld [vmem:[#allocation2] sm:$0xf]  ;;  %7714 = vmatprep.subr.bf16.mxu1 %v7804_v33  ;;  %vm8315_vm10 = vmor %vm2201_vm8, %vm2202_vm9  ;;  %s7973_s29 = sshll.u32 %s8044_s28, 4  ;;  %s7974_s29 = int_to_ptr.vmem [resolvable:$false] %s7973_s29 }
  0x5a   : > { %7312 = vmatprep.subr.bf16.mxu0 %v7783_v3  ;;  %v8271_v28 = vld [vmem:[#allocation2 + $0x4] sm:$0xf]  ;;  %v1194_v29 = vshrl.u32 %v1138_v27, 16  ;;  %v1197_v30 = vshll.u32 %v1138_v27, 16  ;;  %7716 = vmatpush3.bf16.msra.mxu1 %v7804_v33  ;;  %v8296_v53 = vld [vmem:[%s10831_s4] ss:$0 sm:$0xff] }
  0x5b   : > { %v1203_v31 = vshll.u32 %v8271_v28, 16  ;;  %v1207_v32 = vshrl.u32 %v8271_v28, 16  ;;  %v8275_v38 = vld [vmem:[#allocation2 + $0x8] sm:$0x1]  ;;  %7715 = vmatprep.subr.bf16.mxu1 %v7805_v42  ;;  %v8290_v51 = vld [vmem:[#allocation6 + $0x8] sm:$0xff]   ;;  %s7975_s17 = scalar_lea.vmem %s7974_s29, 4096 }
  0x5c   : > { %v1196_v34 = vrot.slane %v1194_v29, 4  ;;  %v1199_v35 = vrot.slane %v1197_v30, 5  ;;  %v1213_v41 = vshll.u32 %v8275_v38, 16 }
  0x5d   : > { %7313 = vmatpush3.bf16.msra.mxu0 %v7783_v3  ;;  %v1205_v36 = vrot.slane %v1203_v31, 5  ;;  %v1209_v37 = vrot.slane %v1207_v32, 4  ;;  %v2153_v3 = vld [vmem:[#allocation2] sm:$0xe] }
  0x5e   : > { %7314 = vmatprep.subr.bf16.mxu0 %v7784_v5  ;;  %v1200_v39 = vor.u32 %v1199_v35, %v1196_v34  ;;  %v1215_v46 = vrot.slane %v1213_v41, 5  ;;  %7717 = vmatpush3.bf16.msra.mxu1 %v7805_v42 }
  0x5f   : > { %v1210_v40 = vor.u32 %v1209_v37, %v1205_v36  ;;  %7390 = vmatprep.subr.bf16.mxu1 %v8290_v51 }
  0x60   : > { %v1201_v44 = vrot.slane %v1200_v39, 4 }
  0x61   : > { %7315 = vmatpush3.bf16.msra.mxu0 %v7784_v5  ;;  %v1211_v45 = vrot.slane %v1210_v40, 4 }
  0x62   : > { %7316 = vmatprep.subr.bf16.mxu0 %v7785_v6  ;;  %v1206_v47 = vsel %vm8278_vm3, %v1201_v44, %v1205_v36 }
  0x63   : > { %v1216_v48 = vsel %vm8278_vm3, %v1211_v45, %v1215_v46 }
  0x64   : > { %v6562_v49 = vcombine.low %v1206_v47, %v1216_v48 }
  0x65   : > { %7317 = vmatpush3.bf16.msra.mxu0 %v7785_v6  ;;  %v2206_v6 = vrot.slane %v8271_v28, 5 }
  0x66   : > { %7318 = vmatprep.subr.bf16.mxu0 %v7786_v7 }
  0x69   : > { %7319 = vmatpush3.bf16.msra.mxu0 %v7786_v7 }
  0x6a   : > { %7320 = vmatprep.subr.bf16.mxu0 %v7787_v8 }
  0x6d   : > { %7321 = vmatpush3.bf16.msra.mxu0 %v7787_v8 }
  0x6e   : > { %7354 = vmatprep.subr.bf16.mxu0 %v7804_v33 }
  0x70   : > { %7323 = vmatmul.mubr.bf16.vlgmr.msra.gmra.mxu0 %v315_v9 }
  0x71   : > { %7326 = vmatprep.mubr.bf16.mxu0 %v317_v10  ;;  %7355 = vmatpush3.bf16.msra.mxu0 %v7804_v33 }
  0x72   : > { %7356 = vmatprep.subr.bf16.mxu0 %v7805_v42 }
  0x75   : > { %7357 = vmatpush3.bf16.msra.mxu0 %v7805_v42 }
  0x76   : > { %7426 = vmatprep.subr.bf16.mxu0 %v8287_v50 }
  0x78   : > { %7327 = vmatmul.mubr.bf16.gmra.mxu0 %v319_v11 }
  0x79   : > { %7330 = vmatprep.mubr.bf16.mxu0 %v321_v12  ;;  %v6630_v12 = vrot.slane %v2153_v3, 9 }
  0x7b   : > { %v8322_v31 = vsel %vm8315_vm10, %v6630_v12, %v2206_v6 }
  0x80   : > { %7331 = vmatmul.mubr.bf16.gmra.mxu0 %v323_v13 }
  0x81   : > { %7334 = vmatprep.mubr.bf16.mxu0 %v325_v14 }
  0x88   : > { %7335 = vmatmul.mubr.bf16.gmra.mxu0 %v327_v15 }
  0x89   : > { %7338 = vmatprep.mubr.bf16.mxu0 %v329_v16 }
  0x90   : > { %7339 = vmatmul.mubr.bf16.gmra.mxu0 %v331_v17 }
  0x91   : > { %7342 = vmatprep.mubr.bf16.mxu0 %v333_v18 }
  0x98   : > { %7343 = vmatmul.mubr.bf16.gmra.mxu0 %v335_v19 }
  0x99   : > { %7346 = vmatprep.mubr.bf16.mxu0 %v337_v20  ;;  %v2208_v20 = vrot.slane %v2206_v6, 4 }
  0xa0   : > { %7347 = vmatmul.mubr.bf16.gmra.mxu0 %v339_v21  ;;  %v2209_v21 = vrot.slane %v8275_v38, 5 }
  0xa1   : > { %7350 = vmatprep.mubr.bf16.mxu0 %v341_v22 }
  0xa2   : > { %v8334_v45 = vsel %vm8315_vm10, %v2208_v20, %v2209_v21 }
  0xa8   : > { %7351 = vmatmul.mubr.bf16.gmra.mxu0 %v343_v23 }
  0xa9   : > { %7358 = vmatprep.mubr.msk.bf16.mxu0 %vm1642_vm4, %v6562_v49 }
 0x130   : > { %v7324_v52 = vpop.f32.mrf.mxu0 }
 0x131   : > { %v555_v55 = vadd.f32 %v7324_v52, %v8296_v53 }
 0x132   : > { %v546_v54 = vpop.f32.mrf.mxu0 }
 0x133   : > { %v547_v57 = vadd.f32 %v8296_v53, %v546_v54  ;;  %v675_v60 = vmax.f32 %v555_v55, 0.0 }
 0x134   : > { %v7325_v56 = vpop.f32.mrf.mxu0 }
 0x135   : > { %v558_v58 = vadd.f32 %v7325_v56, %v8296_v53  ;;  %v673_v0 = vmax.f32 %v547_v57, 0.0 }
 0x136   : > { %v549_v59 = vpop.f32.mrf.mxu0 }
 0x137   : > { %v676_v61 = vmax.f32 %v558_v58, 0.0  ;;  %v550_v62 = vadd.f32 %v8296_v53, %v549_v59 }
 0x138   : > { %v7328_v63 = vpop.f32.mrf.mxu0 }
 0x139   : > { %v706_v1 = vpack.c.bf16 %v676_v61, %v675_v60  ;;  %v674_v2 = vmax.f32 %v550_v62, 0.0  ;;  %v571_v4 = vadd.f32 %v7328_v63, %v8296_v53  ;;  %v6646_v60 = vcombine.low %v8322_v31, %v8334_v45 }
 0x13a   : > { %v562_v5 = vpop.f32.mrf.mxu0 }
 0x13b   : > { %v729_v7 = vshrl.u32 %v706_v1, 16  ;;  %v705_v8 = vpack.c.bf16 %v674_v2, %v673_v0  ;;  %v563_v10 = vadd.f32 %v8296_v53, %v562_v5  ;;  %v732_v14 = vshll.u32 %v706_v1, 16 }
 0x13c   : > { %v7329_v11 = vpop.f32.mrf.mxu0  ;;  %v679_v18 = vmax.f32 %v571_v4, 0.0 }
 0x13d   : > { %v731_v13 = vrot.slane %v729_v7, 7  ;;  %v722_v15 = vshrl.u32 %v705_v8, 16  ;;  %v574_v16 = vadd.f32 %v7329_v11, %v8296_v53  ;;  %v725_v17 = vshll.u32 %v705_v8, 16 }
 0x13e   : > { %v565_v19 = vpop.f32.mrf.mxu0  ;;  %v677_v28 = vmax.f32 %v563_v10, 0.0 }
 0x13f   : > { %v734_v22 = vor.u32 %v732_v14, %v731_v13  ;;  %v885_v23 = vsel %vm8304_vm7, %v731_v13, 0  ;;  %v724_v24 = vrot.slane %v722_v15, 7  ;;  %v680_v25 = vmax.f32 %v574_v16, 0.0 }
 0x140   : > { %v6519_v27 = vcombine.low %v885_v23, %v885_v23  ;;  %v566_v29 = vadd.f32 %v8296_v53, %v565_v19  ;;  %v7332_v30 = vpop.f32.mrf.mxu0 }
 0x141   : > { %v869_v32 = vsel %vm8304_vm7, 0, %v734_v22  ;;  %v727_v33 = vor.u32 %v725_v17, %v724_v24  ;;  %v884_v34 = vsel %vm8304_vm7, %v724_v24, 0  ;;  %v708_v35 = vpack.c.bf16 %v680_v25, %v679_v18 }
 0x142   : > { %v6517_v36 = vcombine.low %v869_v32, %v869_v32  ;;  %v6518_v37 = vcombine.high %v869_v32, %v869_v32  ;;  %1092 = vst.msk [vmem:[#allocation2 + $0x20] sm:$0xf] %vm1083_vm0, %v6519_v27  ;;  %v6516_v38 = vcombine.low %v884_v34, %v884_v34  ;;  %v678_v39 = vmax.f32 %v566_v29, 0.0  ;;  %v578_v40 = vpop.f32.mrf.mxu0 }
 0x143   : > { %v868_v41 = vsel %vm8304_vm7, 0, %v727_v33  ;;  %v743_v42 = vshrl.u32 %v708_v35, 16  ;;  %v587_v44 = vadd.f32 %v7332_v30, %v8296_v53  ;;  %v579_v49 = vadd.f32 %v8296_v53, %v578_v40 }
 0x144   : > { %1090 = vst.msk [vmem:[#allocation2 + $0x18] sm:$0xf] %vm1083_vm0, %v6517_v36  ;;  %1091 = vst.msk [vmem:[#allocation2 + $0x1c] sm:$0xf] %vm1083_vm0, %v6518_v37  ;;  %v6514_v46 = vcombine.low %v868_v41, %v868_v41  ;;  %v6515_v47 = vcombine.high %v868_v41, %v868_v41  ;;  %v707_v48 = vpack.c.bf16 %v678_v39, %v677_v28  ;;  %v7333_v52 = vpop.f32.mrf.mxu0  ;;  %v746_v55 = vshll.u32 %v708_v35, 16 }
 0x145   : > { %1089 = vst.msk [vmem:[#allocation2 + $0x14] sm:$0xf] %vm1083_vm0, %v6516_v38  ;;  %v745_v54 = vrot.slane %v743_v42, 7  ;;  %v590_v56 = vadd.f32 %v7333_v52, %v8296_v53  ;;  %v683_v58 = vmax.f32 %v587_v44, 0.0  ;;  %v681_v4 = vmax.f32 %v579_v49, 0.0 }
 0x146   : > { %1087 = vst.msk [vmem:[#allocation2 + $0xc] sm:$0xf] %vm1083_vm0, %v6514_v46  ;;  %1088 = vst.msk [vmem:[#allocation2 + $0x10] sm:$0xf] %vm1083_vm0, %v6515_v47  ;;  %v736_v57 = vshrl.u32 %v707_v48, 16  ;;  %v581_v59 = vpop.f32.mrf.mxu0  ;;  %v739_v3 = vshll.u32 %v707_v48, 16 }
 0x147   : > { %v748_v61 = vor.u32 %v746_v55, %v745_v54  ;;  %v887_v62 = vsel %vm8304_vm7, %v745_v54, 0  ;;  %v684_v63 = vmax.f32 %v590_v56, 0.0  ;;  %v582_v0 = vadd.f32 %v8296_v53, %v581_v59 }
 0x148   : > { %v6525_v1 = vcombine.low %v887_v62, %v887_v62  ;;  %v738_v2 = vrot.slane %v736_v57, 7  ;;  %v7336_v5 = vpop.f32.mrf.mxu0 }
 0x149   : > { %v871_v6 = vsel %vm8304_vm7, 0, %v748_v61  ;;  %v710_v7 = vpack.c.bf16 %v684_v63, %v683_v58  ;;  %v682_v8 = vmax.f32 %v582_v0, 0.0  ;;  %v603_v10 = vadd.f32 %v7336_v5, %v8296_v53 }
 0x14a   : > { %v6523_v11 = vcombine.low %v871_v6, %v871_v6  ;;  %v6524_v12 = vcombine.high %v871_v6, %v871_v6  ;;  %1098 = vst.msk [vmem:[#allocation2 + $0x38] sm:$0xf] %vm1083_vm0, %v6525_v1  ;;  %v741_v13 = vor.u32 %v739_v3, %v738_v2  ;;  %v886_v14 = vsel %vm8304_vm7, %v738_v2, 0  ;;  %v594_v15 = vpop.f32.mrf.mxu0 }
 0x14b   : > { %v6522_v16 = vcombine.low %v886_v14, %v886_v14  ;;  %v757_v17 = vshrl.u32 %v710_v7, 16  ;;  %v760_v18 = vshll.u32 %v710_v7, 16  ;;  %v709_v19 = vpack.c.bf16 %v682_v8, %v681_v4 }
 0x14c   : > { %v8354_v20 = vld [vmem:[#allocation2 + $0x14] sm:$0x1]  ;;  %1096 = vst.msk [vmem:[#allocation2 + $0x30] sm:$0xf] %vm1083_vm0, %v6523_v11  ;;  %1097 = vst.msk [vmem:[#allocation2 + $0x34] sm:$0xf] %vm1083_vm0, %v6524_v12  ;;  %v595_v23 = vadd.f32 %v8296_v53, %v594_v15  ;;  %v7337_v24 = vpop.f32.mrf.mxu0 }
 0x14d   : > { %v870_v21 = vsel %vm8304_vm7, 0, %v741_v13  ;;  %v687_v22 = vmax.f32 %v603_v10, 0.0  ;;  %v1237_v25 = vshll.u32 %v8354_v20, 16  ;;  %1095 = vst.msk [vmem:[#allocation2 + $0x2c] sm:$0xf] %vm1083_vm0, %v6522_v16  ;;  %v759_v29 = vrot.slane %v757_v17, 7 }
 0x14e   : > { %v6520_v27 = vcombine.low %v870_v21, %v870_v21  ;;  %v6521_v28 = vcombine.high %v870_v21, %v870_v21  ;;  %v750_v30 = vshrl.u32 %v709_v19, 16  ;;  %v1140_v32 = vld [vmem:[#allocation2 + $0xc] sm:$0xf]  ;;  %v753_v33 = vshll.u32 %v709_v19, 16  ;;  %v597_v36 = vpop.f32.mrf.mxu0  ;;  %v8380_v2 = vld [vmem:[#allocation2 + $0x10] sm:$0xf] }
 0x14f   : > { %v685_v34 = vmax.f32 %v595_v23, 0.0  ;;  %v606_v35 = vadd.f32 %v7337_v24, %v8296_v53  ;;  %v1218_v37 = vshrl.u32 %v1140_v32, 16  ;;  %v762_v38 = vor.u32 %v760_v18, %v759_v29 }
 0x150   : > { %1093 = vst.msk [vmem:[#allocation2 + $0x24] sm:$0xf] %vm1083_vm0, %v6520_v27  ;;  %1094 = vst.msk [vmem:[#allocation2 + $0x28] sm:$0xf] %vm1083_vm0, %v6521_v28  ;;  %v889_v39 = vsel %vm8304_vm7, %v759_v29, 0  ;;  %v752_v40 = vrot.slane %v750_v30, 7  ;;  %v598_v41 = vadd.f32 %v8296_v53, %v597_v36  ;;  %v7340_v46 = vpop.f32.mrf.mxu0 }
 0x151   : > { %v6531_v42 = vcombine.low %v889_v39, %v889_v39  ;;  %v688_v44 = vmax.f32 %v606_v35, 0.0  ;;  %v8369_v47 = vrot.slane %v1218_v37, 4  ;;  %v1221_v48 = vshll.u32 %v1140_v32, 16 }
 0x152   : > { %v873_v49 = vsel %vm8304_vm7, 0, %v762_v38  ;;  %v755_v52 = vor.u32 %v753_v33, %v752_v40  ;;  %v888_v54 = vsel %vm8304_vm7, %v752_v40, 0  ;;  %v686_v55 = vmax.f32 %v598_v41, 0.0  ;;  %v610_v61 = vpop.f32.mrf.mxu0 }
 0x153   : > { %v6529_v56 = vcombine.low %v873_v49, %v873_v49  ;;  %v6530_v57 = vcombine.high %v873_v49, %v873_v49  ;;  %1104 = vst.msk [vmem:[#allocation2 + $0x50] sm:$0xf] %vm1083_vm0, %v6531_v42  ;;  %v6528_v58 = vcombine.low %v888_v54, %v888_v54  ;;  %v712_v59 = vpack.c.bf16 %v688_v44, %v687_v22  ;;  %v1142_v49 = vld [vmem:[#allocation2 + $0x18] sm:$0xf] }
 0x154   : > { %v872_v62 = vsel %vm8304_vm7, 0, %v755_v52  ;;  %v711_v63 = vpack.c.bf16 %v686_v55, %v685_v34  ;;  %v619_v0 = vadd.f32 %v7340_v46, %v8296_v53  ;;  %v611_v1 = vadd.f32 %v8296_v53, %v610_v61  ;;  %v7341_v7 = vpop.f32.mrf.mxu0  ;;  %v8407_v52 = vld [vmem:[#allocation2 + $0x1c] sm:$0xf] }
 0x155   : > { %1102 = vst.msk [vmem:[#allocation2 + $0x48] sm:$0xf] %vm1083_vm0, %v6529_v56  ;;  %1103 = vst.msk [vmem:[#allocation2 + $0x4c] sm:$0xf] %vm1083_vm0, %v6530_v57  ;;  %v6526_v3 = vcombine.low %v872_v62, %v872_v62  ;;  %v6527_v4 = vcombine.high %v872_v62, %v872_v62  ;;  %v771_v5 = vshrl.u32 %v712_v59, 16  ;;  %v774_v6 = vshll.u32 %v712_v59, 16 }
 0x156   : > { %1101 = vst.msk [vmem:[#allocation2 + $0x44] sm:$0xf] %vm1083_vm0, %v6528_v58  ;;  %v764_v8 = vshrl.u32 %v711_v63, 16  ;;  %v767_v10 = vshll.u32 %v711_v63, 16  ;;  %v691_v11 = vmax.f32 %v619_v0, 0.0  ;;  %v689_v12 = vmax.f32 %v611_v1, 0.0  ;;  %v613_v15 = vpop.f32.mrf.mxu0 }
 0x157   : > { %1099 = vst.msk [vmem:[#allocation2 + $0x3c] sm:$0xf] %vm1083_vm0, %v6526_v3  ;;  %1100 = vst.msk [vmem:[#allocation2 + $0x40] sm:$0xf] %vm1083_vm0, %v6527_v4  ;;  %v773_v13 = vrot.slane %v771_v5, 7  ;;  %v622_v14 = vadd.f32 %v7341_v7, %v8296_v53  ;;  %v1223_v16 = vrot.slane %v1221_v48, 5  ;;  %v614_v19 = vadd.f32 %v8296_v53, %v613_v15 }
 0x158   : > { %v1227_v17 = vshll.u32 %v8380_v2, 16  ;;  %v766_v18 = vrot.slane %v764_v8, 7  ;;  %v1231_v21 = vshrl.u32 %v8380_v2, 16  ;;  %v8391_v22 = vrot.slane %v1237_v25, 5  ;;  %v7344_v28 = vpop.f32.mrf.mxu0 }
 0x159   : > { %v776_v23 = vor.u32 %v774_v6, %v773_v13  ;;  %v891_v24 = vsel %vm8304_vm7, %v773_v13, 0  ;;  %v692_v27 = vmax.f32 %v622_v14, 0.0  ;;  %v1224_v29 = vor.u32 %v1223_v16, %v8369_v47 }
 0x15a   : > { %v6537_v30 = vcombine.low %v891_v24, %v891_v24  ;;  %v769_v32 = vor.u32 %v767_v10, %v766_v18  ;;  %v890_v33 = vsel %vm8304_vm7, %v766_v18, 0  ;;  %v690_v34 = vmax.f32 %v614_v19, 0.0  ;;  %v626_v38 = vpop.f32.mrf.mxu0  ;;  %v8427_v18 = vld [vmem:[#allocation2 + $0x20] sm:$0x1] }
 0x15b   : > { %v875_v35 = vsel %vm8304_vm7, 0, %v776_v23  ;;  %v6534_v36 = vcombine.low %v890_v33, %v890_v33  ;;  %v714_v25 = vpack.c.bf16 %v692_v27, %v691_v11  ;;  %v8401_v37 = vadd.f32 %v7344_v28, %v8296_v53 }
 0x15c   : > { %v6535_v39 = vcombine.low %v875_v35, %v875_v35  ;;  %v6536_v40 = vcombine.high %v875_v35, %v875_v35  ;;  %1110 = vst.msk [vmem:[#allocation2 + $0x68] sm:$0xf] %vm1083_vm0, %v6537_v30  ;;  %v874_v41 = vsel %vm8304_vm7, 0, %v769_v32  ;;  %v713_v42 = vpack.c.bf16 %v690_v34, %v689_v12  ;;  %v7345_v54 = vpop.f32.mrf.mxu0  ;;  %v8436_v35 = vld [vmem:[#allocation2 + $0x34] sm:$0xf] }
 0x15d   : > { %v6532_v44 = vcombine.low %v874_v41, %v874_v41  ;;  %v6533_v46 = vcombine.high %v874_v41, %v874_v41  ;;  %1107 = vst.msk [vmem:[#allocation2 + $0x5c] sm:$0xf] %vm1083_vm0, %v6534_v36  ;;  %v785_v47 = vshrl.u32 %v714_v25, 16  ;;  %v788_v48 = vshll.u32 %v714_v25, 16 }
 0x15e   : > { %1108 = vst.msk [vmem:[#allocation2 + $0x60] sm:$0xf] %vm1083_vm0, %v6535_v39  ;;  %1109 = vst.msk [vmem:[#allocation2 + $0x64] sm:$0xf] %vm1083_vm0, %v6536_v40  ;;  %v778_v55 = vshrl.u32 %v713_v42, 16  ;;  %v781_v56 = vshll.u32 %v713_v42, 16  ;;  %v8415_v63 = vadd.f32 %v8296_v53, %v626_v38  ;;  %v629_v0 = vpop.f32.mrf.mxu0 }
 0x15f   : > { %v695_v57 = vmax.f32 %v8401_v37, 0.0  ;;  %v1225_v58 = vrot.slane %v1224_v29, 4  ;;  %1105 = vst.msk [vmem:[#allocation2 + $0x54] sm:$0xf] %vm1083_vm0, %v6532_v44  ;;  %1106 = vst.msk [vmem:[#allocation2 + $0x58] sm:$0xf] %vm1083_vm0, %v6533_v46  ;;  %v630_v41 = vadd.f32 %v8296_v53, %v629_v0 }
 0x160   : > { %v787_v59 = vrot.slane %v785_v47, 7  ;;  %v1229_v61 = vrot.slane %v1227_v17, 5  ;;  %v1233_v62 = vrot.slane %v1231_v21, 4  ;;  %v780_v1 = vrot.slane %v778_v55, 7  ;;  %v7348_v21 = vpop.f32.mrf.mxu0  ;;  %v1146_v29 = vld [vmem:[#allocation2 + $0x30] sm:$0xf] }
 0x161   : > { %v1242_v3 = vshrl.u32 %v1142_v49, 16  ;;  %v1245_v4 = vshll.u32 %v1142_v49, 16  ;;  %v1251_v5 = vshll.u32 %v8407_v52, 16  ;;  %v693_v14 = vmax.f32 %v8415_v63, 0.0  ;;  %v7807_v40 = vld [vmem:[#allocation6 + $0x20] sm:$0xff]  }
 0x162   : > { %v790_v6 = vor.u32 %v788_v48, %v787_v59  ;;  %v893_v7 = vsel %vm8304_vm7, %v787_v59, 0  ;;  %v1230_v8 = vsel %vm8278_vm3, %v1225_v58, %v1229_v61  ;;  %v1234_v10 = vor.u32 %v1233_v62, %v1229_v61  ;;  %v8446_v46 = vpop.f32.mrf.mxu0  ;;  %v8449_v55 = vld [vmem:[#allocation2 + $0x38] sm:$0x1] }
 0x163   : > { %v6543_v11 = vcombine.low %v893_v7, %v893_v7  ;;  %v783_v12 = vor.u32 %v781_v56, %v780_v1  ;;  %v892_v13 = vsel %vm8304_vm7, %v780_v1, 0  ;;  %v1244_v19 = vrot.slane %v1242_v3, 4  ;;  %v8456_v3 = vld [vmem:[#allocation6 + $0x48] sm:$0xff]  }
 0x164   : > { %v877_v15 = vsel %vm8304_vm7, 0, %v790_v6  ;;  %v6540_v16 = vcombine.low %v892_v13, %v892_v13  ;;  %v1235_v17 = vrot.slane %v1234_v10, 4  ;;  %v1247_v28 = vrot.slane %v1245_v4, 5 }
 0x165   : > { %v6541_v23 = vcombine.low %v877_v15, %v877_v15  ;;  %v6542_v24 = vcombine.high %v877_v15, %v877_v15  ;;  %1116 = vst.msk [vmem:[#allocation2 + $0x80] sm:$0xf] %vm1083_vm0, %v6543_v11  ;;  %v876_v27 = vsel %vm8304_vm7, 0, %v783_v12  ;;  %v1253_v34 = vrot.slane %v1251_v5, 5 }
 0x166   : > { %v6538_v30 = vcombine.low %v876_v27, %v876_v27  ;;  %v6539_v32 = vcombine.high %v876_v27, %v876_v27  ;;  %1113 = vst.msk [vmem:[#allocation2 + $0x74] sm:$0xf] %vm1083_vm0, %v6540_v16  ;;  %v1240_v33 = vsel %vm8278_vm3, %v1235_v17, %v8391_v22  ;;  %v1248_v25 = vor.u32 %v1247_v28, %v1244_v19  ;;  %v1144_v19 = vld [vmem:[#allocation2 + $0x24] sm:$0xf] }
 0x167   : > { %1114 = vst.msk [vmem:[#allocation2 + $0x78] sm:$0xf] %vm1083_vm0, %v6541_v23  ;;  %1115 = vst.msk [vmem:[#allocation2 + $0x7c] sm:$0xf] %vm1083_vm0, %v6542_v24  ;;  %v6563_v36 = vcombine.low %v1230_v8, %v1240_v33  ;;  %v1255_v38 = vshrl.u32 %v8407_v52, 16  ;;  %v1261_v39 = vshll.u32 %v8427_v18, 16  ;;  %v638_v22 = vadd.f32 %v7345_v54, %v8296_v53  ;;  %v7349_v8 = vpop.f32.mrf.mxu0 }
 0x168   : > { %1111 = vst.msk [vmem:[#allocation2 + $0x6c] sm:$0xf] %vm1083_vm0, %v6538_v30  ;;  %1112 = vst.msk [vmem:[#allocation2 + $0x70] sm:$0xf] %vm1083_vm0, %v6539_v32  ;;  %v1290_v42 = vshrl.u32 %v1146_v29, 16  ;;  %v1293_v44 = vshll.u32 %v1146_v29, 16  ;;  %v8463_v12 = vadd.f32 %v7348_v21, %v8296_v53 }
 0x169   : > { %7359 = vmatmul.mubr.msk.bf16.vlgmr.msra.gmra.mxu0 %vm1642_vm4, %v6563_v36  ;;  %v1249_v47 = vrot.slane %v1248_v25, 4  ;;  %v1257_v48 = vrot.slane %v1255_v38, 4  ;;  %v1263_v49 = vrot.slane %v1261_v39, 5  ;;  %v1299_v56 = vshll.u32 %v8436_v35, 16  ;;  %v645_v29 = vpop.f32.mrf.mxu0 }
 0x16a   : > { %v696_v58 = vmax.f32 %v638_v22, 0.0  ;;  %v694_v59 = vmax.f32 %v630_v41, 0.0  ;;  %v1292_v61 = vrot.slane %v1290_v42, 4  ;;  %v1295_v62 = vrot.slane %v1293_v44, 5  ;;  %7427 = vmatpush3.bf16.msra.mxu0 %v8287_v50  ;;  %v8478_v42 = vld [vmem:[#allocation2 + $0x28] sm:$0xf] }
 0x16b   : > { %v1254_v54 = vsel %vm8278_vm3, %v1249_v47, %v1253_v34  ;;  %v1258_v63 = vor.u32 %v1257_v48, %v1253_v34  ;;  %v1301_v0 = vrot.slane %v1299_v56, 5  ;;  %v1303_v1 = vshrl.u32 %v8436_v35, 16  ;;  %7428 = vmatprep.subr.bf16.mxu0 %v7807_v40  ;;  %v8480_v44 = vld [vmem:[#allocation2 + $0x2c] sm:$0x1] }
 0x16c   : > { %v716_v4 = vpack.c.bf16 %v696_v58, %v695_v57  ;;  %v715_v5 = vpack.c.bf16 %v694_v59, %v693_v14  ;;  %v1296_v6 = vor.u32 %v1295_v62, %v1292_v61  ;;  %v1309_v7 = vshll.u32 %v8449_v55, 16  ;;  %v7352_v59 = vpop.f32.mrf.mxu0 }
 0x16d   : > { %v1259_v10 = vrot.slane %v1258_v63, 4  ;;  %v1305_v50 = vrot.slane %v1303_v1, 4  ;;  %v2237_v11 = vrot.slane %v8449_v55, 5  ;;  %v699_v21 = vmax.f32 %v8463_v12, 0.0 }
 0x16e   : > { %v799_v13 = vshrl.u32 %v716_v4, 16  ;;  %v802_v15 = vshll.u32 %v716_v4, 16  ;;  %v792_v16 = vshrl.u32 %v715_v5, 16  ;;  %v795_v17 = vshll.u32 %v715_v5, 16  ;;  %7429 = vmatpush3.bf16.msra.mxu0 %v7807_v40  ;;  %v8651_v55 = vld [vmem:[#allocation2 + $0x7c] sm:$0xf] }
 0x16f   : > { %v1264_v37 = vsel %vm8278_vm3, %v1259_v10, %v1263_v49  ;;  %v1297_v57 = vrot.slane %v1296_v6, 4  ;;  %v1306_v14 = vor.u32 %v1305_v50, %v1301_v0  ;;  %v1311_v23 = vrot.slane %v1309_v7, 5  ;;  %7498 = vmatprep.subr.bf16.mxu0 %v8456_v3 }
 0x170   : > { %v6564_v24 = vcombine.low %v1254_v54, %v1264_v37  ;;  %v801_v27 = vrot.slane %v799_v13, 7  ;;  %v794_v28 = vrot.slane %v792_v16, 7  ;;  %v1266_v33 = vshrl.u32 %v1144_v19, 16  ;;  %v8503_v13 = vld [vmem:[#allocation2 + $0x40] sm:$0xf] }
 0x171   : > { %v1302_v30 = vsel %vm8278_vm3, %v1297_v57, %v1301_v0  ;;  %v1307_v32 = vrot.slane %v1306_v14, 4  ;;  %v1269_v34 = vshll.u32 %v1144_v19, 16  ;;  %v1148_v0 = vld [vmem:[#allocation2 + $0x3c] sm:$0xf]  ;;  %v1275_v4 = vshll.u32 %v8478_v42, 16 }
 0x172   : > { %7362 = vmatprep.mubr.msk.bf16.mxu0 %vm1642_vm4, %v6564_v24  ;;  %v804_v36 = vor.u32 %v802_v15, %v801_v27  ;;  %v895_v25 = vsel %vm8304_vm7, %v801_v27, 0  ;;  %v797_v38 = vor.u32 %v795_v17, %v794_v28  ;;  %v894_v39 = vsel %vm8304_vm7, %v794_v28, 0  ;;  %v8506_v24 = vld [vmem:[#allocation2 + $0x44] sm:$0x1] }
 0x173   : > { %v6549_v40 = vcombine.low %v895_v25, %v895_v25  ;;  %v6546_v22 = vcombine.low %v894_v39, %v894_v39  ;;  %v1312_v41 = vsel %vm8278_vm3, %v1307_v32, %v1311_v23  ;;  %v1268_v47 = vrot.slane %v1266_v33, 4 }
 0x174   : > { %v879_v48 = vsel %vm8304_vm7, 0, %v804_v36  ;;  %v878_v49 = vsel %vm8304_vm7, 0, %v797_v38  ;;  %v6566_v56 = vcombine.low %v1302_v30, %v1312_v41  ;;  %v1271_v58 = vrot.slane %v1269_v34, 5 }
 0x175   : > { %v6547_v61 = vcombine.low %v879_v48, %v879_v48  ;;  %v6548_v62 = vcombine.high %v879_v48, %v879_v48  ;;  %1122 = vst.msk [vmem:[#allocation2 + $0x98] sm:$0xf] %vm1083_vm0, %v6549_v40  ;;  %v6544_v54 = vcombine.low %v878_v49, %v878_v49  ;;  %v6545_v63 = vcombine.high %v878_v49, %v878_v49 }
 0x176   : > { %1119 = vst.msk [vmem:[#allocation2 + $0x8c] sm:$0xf] %vm1083_vm0, %v6546_v22  ;;  %7366 = vmatprep.mubr.msk.bf16.mxu1 %vm1642_vm4, %v6566_v56  ;;  %v1272_v1 = vor.u32 %v1271_v58, %v1268_v47  ;;  %v1279_v5 = vshrl.u32 %v8478_v42, 16  ;;  %v1285_v6 = vshll.u32 %v8480_v44, 16  ;;  %v643_v7 = vadd.f32 %v8296_v53, %v8446_v46  ;;  %v2154_v47 = vld [vmem:[#allocation2 + $0xc] sm:$0xe] }
 0x177   : > { %1120 = vst.msk [vmem:[#allocation2 + $0x90] sm:$0xf] %vm1083_vm0, %v6547_v61  ;;  %1121 = vst.msk [vmem:[#allocation2 + $0x94] sm:$0xf] %vm1083_vm0, %v6548_v62  ;;  %v654_v10 = vadd.f32 %v7349_v8, %v8296_v53  ;;  %v646_v50 = vadd.f32 %v8296_v53, %v645_v29  ;;  %v8501_v12 = vadd.f32 %v7352_v59, %v8296_v53  ;;  %v1277_v16 = vrot.slane %v1275_v4, 5 }
 0x178   : > { %1117 = vst.msk [vmem:[#allocation2 + $0x84] sm:$0xf] %vm1083_vm0, %v6544_v54  ;;  %1118 = vst.msk [vmem:[#allocation2 + $0x88] sm:$0xf] %vm1083_vm0, %v6545_v63  ;;  %v1273_v15 = vrot.slane %v1272_v1, 4  ;;  %v1281_v17 = vrot.slane %v1279_v5, 4  ;;  %v658_v54 = vpop.f32.mrf.mxu0 }
 0x179   : > { %v1287_v19 = vrot.slane %v1285_v6, 5  ;;  %v697_v37 = vmax.f32 %v643_v7, 0.0  ;;  %v700_v57 = vmax.f32 %v654_v10, 0.0  ;;  %v698_v14 = vmax.f32 %v646_v50, 0.0 }
 0x17a   : > { %v703_v23 = vmax.f32 %v8501_v12, 0.0  ;;  %v1278_v46 = vsel %vm8278_vm3, %v1273_v15, %v1277_v16  ;;  %v1282_v8 = vor.u32 %v1281_v17, %v1277_v16  ;;  %v1314_v27 = vshrl.u32 %v1148_v0, 16  ;;  %v8527_v17 = vld [vmem:[#allocation2 + $0x48] sm:$0xf]  ;;  %v7353_v31 = vpop.f32.mrf.mxu0 }
 0x17b   : > { %v1317_v28 = vshll.u32 %v1148_v0, 16  ;;  %v718_v29 = vpack.c.bf16 %v700_v57, %v699_v21  ;;  %v717_v30 = vpack.c.bf16 %v698_v14, %v697_v37  ;;  %v1323_v32 = vshll.u32 %v8503_v13, 16 }
 0x17c   : > { %v1327_v33 = vshrl.u32 %v8503_v13, 16  ;;  %v1283_v34 = vrot.slane %v1282_v8, 4  ;;  %v1316_v36 = vrot.slane %v1314_v27, 4  ;;  %v1333_v38 = vshll.u32 %v8506_v24, 16 }
 0x17d   : > { %v1319_v25 = vrot.slane %v1317_v28, 5  ;;  %v813_v39 = vshrl.u32 %v718_v29, 16  ;;  %v816_v40 = vshll.u32 %v718_v29, 16  ;;  %v806_v22 = vshrl.u32 %v717_v30, 16  ;;  %v8539_v28 = vld [vmem:[#allocation2 + $0x50] sm:$0x1] }
 0x17e   : > { %v809_v41 = vshll.u32 %v717_v30, 16  ;;  %v1288_v48 = vsel %vm8278_vm3, %v1283_v34, %v1287_v19  ;;  %v1325_v21 = vrot.slane %v1323_v32, 5  ;;  %v1329_v56 = vrot.slane %v1327_v33, 4  ;;  %v2155_v34 = vld [vmem:[#allocation2 + $0x18] sm:$0xe] }
 0x17f   : > { %v1320_v49 = vor.u32 %v1319_v25, %v1316_v36  ;;  %v6565_v58 = vcombine.low %v1278_v46, %v1288_v48  ;;  %v815_v59 = vrot.slane %v813_v39, 7  ;;  %v808_v61 = vrot.slane %v806_v22, 7  ;;  %v8535_v46 = vld [vmem:[#allocation2 + $0x4c] sm:$0xf]  ;;  %v8553_v39 = vld [vmem:[#allocation2 + $0x54] sm:$0xf]  ;;  %v661_v48 = vpop.f32.mrf.mxu0 }
 0x180   : > { %v1335_v62 = vrot.slane %v1333_v38, 5  ;;  %v1330_v0 = vor.u32 %v1329_v56, %v1325_v21  ;;  %v6631_v1 = vrot.slane %v2154_v47, 9  ;;  %v2213_v4 = vrot.slane %v8380_v2, 5 }
 0x181   : > { %v1321_v63 = vrot.slane %v1320_v49, 4  ;;  %7363 = vmatmul.mubr.msk.bf16.gmra.mxu0 %vm1642_vm4, %v6565_v58  ;;  %v818_v5 = vor.u32 %v816_v40, %v815_v59  ;;  %v897_v6 = vsel %vm8304_vm7, %v815_v59, 0  ;;  %v811_v7 = vor.u32 %v809_v41, %v808_v61  ;;  %v7809_v49 = vld [vmem:[#allocation6] sm:$0xff]  }
 0x182   : > { %v896_v10 = vsel %vm8304_vm7, %v808_v61, 0  ;;  %v6555_v50 = vcombine.low %v897_v6, %v897_v6  ;;  %7430 = vmatprep.mubr.msk.bf16.mxu0 %vm1642_vm4, %v6646_v60  ;;  %v1331_v16 = vrot.slane %v1330_v0, 4  ;;  %v2214_v57 = vsel %vm8315_vm10, %v6631_v1, %v2213_v4  ;;  %v8559_v61 = vld [vmem:[#allocation2 + $0x58] sm:$0xf] }
 0x183   : > { %v6552_v15 = vcombine.low %v896_v10, %v896_v10  ;;  %v1326_v2 = vsel %vm8278_vm3, %v1321_v63, %v1325_v21  ;;  %v881_v19 = vsel %vm8304_vm7, 0, %v818_v5  ;;  %v880_v37 = vsel %vm8304_vm7, 0, %v811_v7 }
 0x184   : > { %v2215_v14 = vrot.slane %v2213_v4, 4  ;;  %v6553_v45 = vcombine.low %v881_v19, %v881_v19  ;;  %v6554_v60 = vcombine.high %v881_v19, %v881_v19  ;;  %1128 = vst.msk [vmem:[#allocation2 + $0xb0] sm:$0xf] %vm1083_vm0, %v6555_v50  ;;  %v6550_v8 = vcombine.low %v880_v37, %v880_v37 }
 0x185   : > { %v6551_v27 = vcombine.high %v880_v37, %v880_v37  ;;  %1125 = vst.msk [vmem:[#allocation2 + $0xa4] sm:$0xf] %vm1083_vm0, %v6552_v15  ;;  %v1336_v29 = vsel %vm8278_vm3, %v1331_v16, %v1335_v62  ;;  %v2216_v30 = vrot.slane %v8354_v20, 5  ;;  %v659_v32 = vadd.f32 %v8296_v53, %v658_v54  ;;  %v8561_v62 = vld [vmem:[#allocation6 + $0x38] sm:$0xff]   ;;  %v7812_v54 = vld [vmem:[#allocation6 + $0x40] sm:$0xff]  }
 0x186   : > { %v1338_v33 = vshrl.u32 %v8527_v17, 16  ;;  %1126 = vst.msk [vmem:[#allocation2 + $0xa8] sm:$0xf] %vm1083_vm0, %v6553_v45  ;;  %1127 = vst.msk [vmem:[#allocation2 + $0xac] sm:$0xf] %vm1083_vm0, %v6554_v60  ;;  %v6567_v36 = vcombine.low %v1326_v2, %v1336_v29  ;;  %v1341_v25 = vshll.u32 %v8527_v17, 16  ;;  %v670_v7 = vadd.f32 %v7353_v31, %v8296_v53 }
 0x187   : > { %1123 = vst.msk [vmem:[#allocation2 + $0x9c] sm:$0xf] %vm1083_vm0, %v6550_v8  ;;  %1124 = vst.msk [vmem:[#allocation2 + $0xa0] sm:$0xf] %vm1083_vm0, %v6551_v27  ;;  %v1347_v38 = vshll.u32 %v8535_v46, 16  ;;  %v1351_v20 = vshrl.u32 %v8535_v46, 16  ;;  %v2217_v40 = vsel %vm8315_vm10, %v2215_v14, %v2216_v30  ;;  %v662_v10 = vadd.f32 %v8296_v53, %v661_v48 }
 0x188   : > { %v701_v22 = vmax.f32 %v659_v32, 0.0  ;;  %v1340_v41 = vrot.slane %v1338_v33, 4  ;;  %v1357_v47 = vshll.u32 %v8539_v28, 16  ;;  %7367 = vmatmul.mubr.msk.bf16.vlgmr.msra.gmra.mxu1 %vm1642_vm4, %v6567_v36  ;;  %v6647_v21 = vcombine.low %v2214_v57, %v2217_v40  ;;  %v8576_v53 = vld [vmem:[#allocation2 + $0x5c] sm:$0x1] }
 0x189   : > { %v1343_v56 = vrot.slane %v1341_v25, 5  ;;  %v1349_v58 = vrot.slane %v1347_v38, 5  ;;  %v1353_v59 = vrot.slane %v1351_v20, 4  ;;  %7391 = vmatpush3.bf16.msra.mxu1 %v8290_v51  ;;  %v6632_v0 = vrot.slane %v2155_v34, 9  ;;  %v2156_v27 = vld [vmem:[#allocation2 + $0x24] sm:$0xe] }
 0x18a   : > { %v1359_v63 = vrot.slane %v1357_v47, 5  ;;  %v2220_v1 = vrot.slane %v8407_v52, 5  ;;  %v2223_v4 = vrot.slane %v8427_v18, 5  ;;  %7431 = vmatmul.mubr.msk.bf16.vlgmr.msra.gmra.mxu0 %vm1642_vm4, %v6647_v21  ;;  %v1362_v51 = vshrl.u32 %v8553_v39, 16  ;;  %7392 = vmatprep.subr.bf16.mxu1 %v7809_v49  ;;  %v8589_v20 = vld [vmem:[#allocation2 + $0x60] sm:$0xf] }
 0x18b   : > { %v1344_v5 = vor.u32 %v1343_v56, %v1340_v41  ;;  %v1354_v6 = vor.u32 %v1353_v59, %v1349_v58  ;;  %v1365_v2 = vshll.u32 %v8553_v39, 16  ;;  %7499 = vmatpush3.bf16.msra.mxu0 %v8456_v3  ;;  %v704_v16 = vmax.f32 %v670_v7, 0.0 }
 0x18c   : > { %v2221_v50 = vsel %vm8315_vm10, %v6632_v0, %v2220_v1  ;;  %v2222_v15 = vrot.slane %v2220_v1, 4  ;;  %v702_v19 = vmax.f32 %v662_v10, 0.0  ;;  %7500 = vmatprep.subr.bf16.mxu0 %v7812_v54  ;;  %v1364_v57 = vrot.slane %v1362_v51, 4  ;;  %v8605_v10 = vld [vmem:[#allocation2 + $0x68] sm:$0x1] }
 0x18d   : > { %v1345_v52 = vrot.slane %v1344_v5, 4  ;;  %v1355_v18 = vrot.slane %v1354_v6, 4  ;;  %v1367_v14 = vrot.slane %v1365_v2, 5  ;;  %v1371_v31 = vshll.u32 %v8559_v61, 16  ;;  %7393 = vmatpush3.bf16.msra.mxu1 %v7809_v49 }
 0x18e   : > { %v2224_v37 = vsel %vm8315_vm10, %v2222_v15, %v2223_v4  ;;  %v720_v8 = vpack.c.bf16 %v704_v16, %v703_v23  ;;  %7462 = vmatprep.subr.bf16.mxu1 %v8561_v62  ;;  %v719_v30 = vpack.c.bf16 %v702_v19, %v701_v22  ;;  %v1375_v25 = vshrl.u32 %v8559_v61, 16  ;;  %v8601_v4 = vld [vmem:[#allocation2 + $0x64] sm:$0xf] }
 0x18f   : > { %v1350_v45 = vsel %vm8278_vm3, %v1345_v52, %v1349_v58  ;;  %v1360_v3 = vsel %vm8278_vm3, %v1355_v18, %v1359_v63  ;;  %v6648_v60 = vcombine.low %v2221_v50, %v2224_v37  ;;  %v1368_v32 = vor.u32 %v1367_v14, %v1364_v57  ;;  %7501 = vmatpush3.bf16.msra.mxu0 %v7812_v54  ;;  %v8607_v50 = vld [vmem:[#allocation2 + $0x6c] sm:$0xf] }
 0x190   : > { %v6568_v29 = vcombine.low %v1350_v45, %v1360_v3  ;;  %v1373_v33 = vrot.slane %v1371_v31, 5  ;;  %v827_v34 = vshrl.u32 %v720_v8, 16  ;;  %v830_v36 = vshll.u32 %v720_v8, 16  ;;  %v8619_v3 = vld [vmem:[#allocation2 + $0x70] sm:$0xf] }
 0x191   : > { %7434 = vmatprep.mubr.msk.bf16.mxu0 %vm1642_vm4, %v6648_v60  ;;  %v1381_v38 = vshll.u32 %v8576_v53, 16  ;;  %v820_v12 = vshrl.u32 %v719_v30, 16  ;;  %v823_v23 = vshll.u32 %v719_v30, 16  ;;  %v1369_v40 = vrot.slane %v1368_v32, 4  ;;  %v2158_v30 = vld [vmem:[#allocation2 + $0x3c] sm:$0xe] }
 0x192   : > { %7370 = vmatprep.mubr.msk.bf16.mxu1 %vm1642_vm4, %v6568_v29  ;;  %v6633_v41 = vrot.slane %v2156_v27, 9  ;;  %v829_v22 = vrot.slane %v827_v34, 7  ;;  %v1377_v47 = vrot.slane %v1375_v25, 4  ;;  %v2227_v49 = vrot.slane %v8478_v42, 5  ;;  %v8626_v29 = vld [vmem:[#allocation2 + $0x74] sm:$0x1] }
 0x193   : > { %v1383_v48 = vrot.slane %v1381_v38, 5  ;;  %v822_v21 = vrot.slane %v820_v12, 7  ;;  %v1374_v56 = vsel %vm8278_vm3, %v1369_v40, %v1373_v33  ;;  %v2230_v58 = vrot.slane %v8480_v44, 5  ;;  %v2157_v44 = vld [vmem:[#allocation2 + $0x30] sm:$0xe]  ;;  %v8628_v32 = vld [vmem:[#allocation6 + $0x68] sm:$0xff]  }
 0x194   : > { %v1386_v59 = vshrl.u32 %v8589_v20, 16  ;;  %v832_v54 = vor.u32 %v830_v36, %v829_v22  ;;  %v899_v63 = vsel %vm8304_vm7, %v829_v22, 0  ;;  %v1378_v0 = vor.u32 %v1377_v47, %v1373_v33  ;;  %7570 = vmatprep.subr.bf16.mxu0 %v8628_v32 }
 0x195   : > { %v2228_v1 = vsel %vm8315_vm10, %v6633_v41, %v2227_v49  ;;  %v6561_v5 = vcombine.low %v899_v63, %v899_v63  ;;  %v825_v42 = vor.u32 %v823_v23, %v822_v21  ;;  %v898_v6 = vsel %vm8304_vm7, %v822_v21, 0 }
 0x196   : > { %v2229_v7 = vrot.slane %v2227_v49, 4  ;;  %v883_v15 = vsel %vm8304_vm7, 0, %v832_v54  ;;  %v6558_v51 = vcombine.low %v898_v6, %v898_v6  ;;  %v1379_v2 = vrot.slane %v1378_v0, 4  ;;  %v8648_v6 = vld [vmem:[#allocation2 + $0x78] sm:$0xf] }
 0x197   : > { %v1388_v52 = vrot.slane %v1386_v59, 4  ;;  %v6559_v18 = vcombine.low %v883_v15, %v883_v15  ;;  %v6560_v16 = vcombine.high %v883_v15, %v883_v15  ;;  %1134 = vst.msk [vmem:[#allocation2 + $0xc8] sm:$0xf] %vm1083_vm0, %v6561_v5  ;;  %v882_v19 = vsel %vm8304_vm7, 0, %v825_v42 }
 0x198   : > { %v2231_v37 = vsel %vm8315_vm10, %v2229_v7, %v2230_v58  ;;  %v6556_v57 = vcombine.low %v882_v19, %v882_v19  ;;  %v6557_v14 = vcombine.high %v882_v19, %v882_v19  ;;  %1131 = vst.msk [vmem:[#allocation2 + $0xbc] sm:$0xf] %vm1083_vm0, %v6558_v51  ;;  %v1384_v31 = vsel %vm8278_vm3, %v1379_v2, %v1383_v48 }
 0x199   : > { %v6649_v45 = vcombine.low %v2228_v1, %v2231_v37  ;;  %1132 = vst.msk [vmem:[#allocation2 + $0xc0] sm:$0xf] %vm1083_vm0, %v6559_v18  ;;  %1133 = vst.msk [vmem:[#allocation2 + $0xc4] sm:$0xf] %vm1083_vm0, %v6560_v16  ;;  %v6569_v60 = vcombine.low %v1374_v56, %v1384_v31  ;;  %v1389_v9 = vshll.u32 %v8589_v20, 16  ;;  %v1395_v8 = vshll.u32 %v8601_v4, 16 }
 0x19a   : > { %v1399_v27 = vshrl.u32 %v8601_v4, 16  ;;  %1129 = vst.msk [vmem:[#allocation2 + $0xb4] sm:$0xf] %vm1083_vm0, %v6556_v57  ;;  %1130 = vst.msk [vmem:[#allocation2 + $0xb8] sm:$0xf] %vm1083_vm0, %v6557_v14  ;;  %v1405_v33 = vshll.u32 %v8605_v10, 16 }
 0x19b   : > { %7435 = vmatmul.mubr.msk.bf16.gmra.mxu0 %vm1642_vm4, %v6649_v45  ;;  %v6634_v34 = vrot.slane %v2157_v44, 9  ;;  %v2234_v36 = vrot.slane %v8436_v35, 5  ;;  %v1410_v25 = vshrl.u32 %v8607_v50, 16  ;;  %7371 = vmatmul.mubr.msk.bf16.gmra.mxu1 %vm1642_vm4, %v6569_v60  ;;  %v1391_v38 = vrot.slane %v1389_v9, 5  ;;  %v8659_v16 = vld [vmem:[#allocation2 + $0x80] sm:$0x1] }
 0x19c   : > { %v1397_v12 = vrot.slane %v1395_v8, 5  ;;  %v1401_v23 = vrot.slane %v1399_v27, 4  ;;  %v1413_v40 = vshll.u32 %v8607_v50, 16  ;;  %v1407_v41 = vrot.slane %v1405_v33, 5  ;;  %v2159_v14 = vld [vmem:[#allocation2 + $0x48] sm:$0xe] }
 0x19d   : > { %v2235_v22 = vsel %vm8315_vm10, %v6634_v34, %v2234_v36  ;;  %v2236_v47 = vrot.slane %v2234_v36, 4  ;;  %v1412_v48 = vrot.slane %v1410_v25, 4  ;;  %v1392_v49 = vor.u32 %v1391_v38, %v1388_v52  ;;  %v8668_v8 = vld [vmem:[#allocation2 + $0x84] sm:$0xf]  ;;  %v8675_v34 = vld [vmem:[#allocation2 + $0x88] sm:$0xf] }
 0x19e   : > { %v1402_v21 = vor.u32 %v1401_v23, %v1397_v12  ;;  %v1415_v35 = vrot.slane %v1413_v40, 5  ;;  %v1419_v56 = vshll.u32 %v8619_v3, 16  ;;  %v1423_v59 = vshrl.u32 %v8619_v3, 16 }
 0x19f   : > { %v2238_v58 = vsel %vm8315_vm10, %v2236_v47, %v2237_v11  ;;  %v1429_v54 = vshll.u32 %v8626_v29, 16  ;;  %v6635_v63 = vrot.slane %v2158_v30, 9  ;;  %v1393_v0 = vrot.slane %v1392_v49, 4  ;;  %v8679_v47 = vld [vmem:[#allocation2 + $0x8c] sm:$0x1] }
 0x1a0   : > { %v1403_v1 = vrot.slane %v1402_v21, 4  ;;  %v6650_v5 = vcombine.low %v2235_v22, %v2238_v58  ;;  %v1416_v42 = vor.u32 %v1415_v35, %v1412_v48  ;;  %v1421_v7 = vrot.slane %v1419_v56, 5  ;;  %v2160_v56 = vld [vmem:[#allocation2 + $0x54] sm:$0xe] }
 0x1a1   : > { %v1425_v44 = vrot.slane %v1423_v59, 4  ;;  %v1431_v15 = vrot.slane %v1429_v54, 5  ;;  %v2241_v51 = vrot.slane %v8503_v13, 5  ;;  %v1398_v11 = vsel %vm8278_vm3, %v1393_v0, %v1397_v12 }
 0x1a2   : > { %v1408_v2 = vsel %vm8278_vm3, %v1403_v1, %v1407_v41  ;;  %7438 = vmatprep.mubr.msk.bf16.mxu0 %vm1642_vm4, %v6650_v5  ;;  %v1417_v52 = vrot.slane %v1416_v42, 4  ;;  %v2244_v18 = vrot.slane %v8506_v24, 5  ;;  %v1434_v45 = vshrl.u32 %v8648_v6, 16 }
 0x1a3   : > { %v6570_v19 = vcombine.low %v1398_v11, %v1408_v2  ;;  %v1426_v37 = vor.u32 %v1425_v44, %v1421_v7  ;;  %v2242_v13 = vsel %vm8315_vm10, %v6635_v63, %v2241_v51  ;;  %v2243_v57 = vrot.slane %v2241_v51, 4  ;;  %v8693_v11 = vld [vmem:[#allocation2 + $0x94] sm:$0xf] }
 0x1a4   : > { %v1422_v31 = vsel %vm8278_vm3, %v1417_v52, %v1421_v7  ;;  %v1437_v60 = vshll.u32 %v8648_v6, 16  ;;  %v1443_v9 = vshll.u32 %v8651_v55, 16  ;;  %v1447_v30 = vshrl.u32 %v8651_v55, 16  ;;  %v8691_v7 = vld [vmem:[#allocation2 + $0x90] sm:$0xf] }
 0x1a5   : > { %7374 = vmatprep.mubr.msk.bf16.mxu1 %vm1642_vm4, %v6570_v19  ;;  %v1427_v24 = vrot.slane %v1426_v37, 4  ;;  %v2245_v27 = vsel %vm8315_vm10, %v2243_v57, %v2244_v18  ;;  %v1453_v33 = vshll.u32 %v8659_v16, 16  ;;  %v1436_v25 = vrot.slane %v1434_v45, 4 }
 0x1a6   : > { %v6651_v36 = vcombine.low %v2242_v13, %v2245_v27  ;;  %v1439_v38 = vrot.slane %v1437_v60, 5  ;;  %v1445_v12 = vrot.slane %v1443_v9, 5  ;;  %v1449_v40 = vrot.slane %v1447_v30, 4 }
 0x1a7   : > { %v1432_v23 = vsel %vm8278_vm3, %v1427_v24, %v1431_v15  ;;  %v1455_v41 = vrot.slane %v1453_v33, 5  ;;  %v6636_v22 = vrot.slane %v2159_v14, 9  ;;  %v2248_v21 = vrot.slane %v8535_v46, 5 }
 0x1a8   : > { %v6571_v48 = vcombine.low %v1422_v31, %v1432_v23  ;;  %7439 = vmatmul.mubr.msk.bf16.gmra.mxu0 %vm1642_vm4, %v6651_v36  ;;  %v1440_v49 = vor.u32 %v1439_v38, %v1436_v25  ;;  %v2251_v35 = vrot.slane %v8539_v28, 5  ;;  %v1450_v58 = vor.u32 %v1449_v40, %v1445_v12  ;;  %v8702_v31 = vld [vmem:[#allocation2 + $0x98] sm:$0x1]  ;;  %v2161_v25 = vld [vmem:[#allocation2 + $0x60] sm:$0xe] }
 0x1a9   : > { %v1458_v59 = vshrl.u32 %v8668_v8, 16  ;;  %v1461_v54 = vshll.u32 %v8668_v8, 16  ;;  %v1467_v63 = vshll.u32 %v8675_v34, 16  ;;  %v2249_v1 = vsel %vm8315_vm10, %v6636_v22, %v2248_v21 }
 0x1aa   : > { %7375 = vmatmul.mubr.msk.bf16.gmra.mxu1 %vm1642_vm4, %v6571_v48  ;;  %v1441_v0 = vrot.slane %v1440_v49, 4  ;;  %v2250_v5 = vrot.slane %v2248_v21, 4  ;;  %v1471_v42 = vshrl.u32 %v8675_v34, 16  ;;  %v1451_v28 = vrot.slane %v1450_v58, 4  ;;  %v8718_v21 = vld [vmem:[#allocation2 + $0xa0] sm:$0xf] }
 0x1ab   : > { %v1460_v44 = vrot.slane %v1458_v59, 4  ;;  %v1463_v15 = vrot.slane %v1461_v54, 5  ;;  %v1469_v51 = vrot.slane %v1467_v63, 5  ;;  %v1477_v19 = vshll.u32 %v8679_v47, 16 }
 0x1ac   : > { %v1446_v2 = vsel %vm8278_vm3, %v1441_v0, %v1445_v12  ;;  %v2252_v52 = vsel %vm8315_vm10, %v2250_v5, %v2251_v35  ;;  %v1473_v18 = vrot.slane %v1471_v42, 4  ;;  %v1456_v37 = vsel %vm8278_vm3, %v1451_v28, %v1455_v41  ;;  %v8713_v41 = vld [vmem:[#allocation2 + $0x9c] sm:$0xf]  ;;  %v8725_v5 = vld [vmem:[#allocation2 + $0xa4] sm:$0x1] }
 0x1ad   : > { %v6652_v13 = vcombine.low %v2249_v1, %v2252_v52  ;;  %v1464_v57 = vor.u32 %v1463_v15, %v1460_v44  ;;  %v6637_v14 = vrot.slane %v2160_v56, 9  ;;  %v6572_v45 = vcombine.low %v1446_v2, %v1456_v37 }
 0x1ae   : > { %v1474_v60 = vor.u32 %v1473_v18, %v1469_v51  ;;  %v1479_v9 = vrot.slane %v1477_v19, 5  ;;  %v2255_v24 = vrot.slane %v8559_v61, 5  ;;  %v2258_v30 = vrot.slane %v8576_v53, 5 }
 0x1af   : > { %7442 = vmatprep.mubr.msk.bf16.mxu0 %vm1642_vm4, %v6652_v13  ;;  %v1465_v27 = vrot.slane %v1464_v57, 4  ;;  %v1482_v33 = vshrl.u32 %v8691_v7, 16  ;;  %v1485_v36 = vshll.u32 %v8691_v7, 16  ;;  %7378 = vmatprep.mubr.msk.bf16.mxu1 %vm1642_vm4, %v6572_v45  ;;  %v1491_v40 = vshll.u32 %v8693_v11, 16 }
 0x1b0   : > { %v1475_v38 = vrot.slane %v1474_v60, 4  ;;  %v2256_v12 = vsel %vm8315_vm10, %v6637_v14, %v2255_v24  ;;  %v2257_v23 = vrot.slane %v2255_v24, 4  ;;  %v1495_v49 = vshrl.u32 %v8693_v11, 16 }
 0x1b1   : > { %v1470_v22 = vsel %vm8278_vm3, %v1465_v27, %v1469_v51  ;;  %v1484_v53 = vrot.slane %v1482_v33, 4  ;;  %v1487_v48 = vrot.slane %v1485_v36, 5  ;;  %v1493_v58 = vrot.slane %v1491_v40, 5  ;;  %v2162_v51 = vld [vmem:[#allocation2 + $0x6c] sm:$0xe] }
 0x1b2   : > { %v1480_v35 = vsel %vm8278_vm3, %v1475_v38, %v1479_v9  ;;  %v2259_v56 = vsel %vm8315_vm10, %v2257_v23, %v2258_v30  ;;  %v1501_v59 = vshll.u32 %v8702_v31, 16  ;;  %v1497_v1 = vrot.slane %v1495_v49, 4  ;;  %v8741_v27 = vld [vmem:[#allocation2 + $0xac] sm:$0xf] }
 0x1b3   : > { %v6573_v54 = vcombine.low %v1470_v22, %v1480_v35  ;;  %v6653_v63 = vcombine.low %v2256_v12, %v2259_v56  ;;  %v1488_v0 = vor.u32 %v1487_v48, %v1484_v53  ;;  %v6638_v28 = vrot.slane %v2161_v25, 9  ;;  %v8749_v35 = vld [vmem:[#allocation2 + $0xb0] sm:$0x1] }
 0x1b4   : > { %v1503_v42 = vrot.slane %v1501_v59, 5  ;;  %v2262_v44 = vrot.slane %v8601_v4, 5  ;;  %v2265_v15 = vrot.slane %v8605_v10, 5  ;;  %v1498_v52 = vor.u32 %v1497_v1, %v1493_v58  ;;  %v8737_v10 = vld [vmem:[#allocation2 + $0xa8] sm:$0xf] }
 0x1b5   : > { %7379 = vmatmul.mubr.msk.bf16.gmra.mxu1 %vm1642_vm4, %v6573_v54  ;;  %7443 = vmatmul.mubr.msk.bf16.gmra.mxu0 %vm1642_vm4, %v6653_v63  ;;  %v1489_v2 = vrot.slane %v1488_v0, 4  ;;  %v1506_v18 = vshrl.u32 %v8713_v41, 16  ;;  %v1509_v19 = vshll.u32 %v8713_v41, 16  ;;  %v1515_v57 = vshll.u32 %v8718_v21, 16  ;;  %v2163_v63 = vld [vmem:[#allocation2 + $0x78] sm:$0xe] }
 0x1b6   : > { %v2263_v37 = vsel %vm8315_vm10, %v6638_v28, %v2262_v44  ;;  %v2264_v13 = vrot.slane %v2262_v44, 4  ;;  %v1519_v14 = vshrl.u32 %v8718_v21, 16  ;;  %v1499_v60 = vrot.slane %v1498_v52, 4  ;;  %v8759_v44 = vld [vmem:[#allocation2 + $0xb4] sm:$0xf] }
 0x1b7   : > { %v1494_v45 = vsel %vm8278_vm3, %v1489_v2, %v1493_v58  ;;  %v1508_v9 = vrot.slane %v1506_v18, 4  ;;  %v1511_v24 = vrot.slane %v1509_v19, 5  ;;  %v1517_v33 = vrot.slane %v1515_v57, 5 }
 0x1b8   : > { %v2266_v30 = vsel %vm8315_vm10, %v2264_v13, %v2265_v15  ;;  %v1521_v36 = vrot.slane %v1519_v14, 4  ;;  %v1525_v25 = vshll.u32 %v8725_v5, 16  ;;  %v1504_v38 = vsel %vm8278_vm3, %v1499_v60, %v1503_v42  ;;  %v8769_v13 = vld [vmem:[#allocation2 + $0xb8] sm:$0xf] }
 0x1b9   : > { %v6654_v12 = vcombine.low %v2263_v37, %v2266_v30  ;;  %v1512_v23 = vor.u32 %v1511_v24, %v1508_v9  ;;  %v6639_v40 = vrot.slane %v2162_v51, 9  ;;  %v6574_v22 = vcombine.low %v1494_v45, %v1504_v38  ;;  %v8775_v38 = vld [vmem:[#allocation2 + $0xbc] sm:$0x1] }
 0x1ba   : > { %v1522_v53 = vor.u32 %v1521_v36, %v1517_v33  ;;  %v1527_v48 = vrot.slane %v1525_v25, 5  ;;  %v2269_v49 = vrot.slane %v8619_v3, 5  ;;  %v2272_v58 = vrot.slane %v8626_v29, 5 }
 0x1bb   : > { %7446 = vmatprep.mubr.msk.bf16.mxu0 %vm1642_vm4, %v6654_v12  ;;  %v1513_v56 = vrot.slane %v1512_v23, 4  ;;  %v1530_v59 = vshrl.u32 %v8737_v10, 16  ;;  %v1533_v54 = vshll.u32 %v8737_v10, 16  ;;  %7382 = vmatprep.mubr.msk.bf16.mxu1 %vm1642_vm4, %v6574_v22  ;;  %v1539_v28 = vshll.u32 %v8741_v27, 16 }
 0x1bc   : > { %v1523_v0 = vrot.slane %v1522_v53, 4  ;;  %v2270_v1 = vsel %vm8315_vm10, %v6639_v40, %v2269_v49  ;;  %v2271_v42 = vrot.slane %v2269_v49, 4  ;;  %v1543_v2 = vshrl.u32 %v8741_v27, 16 }
 0x1bd   : > { %v1518_v15 = vsel %vm8278_vm3, %v1513_v56, %v1517_v33  ;;  %v1532_v29 = vrot.slane %v1530_v59, 4  ;;  %v1535_v51 = vrot.slane %v1533_v54, 5  ;;  %v1541_v19 = vrot.slane %v1539_v28, 5 }
 0x1be   : > { %v1528_v52 = vsel %vm8278_vm3, %v1523_v0, %v1527_v48  ;;  %v2273_v18 = vsel %vm8315_vm10, %v2271_v42, %v2272_v58  ;;  %v1549_v37 = vshll.u32 %v8749_v35, 16  ;;  %v1545_v60 = vrot.slane %v1543_v2, 4  ;;  %v2164_v48 = vld [vmem:[#allocation2 + $0x84] sm:$0xe]  ;;  %v2165_v42 = vld [vmem:[#allocation2 + $0x90] sm:$0xe] }
 0x1bf   : > { %v6575_v57 = vcombine.low %v1518_v15, %v1528_v52  ;;  %v6655_v14 = vcombine.low %v2270_v1, %v2273_v18  ;;  %v1536_v45 = vor.u32 %v1535_v51, %v1532_v29  ;;  %v6640_v24 = vrot.slane %v2163_v63, 9 }
 0x1c0   : > { %v1551_v9 = vrot.slane %v1549_v37, 5  ;;  %v2276_v30 = vrot.slane %v8651_v55, 5  ;;  %v2279_v33 = vrot.slane %v8659_v16, 5  ;;  %v1546_v25 = vor.u32 %v1545_v60, %v1541_v19  ;;  %v2166_v60 = vld [vmem:[#allocation2 + $0x9c] sm:$0xe] }
 0x1c1   : > { %7383 = vmatmul.mubr.msk.bf16.gmra.mxu1 %vm1642_vm4, %v6575_v57  ;;  %7447 = vmatmul.mubr.msk.bf16.gmra.mxu0 %vm1642_vm4, %v6655_v14  ;;  %v1537_v36 = vrot.slane %v1536_v45, 4  ;;  %v1554_v12 = vshrl.u32 %v8759_v44, 16  ;;  %v1557_v23 = vshll.u32 %v8759_v44, 16  ;;  %v1563_v53 = vshll.u32 %v8769_v13, 16 }
 0x1c2   : > { %v2277_v40 = vsel %vm8315_vm10, %v6640_v24, %v2276_v30  ;;  %v2278_v22 = vrot.slane %v2276_v30, 4  ;;  %v1567_v16 = vshrl.u32 %v8769_v13, 16  ;;  %v1547_v56 = vrot.slane %v1546_v25, 4 }
 0x1c3   : > { %v1542_v49 = vsel %vm8278_vm3, %v1537_v36, %v1541_v19  ;;  %v1556_v58 = vrot.slane %v1554_v12, 4  ;;  %v1559_v59 = vrot.slane %v1557_v23, 5  ;;  %v1565_v63 = vrot.slane %v1563_v53, 5  ;;  %v7881_v12 = vld [vmem:[#allocation2] sm:$0xf] }
 0x1c4   : > { %v2280_v54 = vsel %vm8315_vm10, %v2278_v22, %v2279_v33  ;;  %v1569_v0 = vrot.slane %v1567_v16, 4  ;;  %v1573_v1 = vshll.u32 %v8775_v38, 16  ;;  %v1552_v28 = vsel %vm8278_vm3, %v1547_v56, %v1551_v9  ;;  %v7882_v23 = vld [vmem:[#allocation2 + $0x4] sm:$0xf]  ;;  %v2167_v22 = vld [vmem:[#allocation2 + $0xa8] sm:$0xe] }
 0x1c5   : > { %v6656_v15 = vcombine.low %v2277_v40, %v2280_v54  ;;  %v1560_v29 = vor.u32 %v1559_v59, %v1556_v58  ;;  %v6641_v51 = vrot.slane %v2164_v48, 9  ;;  %v6576_v2 = vcombine.low %v1542_v49, %v1552_v28  ;;  %v8806_v48 = vld [vmem:[#allocation2 + $0xc] sm:$0xf]  ;;  %v7885_v28 = vld [vmem:[#allocation2 + $0x18] sm:$0xf] }
 0x1c6   : > { %v1570_v52 = vor.u32 %v1569_v0, %v1565_v63  ;;  %v1575_v18 = vrot.slane %v1573_v1, 5  ;;  %v2283_v19 = vrot.slane %v8675_v34, 5  ;;  %v2286_v57 = vrot.slane %v8679_v47, 5  ;;  %v2168_v0 = vld [vmem:[#allocation2 + $0xb4] sm:$0xe] }
 0x1c7   : > { %7450 = vmatprep.mubr.msk.bf16.mxu0 %vm1642_vm4, %v6656_v15  ;;  %v1561_v37 = vrot.slane %v1560_v29, 4  ;;  %v6642_v14 = vrot.slane %v2165_v42, 9  ;;  %v2290_v45 = vrot.slane %v8693_v11, 5  ;;  %7386 = vmatprep.mubr.msk.bf16.mxu1 %vm1642_vm4, %v6576_v2  ;;  %v2293_v33 = vrot.slane %v8702_v31, 5  ;;  %v8808_v31 = vld [vmem:[#allocation2 + $0x10] sm:$0xf] }
 0x1c8   : > { %v1571_v9 = vrot.slane %v1570_v52, 4  ;;  %v2284_v24 = vsel %vm8315_vm10, %v6641_v51, %v2283_v19  ;;  %v2285_v30 = vrot.slane %v2283_v19, 4  ;;  %v6596_v40 = vcombine.low %v7881_v12, %v7882_v23  ;;  %v7886_v15 = vld [vmem:[#allocation2 + $0x1c] sm:$0xf]  ;;  %v2995_v12 = vld [vmem:[#allocation2 + $0x14] sm:$0x1] }
 0x1c9   : > { %v1566_v36 = vsel %vm8278_vm3, %v1561_v37, %v1565_v63  ;;  %v2291_v25 = vsel %vm8315_vm10, %v6642_v14, %v2290_v45  ;;  %v2292_v47 = vrot.slane %v2290_v45, 4  ;;  %v6597_v49 = vcombine.low %v8806_v48, %v8808_v31  ;;  %v2993_v37 = vld [vmem:[#allocation2 + $0xc] sm:$0xf] }
 0x1ca   : > { %v1576_v53 = vsel %vm8278_vm3, %v1571_v9, %v1575_v18  ;;  %v2287_v16 = vsel %vm8315_vm10, %v2285_v30, %v2286_v57  ;;  %v6643_v56 = vrot.slane %v2166_v60, 9  ;;  %v2297_v63 = vrot.slane %v8718_v21, 5  ;;  %v8826_v57 = vld [vmem:[#allocation2 + $0x28] sm:$0xf] }
 0x1cb   : > { %v6577_v58 = vcombine.low %v1566_v36, %v1576_v53  ;;  %v6657_v59 = vcombine.low %v2284_v24, %v2287_v16  ;;  %v2294_v54 = vsel %vm8315_vm10, %v2292_v47, %v2293_v33  ;;  %v2300_v42 = vrot.slane %v8725_v5, 5  ;;  %v8824_v5 = vld [vmem:[#allocation2 + $0x24] sm:$0xf]  ;;  %v2994_v24 = vld [vmem:[#allocation2 + $0x10] sm:$0xf] }
 0x1cc   : > { %v6658_v1 = vcombine.low %v2291_v25, %v2294_v54  ;;  %v6598_v29 = vcombine.low %v7885_v28, %v7886_v15  ;;  %v6644_v51 = vrot.slane %v2167_v22, 9  ;;  %v2298_v2 = vsel %vm8315_vm10, %v6643_v56, %v2297_v63  ;;  %v8836_v36 = vld [vmem:[#allocation2 + $0x30] sm:$0xf]  ;;  %v8838_v25 = vld [vmem:[#allocation2 + $0x34] sm:$0xf] }
 0x1cd   : > { %7387 = vmatmul.mubr.msk.bf16.gmra.mxu1 %vm1642_vm4, %v6577_v58  ;;  %7451 = vmatmul.mubr.msk.bf16.gmra.mxu0 %vm1642_vm4, %v6657_v59  ;;  %v2299_v52 = vrot.slane %v2297_v63, 4  ;;  %v2304_v18 = vrot.slane %v8741_v27, 5  ;;  %v2307_v19 = vrot.slane %v8749_v35, 5  ;;  %v6599_v14 = vcombine.low %v8824_v5, %v8826_v57  ;;  %v2996_v56 = vld [vmem:[#allocation2 + $0x18] sm:$0xf] }
 0x1ce   : > { %7454 = vmatprep.mubr.msk.bf16.mxu0 %vm1642_vm4, %v6658_v1  ;;  %7394 = vmatprep.mubr.msk.bf16.mxu1 %vm1642_vm4, %v6596_v40  ;;  %v6645_v45 = vrot.slane %v2168_v0, 9  ;;  %v2311_v60 = vrot.slane %v8769_v13, 5  ;;  %v2314_v9 = vrot.slane %v8775_v38, 5  ;;  %v6600_v47 = vcombine.low %v8836_v36, %v8838_v25  ;;  %v2997_v0 = vld [vmem:[#allocation2 + $0x1c] sm:$0xf] }
 0x1cf   : > { %v2301_v35 = vsel %vm8315_vm10, %v2299_v52, %v2300_v42  ;;  %v2305_v30 = vsel %vm8315_vm10, %v6644_v51, %v2304_v18  ;;  %v2306_v33 = vrot.slane %v2304_v18, 4  ;;  %v3042_v22 = vshrl.u32 %v2993_v37, 16  ;;  %v2998_v51 = vld [vmem:[#allocation2 + $0x20] sm:$0x1]  ;;  %v8854_v18 = vld [vmem:[#allocation2 + $0x3c] sm:$0xf] }
 0x1d0   : > { %v6659_v23 = vcombine.low %v2298_v2, %v2301_v35  ;;  %v8844_v38 = vsel %vm8315_vm10, %v6645_v45, %v2311_v60  ;;  %v2313_v40 = vrot.slane %v2311_v60, 4  ;;  %v3045_v16 = vshll.u32 %v2993_v37, 16  ;;  %v7815_v2 = vld [vmem:[#allocation6 + $0x30] sm:$0xff]  }
 0x1d1   : > { %v2308_v53 = vsel %vm8315_vm10, %v2306_v33, %v2307_v19  ;;  %v3051_v48 = vshll.u32 %v2994_v24, 16  ;;  %v3055_v31 = vshrl.u32 %v2994_v24, 16  ;;  %v3044_v54 = vrot.slane %v3042_v22, 4  ;;  %v8856_v19 = vld [vmem:[#allocation2 + $0x40] sm:$0xf] }
 0x1d2   : > { %v6660_v58 = vcombine.low %v2305_v30, %v2308_v53  ;;  %v8850_v59 = vsel %vm8315_vm10, %v2313_v40, %v2314_v9  ;;  %v3061_v63 = vshll.u32 %v2995_v12, 16  ;;  %v3047_v42 = vrot.slane %v3045_v16, 5  ;;  %v2999_v33 = vld [vmem:[#allocation2 + $0x24] sm:$0xf]  ;;  %v3000_v53 = vld [vmem:[#allocation2 + $0x28] sm:$0xf] }
 0x1d3   : > { %v6661_v1 = vcombine.low %v8844_v38, %v8850_v59  ;;  %v3053_v28 = vrot.slane %v3051_v48, 5  ;;  %v3057_v15 = vrot.slane %v3055_v31, 4  ;;  %v6601_v37 = vcombine.low %v8854_v18, %v8856_v19  ;;  %v8867_v31 = vld [vmem:[#allocation6 + $0x58] sm:$0xff]   ;;  %v3001_v59 = vld [vmem:[#allocation2 + $0x2c] sm:$0x1] }
 0x1d4   : > { %v3063_v52 = vrot.slane %v3061_v63, 5  ;;  %v3066_v45 = vshrl.u32 %v2996_v56, 16  ;;  %v3069_v60 = vshll.u32 %v2996_v56, 16  ;;  %v3048_v9 = vor.u32 %v3047_v42, %v3044_v54 }
 0x1d5   : > { %7395 = vmatmul.mubr.msk.bf16.vlgmr.msra.gmra.mxu1 %vm1642_vm4, %v6597_v49  ;;  %7455 = vmatmul.mubr.msk.bf16.gmra.mxu0 %vm1642_vm4, %v6659_v23  ;;  %v3058_v24 = vor.u32 %v3057_v15, %v3053_v28  ;;  %v3075_v35 = vshll.u32 %v2997_v0, 16  ;;  %v3079_v30 = vshrl.u32 %v2997_v0, 16  ;;  %v3085_v40 = vshll.u32 %v2998_v51, 16  ;;  %v3002_v15 = vld [vmem:[#allocation2 + $0x30] sm:$0xf] }
 0x1d6   : > { %7463 = vmatpush3.bf16.msra.mxu1 %v8561_v62  ;;  %7398 = vmatprep.mubr.msk.bf16.mxu1 %vm1642_vm4, %v6598_v29  ;;  %v3068_v12 = vrot.slane %v3066_v45, 4  ;;  %v3071_v38 = vrot.slane %v3069_v60, 5  ;;  %v6602_v22 = vcombine.low %v8527_v17, %v8535_v46  ;;  %v3049_v49 = vrot.slane %v3048_v9, 4 }
 0x1d7   : > { %7458 = vmatprep.mubr.msk.bf16.mxu0 %vm1642_vm4, %v6660_v58  ;;  %v3059_v23 = vrot.slane %v3058_v24, 4  ;;  %v3077_v16 = vrot.slane %v3075_v35, 5  ;;  %v3081_v48 = vrot.slane %v3079_v30, 4  ;;  %7464 = vmatprep.subr.bf16.mxu1 %v7815_v2  ;;  %v3087_v62 = vrot.slane %v3085_v40, 5  ;;  %v8880_v40 = vld [vmem:[#allocation2 + $0x38] sm:$0x1] }
 0x1d8   : > { %v3072_v56 = vor.u32 %v3071_v38, %v3068_v12  ;;  %v3090_v29 = vshrl.u32 %v2999_v33, 16  ;;  %v3093_v54 = vshll.u32 %v2999_v33, 16  ;;  %v3054_v63 = vsel %vm8278_vm3, %v3049_v49, %v3053_v28  ;;  %v8873_v38 = vld [vmem:[#allocation2 + $0x34] sm:$0xf] }
 0x1d9   : > { %v3064_v0 = vsel %vm8278_vm3, %v3059_v23, %v3063_v52  ;;  %v3082_v42 = vor.u32 %v3081_v48, %v3077_v16  ;;  %v3099_v58 = vshll.u32 %v3000_v53, 16  ;;  %v3103_v30 = vshrl.u32 %v3000_v53, 16  ;;  %v3005_v48 = vld [vmem:[#allocation2 + $0x3c] sm:$0xf] }
 0x1da   : > { %v6714_v51 = vcombine.low %v3054_v63, %v3064_v0  ;;  %v3073_v45 = vrot.slane %v3072_v56, 4  ;;  %v3092_v60 = vrot.slane %v3090_v29, 4  ;;  %v3095_v9 = vrot.slane %v3093_v54, 5  ;;  %7465 = vmatpush3.bf16.msra.mxu1 %v7815_v2  ;;  %v8897_v54 = vld [vmem:[#allocation2 + $0x40] sm:$0xf] }
 0x1db   : > { %v3083_v24 = vrot.slane %v3082_v42, 4  ;;  %v3101_v35 = vrot.slane %v3099_v58, 5  ;;  %v3109_v12 = vshll.u32 %v3001_v59, 16  ;;  %7534 = vmatprep.subr.bf16.mxu1 %v8867_v31  ;;  %v6603_v33 = vcombine.low %v8553_v39, %v8559_v61  ;;  %v8903_v63 = vld [vmem:[#allocation2 + $0x44] sm:$0x1] }
 0x1dc   : > { %v3078_v28 = vsel %vm8278_vm3, %v3073_v45, %v3077_v16  ;;  %v3096_v52 = vor.u32 %v3095_v9, %v3092_v60  ;;  %v3114_v49 = vshrl.u32 %v3002_v15, 16  ;;  %v3105_v53 = vrot.slane %v3103_v30, 4 }
 0x1dd   : > { %7399 = vmatmul.mubr.msk.bf16.gmra.mxu1 %vm1642_vm4, %v6599_v14  ;;  %7459 = vmatmul.mubr.msk.bf16.gmra.mxu0 %vm1642_vm4, %v6661_v1  ;;  %v3088_v2 = vsel %vm8278_vm3, %v3083_v24, %v3087_v62  ;;  %v3111_v23 = vrot.slane %v3109_v12, 5  ;;  %v3117_v16 = vshll.u32 %v3002_v15, 16  ;;  %v3123_v14 = vshll.u32 %v8873_v38, 16 }
 0x1de   : > { %7402 = vmatprep.mubr.msk.bf16.mxu1 %vm1642_vm4, %v6600_v47  ;;  %7502 = vmatprep.mubr.msk.bf16.mxu0 %vm1642_vm4, %v6714_v51  ;;  %v6715_v56 = vcombine.low %v3078_v28, %v3088_v2  ;;  %v3097_v5 = vrot.slane %v3096_v52, 4  ;;  %v3116_v57 = vrot.slane %v3114_v49, 4  ;;  %v3106_v1 = vor.u32 %v3105_v53, %v3101_v35  ;;  %v3008_v52 = vld [vmem:[#allocation2 + $0x48] sm:$0xf]  ;;  %v8910_v49 = vld [vmem:[#allocation2 + $0x4c] sm:$0xf] }
 0x1df   : > { %v3119_v59 = vrot.slane %v3117_v16, 5  ;;  %v3127_v62 = vshrl.u32 %v8873_v38, 16  ;;  %v3133_v29 = vshll.u32 %v8880_v40, 16  ;;  %v3125_v25 = vrot.slane %v3123_v14, 5 }
 0x1e0   : > { %v3102_v36 = vsel %vm8278_vm3, %v3097_v5, %v3101_v35  ;;  %v6604_v47 = vcombine.low %v8589_v20, %v8601_v4  ;;  %v3138_v0 = vshrl.u32 %v3005_v48, 16  ;;  %v3107_v42 = vrot.slane %v3106_v1, 4 }
 0x1e1   : > { %v3120_v58 = vor.u32 %v3119_v59, %v3116_v57  ;;  %v3129_v15 = vrot.slane %v3127_v62, 4  ;;  %v3135_v51 = vrot.slane %v3133_v29, 5  ;;  %v3141_v60 = vshll.u32 %v3005_v48, 16  ;;  %v8912_v57 = vld [vmem:[#allocation2 + $0x50] sm:$0x1]  ;;  %v7831_v48 = vld [vmem:[#allocation6 + $0x60] sm:$0xff]  }
 0x1e2   : > { %v3140_v45 = vrot.slane %v3138_v0, 4  ;;  %v3147_v9 = vshll.u32 %v8897_v54, 16  ;;  %v3151_v24 = vshrl.u32 %v8897_v54, 16  ;;  %v3112_v35 = vsel %vm8278_vm3, %v3107_v42, %v3111_v23  ;;  %v3011_v0 = vld [vmem:[#allocation2 + $0x54] sm:$0xf] }
 0x1e3   : > { %v3121_v30 = vrot.slane %v3120_v58, 4  ;;  %v3130_v12 = vor.u32 %v3129_v15, %v3125_v25  ;;  %v3157_v28 = vshll.u32 %v8903_v63, 16  ;;  %v6716_v2 = vcombine.low %v3102_v36, %v3112_v35  ;;  %v8934_v58 = vld [vmem:[#allocation2 + $0x58] sm:$0xf]  ;;  %v8936_v15 = vld [vmem:[#allocation6 + $0x88] sm:$0xff]  }
 0x1e4   : > { %v3143_v53 = vrot.slane %v3141_v60, 5  ;;  %v3149_v16 = vrot.slane %v3147_v9, 5  ;;  %v3153_v5 = vrot.slane %v3151_v24, 4  ;;  %v6605_v59 = vcombine.low %v8607_v50, %v8619_v3  ;;  %v8938_v24 = vld [vmem:[#allocation2 + $0x5c] sm:$0x1] }
 0x1e5   : > { %7403 = vmatmul.mubr.msk.bf16.gmra.mxu1 %vm1642_vm4, %v6601_v37  ;;  %7503 = vmatmul.mubr.msk.bf16.vlgmr.msra.gmra.mxu0 %vm1642_vm4, %v6715_v56  ;;  %v3126_v23 = vsel %vm8278_vm3, %v3121_v30, %v3125_v25  ;;  %v3131_v14 = vrot.slane %v3130_v12, 4  ;;  %v3159_v1 = vrot.slane %v3157_v28, 5  ;;  %v3162_v37 = vshrl.u32 %v3008_v52, 16 }
 0x1e6   : > { %7406 = vmatprep.mubr.msk.bf16.mxu1 %vm1642_vm4, %v6602_v22  ;;  %7506 = vmatprep.mubr.msk.bf16.mxu0 %vm1642_vm4, %v6716_v2  ;;  %v3144_v18 = vor.u32 %v3143_v53, %v3140_v45  ;;  %v3154_v19 = vor.u32 %v3153_v5, %v3149_v16  ;;  %v3165_v62 = vshll.u32 %v3008_v52, 16  ;;  %v3171_v29 = vshll.u32 %v8910_v49, 16  ;;  %v3014_v5 = vld [vmem:[#allocation2 + $0x60] sm:$0xf] }
 0x1e7   : > { %v3136_v56 = vsel %vm8278_vm3, %v3131_v14, %v3135_v51  ;;  %v3175_v36 = vshrl.u32 %v8910_v49, 16  ;;  %v3181_v25 = vshll.u32 %v8912_v57, 16  ;;  %7571 = vmatpush3.bf16.msra.mxu0 %v8628_v32  ;;  %v3164_v42 = vrot.slane %v3162_v37, 4  ;;  %v8964_v37 = vld [vmem:[#allocation2 + $0x68] sm:$0x1] }
 0x1e8   : > { %v6717_v17 = vcombine.low %v3126_v23, %v3136_v56  ;;  %v3145_v46 = vrot.slane %v3144_v18, 4  ;;  %v3155_v22 = vrot.slane %v3154_v19, 4  ;;  %7572 = vmatprep.subr.bf16.mxu0 %v7831_v48  ;;  %v3167_v45 = vrot.slane %v3165_v62, 5  ;;  %v8957_v19 = vld [vmem:[#allocation2 + $0x64] sm:$0xf] }
 0x1e9   : > { %v3173_v51 = vrot.slane %v3171_v29, 5  ;;  %v3177_v60 = vrot.slane %v3175_v36, 4  ;;  %v3183_v9 = vrot.slane %v3181_v25, 5  ;;  %v6606_v30 = vcombine.low %v8648_v6, %v8651_v55 }
 0x1ea   : > { %v3150_v35 = vsel %vm8278_vm3, %v3145_v46, %v3149_v16  ;;  %v3160_v32 = vsel %vm8278_vm3, %v3155_v22, %v3159_v1  ;;  %v3186_v12 = vshrl.u32 %v3011_v0, 16  ;;  %v3168_v52 = vor.u32 %v3167_v45, %v3164_v42 }
 0x1eb   : > { %v6718_v28 = vcombine.low %v3150_v35, %v3160_v32  ;;  %v3178_v2 = vor.u32 %v3177_v60, %v3173_v51  ;;  %v3189_v53 = vshll.u32 %v3011_v0, 16  ;;  %7573 = vmatpush3.bf16.msra.mxu0 %v7831_v48  ;;  %v3195_v14 = vshll.u32 %v8934_v58, 16  ;;  %v3017_v0 = vld [vmem:[#allocation2 + $0x6c] sm:$0xf]  ;;  %v8973_v60 = vld [vmem:[#allocation2 + $0x70] sm:$0xf] }
 0x1ec   : > { %v3188_v23 = vrot.slane %v3186_v12, 4  ;;  %v3199_v18 = vshrl.u32 %v8934_v58, 16  ;;  %v3205_v16 = vshll.u32 %v8938_v24, 16  ;;  %7642 = vmatprep.subr.bf16.mxu0 %v8936_v15  ;;  %v3169_v6 = vrot.slane %v3168_v52, 4 }
 0x1ed   : > { %7407 = vmatmul.mubr.msk.bf16.gmra.mxu1 %vm1642_vm4, %v6603_v33  ;;  %7507 = vmatmul.mubr.msk.bf16.gmra.mxu0 %vm1642_vm4, %v6717_v17  ;;  %v3179_v55 = vrot.slane %v3178_v2, 4  ;;  %v3191_v1 = vrot.slane %v3189_v53, 5  ;;  %v6607_v48 = vcombine.low %v8668_v8, %v8675_v34  ;;  %v3197_v39 = vrot.slane %v3195_v14, 5  ;;  %v8979_v53 = vld [vmem:[#allocation2 + $0x74] sm:$0x1] }
 0x1ee   : > { %7410 = vmatprep.mubr.msk.bf16.mxu1 %vm1642_vm4, %v6604_v47  ;;  %7510 = vmatprep.mubr.msk.bf16.mxu0 %vm1642_vm4, %v6718_v28  ;;  %v3201_v61 = vrot.slane %v3199_v18, 4  ;;  %v3207_v33 = vrot.slane %v3205_v16, 5  ;;  %v3210_v62 = vshrl.u32 %v3014_v5, 16  ;;  %v3174_v56 = vsel %vm8278_vm3, %v3169_v6, %v3173_v51  ;;  %v3020_v16 = vld [vmem:[#allocation2 + $0x78] sm:$0xf] }
 0x1ef   : > { %v3184_v29 = vsel %vm8278_vm3, %v3179_v55, %v3183_v9  ;;  %v3192_v36 = vor.u32 %v3191_v1, %v3188_v23  ;;  %v3213_v25 = vshll.u32 %v3014_v5, 16  ;;  %v3219_v17 = vshll.u32 %v8957_v19, 16  ;;  %v8990_v1 = vld [vmem:[#allocation2 + $0x7c] sm:$0xf] }
 0x1f0   : > { %v6719_v20 = vcombine.low %v3174_v56, %v3184_v29  ;;  %v3202_v4 = vor.u32 %v3201_v61, %v3197_v39  ;;  %v3212_v47 = vrot.slane %v3210_v62, 4  ;;  %v3223_v42 = vshrl.u32 %v8957_v19, 16 }
 0x1f1   : > { %v3193_v46 = vrot.slane %v3192_v36, 4  ;;  %v3215_v22 = vrot.slane %v3213_v25, 5  ;;  %v3229_v45 = vshll.u32 %v8964_v37, 16  ;;  %v3221_v35 = vrot.slane %v3219_v17, 5  ;;  %v8999_v25 = vld [vmem:[#allocation2 + $0x80] sm:$0x1] }
 0x1f2   : > { %v3203_v51 = vrot.slane %v3202_v4, 4  ;;  %v6608_v9 = vcombine.low %v8691_v7, %v8693_v11  ;;  %v3234_v32 = vshrl.u32 %v3017_v0, 16  ;;  %v3225_v52 = vrot.slane %v3223_v42, 4 }
 0x1f3   : > { %v3198_v12 = vsel %vm8278_vm3, %v3193_v46, %v3197_v39  ;;  %v3216_v28 = vor.u32 %v3215_v22, %v3212_v47  ;;  %v3231_v2 = vrot.slane %v3229_v45, 5  ;;  %v3237_v14 = vshll.u32 %v3017_v0, 16  ;;  %v3023_v46 = vld [vmem:[#allocation2 + $0x84] sm:$0xf] }
 0x1f4   : > { %v3208_v5 = vsel %vm8278_vm3, %v3203_v51, %v3207_v33  ;;  %v3236_v23 = vrot.slane %v3234_v32, 4  ;;  %v3243_v18 = vshll.u32 %v8973_v60, 16  ;;  %v3226_v6 = vor.u32 %v3225_v52, %v3221_v35 }
 0x1f5   : > { %7411 = vmatmul.mubr.msk.bf16.gmra.mxu1 %vm1642_vm4, %v6605_v59  ;;  %7511 = vmatmul.mubr.msk.bf16.gmra.mxu0 %vm1642_vm4, %v6719_v20  ;;  %v6720_v7 = vcombine.low %v3198_v12, %v3208_v5  ;;  %v3217_v11 = vrot.slane %v3216_v28, 4  ;;  %v3247_v55 = vshrl.u32 %v8973_v60, 16  ;;  %v3239_v39 = vrot.slane %v3237_v14, 5 }
 0x1f6   : > { %7414 = vmatprep.mubr.msk.bf16.mxu1 %vm1642_vm4, %v6606_v30  ;;  %v3245_v61 = vrot.slane %v3243_v18, 5  ;;  %v3253_v33 = vshll.u32 %v8979_v53, 16  ;;  %v6609_v50 = vcombine.low %v8713_v41, %v8718_v21  ;;  %v3227_v59 = vrot.slane %v3226_v6, 4 }
 0x1f7   : > { %7514 = vmatprep.mubr.msk.bf16.mxu0 %vm1642_vm4, %v6720_v7  ;;  %v3222_v3 = vsel %vm8278_vm3, %v3217_v11, %v3221_v35  ;;  %v3249_v62 = vrot.slane %v3247_v55, 4  ;;  %v3258_v56 = vshrl.u32 %v3020_v16, 16  ;;  %v3240_v29 = vor.u32 %v3239_v39, %v3236_v23  ;;  %v9005_v35 = vld [vmem:[#allocation2 + $0x88] sm:$0xf]  ;;  %v9012_v23 = vld [vmem:[#allocation2 + $0x8c] sm:$0x1] }
 0x1f8   : > { %v3255_v36 = vrot.slane %v3253_v33, 5  ;;  %v3261_v30 = vshll.u32 %v3020_v16, 16  ;;  %v3267_v0 = vshll.u32 %v8990_v1, 16  ;;  %v3232_v20 = vsel %vm8278_vm3, %v3227_v59, %v3231_v2  ;;  %v3026_v11 = vld [vmem:[#allocation2 + $0x90] sm:$0xf] }
 0x1f9   : > { %v3250_v4 = vor.u32 %v3249_v62, %v3245_v61  ;;  %v3260_v47 = vrot.slane %v3258_v56, 4  ;;  %v3271_v17 = vshrl.u32 %v8990_v1, 16  ;;  %v6721_v22 = vcombine.low %v3222_v3, %v3232_v20  ;;  %v9025_v3 = vld [vmem:[#allocation2 + $0x94] sm:$0xf]  ;;  %v9032_v56 = vld [vmem:[#allocation2 + $0x98] sm:$0x1] }
 0x1fa   : > { %v3241_v42 = vrot.slane %v3240_v29, 4  ;;  %v3263_v45 = vrot.slane %v3261_v30, 5  ;;  %v3269_v51 = vrot.slane %v3267_v0, 5  ;;  %v3277_v28 = vshll.u32 %v8999_v25, 16 }
 0x1fb   : > { %v3251_v32 = vrot.slane %v3250_v4, 4  ;;  %v3273_v12 = vrot.slane %v3271_v17, 4  ;;  %v6610_v52 = vcombine.low %v8737_v10, %v8741_v27  ;;  %v3282_v14 = vshrl.u32 %v3023_v46, 16  ;;  %v3029_v4 = vld [vmem:[#allocation2 + $0x9c] sm:$0xf] }
 0x1fc   : > { %v3246_v2 = vsel %vm8278_vm3, %v3241_v42, %v3245_v61  ;;  %v3264_v5 = vor.u32 %v3263_v45, %v3260_v47  ;;  %v3285_v18 = vshll.u32 %v3023_v46, 16  ;;  %v3279_v10 = vrot.slane %v3277_v28, 5 }
 0x1fd   : > { %7415 = vmatmul.mubr.msk.bf16.gmra.mxu1 %vm1642_vm4, %v6607_v48  ;;  %7515 = vmatmul.mubr.msk.bf16.gmra.mxu0 %vm1642_vm4, %v6721_v22  ;;  %v3256_v16 = vsel %vm8278_vm3, %v3251_v32, %v3255_v36  ;;  %v3274_v7 = vor.u32 %v3273_v12, %v3269_v51  ;;  %v3291_v27 = vshll.u32 %v9005_v35, 16  ;;  %v3284_v39 = vrot.slane %v3282_v14, 4  ;;  %v9039_v12 = vld [vmem:[#allocation2 + $0xa0] sm:$0xf] }
 0x1fe   : > { %7418 = vmatprep.mubr.msk.bf16.mxu1 %vm1642_vm4, %v6608_v9  ;;  %v6722_v6 = vcombine.low %v3246_v2, %v3256_v16  ;;  %v3265_v55 = vrot.slane %v3264_v5, 4  ;;  %v3287_v61 = vrot.slane %v3285_v18, 5  ;;  %v3295_v34 = vshrl.u32 %v9005_v35, 16  ;;  %v9043_v5 = vld [vmem:[#allocation2 + $0xa4] sm:$0x1] }
 0x1ff   : > { %v3275_v33 = vrot.slane %v3274_v7, 4  ;;  %v3293_v8 = vrot.slane %v3291_v27, 5  ;;  %v3301_v48 = vshll.u32 %v9012_v23, 16  ;;  %v6611_v9 = vcombine.low %v8759_v44, %v8769_v13 }
 0x200   : > { %7518 = vmatprep.mubr.msk.bf16.mxu0 %vm1642_vm4, %v6722_v6  ;;  %v3270_v59 = vsel %vm8278_vm3, %v3265_v55, %v3269_v51  ;;  %v3288_v62 = vor.u32 %v3287_v61, %v3284_v39  ;;  %v3306_v29 = vshrl.u32 %v3026_v11, 16  ;;  %v3297_v30 = vrot.slane %v3295_v34, 4  ;;  %v3032_v61 = vld [vmem:[#allocation2 + $0xa8] sm:$0xf] }
 0x201   : > { %v3280_v36 = vsel %vm8278_vm3, %v3275_v33, %v3279_v10  ;;  %v3303_v0 = vrot.slane %v3301_v48, 5  ;;  %v3309_v20 = vshll.u32 %v3026_v11, 16  ;;  %v3315_v22 = vshll.u32 %v9025_v3, 16 }
 0x202   : > { %v6723_v47 = vcombine.low %v3270_v59, %v3280_v36  ;;  %v3289_v17 = vrot.slane %v3288_v62, 4  ;;  %v3308_v46 = vrot.slane %v3306_v29, 4  ;;  %v3298_v42 = vor.u32 %v3297_v30, %v3293_v8  ;;  %v9058_v62 = vld [vmem:[#allocation2 + $0xb0] sm:$0x1] }
 0x203   : > { %v3311_v45 = vrot.slane %v3309_v20, 5  ;;  %v3319_v51 = vshrl.u32 %v9025_v3, 16  ;;  %v3325_v32 = vshll.u32 %v9032_v56, 16  ;;  %v3317_v2 = vrot.slane %v3315_v22, 5 }
 0x204   : > { %v3294_v28 = vsel %vm8278_vm3, %v3289_v17, %v3293_v8  ;;  %v3330_v14 = vshrl.u32 %v3029_v4, 16  ;;  %v3333_v18 = vshll.u32 %v3029_v4, 16  ;;  %v3299_v16 = vrot.slane %v3298_v42, 4  ;;  %v9056_v8 = vld [vmem:[#allocation2 + $0xac] sm:$0xf] }
 0x205   : > { %7419 = vmatmul.mubr.msk.bf16.gmra.mxu1 %vm1642_vm4, %v6609_v50  ;;  %7519 = vmatmul.mubr.msk.bf16.gmra.mxu0 %vm1642_vm4, %v6723_v47  ;;  %v3312_v7 = vor.u32 %v3311_v45, %v3308_v46  ;;  %v3321_v10 = vrot.slane %v3319_v51, 4  ;;  %v3327_v27 = vrot.slane %v3325_v32, 5  ;;  %v3339_v55 = vshll.u32 %v9039_v12, 16  ;;  %v3035_v51 = vld [vmem:[#allocation2 + $0xb4] sm:$0xf] }
 0x206   : > { %7422 = vmatprep.mubr.msk.bf16.mxu1 %vm1642_vm4, %v6610_v52  ;;  %v3332_v11 = vrot.slane %v3330_v14, 4  ;;  %v3335_v6 = vrot.slane %v3333_v18, 5  ;;  %v3343_v39 = vshrl.u32 %v9039_v12, 16  ;;  %v3304_v41 = vsel %vm8278_vm3, %v3299_v16, %v3303_v0  ;;  %v9070_v16 = vld [vmem:[#allocation2 + $0xb8] sm:$0xf] }
 0x207   : > { %v3313_v21 = vrot.slane %v3312_v7, 4  ;;  %v3322_v50 = vor.u32 %v3321_v10, %v3317_v2  ;;  %v3349_v33 = vshll.u32 %v9043_v5, 16  ;;  %v6724_v34 = vcombine.low %v3294_v28, %v3304_v41  ;;  %v7823_v28 = vld [vmem:[#allocation2 + $0xc] sm:$0xff]   ;;  %v3038_v41 = vld [vmem:[#allocation2 + $0xc0] sm:$0xf] }
 0x208   : > { %v3336_v48 = vor.u32 %v3335_v6, %v3332_v11  ;;  %v3341_v59 = vrot.slane %v3339_v55, 5  ;;  %v3345_v52 = vrot.slane %v3343_v39, 4  ;;  %v3354_v20 = vshrl.u32 %v3032_v61, 16  ;;  %v9076_v11 = vld [vmem:[#allocation2 + $0xbc] sm:$0x1] }
 0x209   : > { %v3318_v29 = vsel %vm8278_vm3, %v3313_v21, %v3317_v2  ;;  %v3323_v36 = vrot.slane %v3322_v50, 4  ;;  %v3351_v30 = vrot.slane %v3349_v33, 5  ;;  %7522 = vmatprep.mubr.msk.bf16.mxu0 %vm1642_vm4, %v6724_v34  ;;  %v3357_v47 = vshll.u32 %v3032_v61, 16 }
 0x20a   : > { %v3337_v0 = vrot.slane %v3336_v48, 4  ;;  %v3346_v4 = vor.u32 %v3345_v52, %v3341_v59  ;;  %v3363_v17 = vshll.u32 %v9056_v8, 16  ;;  %v3356_v22 = vrot.slane %v3354_v20, 4 }
 0x20b   : > { %v3328_v46 = vsel %vm8278_vm3, %v3323_v36, %v3327_v27  ;;  %v3367_v42 = vshrl.u32 %v9056_v8, 16  ;;  %v3373_v45 = vshll.u32 %v9058_v62, 16  ;;  %v3359_v18 = vrot.slane %v3357_v47, 5  ;;  %v7825_v47 = vld [vmem:[#allocation2 + $0x18] sm:$0xff]  }
 0x20c   : > { %v6725_v32 = vcombine.low %v3318_v29, %v3328_v46  ;;  %v3342_v2 = vsel %vm8278_vm3, %v3337_v0, %v3341_v59  ;;  %v3347_v14 = vrot.slane %v3346_v4, 4  ;;  %v3365_v7 = vrot.slane %v3363_v17, 5  ;;  %v9085_v59 = vld [vmem:[#allocation2 + $0xc4] sm:$0xf] }
 0x20d   : > { %7423 = vmatmul.mubr.msk.bf16.gmra.mxu1 %vm1642_vm4, %v6611_v9  ;;  %v3369_v10 = vrot.slane %v3367_v42, 4  ;;  %v3375_v27 = vrot.slane %v3373_v45, 5  ;;  %v3360_v55 = vor.u32 %v3359_v18, %v3356_v22  ;;  %v3378_v39 = vshrl.u32 %v3035_v51, 16  ;;  %v9092_v22 = vld [vmem:[#allocation2 + $0xc8] sm:$0x1] }
 0x20e   : > { %7523 = vmatmul.mubr.msk.bf16.gmra.mxu0 %vm1642_vm4, %v6725_v32  ;;  %7466 = vmatprep.mubr.msk.bf16.mxu1 %vm1642_vm4, %v7823_v28  ;;  %v3352_v6 = vsel %vm8278_vm3, %v3347_v14, %v3351_v30  ;;  %v3381_v61 = vshll.u32 %v3035_v51, 16  ;;  %v3387_v13 = vshll.u32 %v9070_v16, 16  ;;  %v3391_v9 = vshrl.u32 %v9070_v16, 16  ;;  %v7840_v51 = vld [vmem:[#allocation6 + $0x50] sm:$0xff]  }
 0x20f   : > { %v6726_v21 = vcombine.low %v3342_v2, %v3352_v6  ;;  %v3370_v44 = vor.u32 %v3369_v10, %v3365_v7  ;;  %v3361_v50 = vrot.slane %v3360_v55, 4  ;;  %v3380_v33 = vrot.slane %v3378_v39, 4  ;;  %v7826_v18 = vld [vmem:[#allocation2 + $0x24] sm:$0xff]  }
 0x210   : > { %v3383_v34 = vrot.slane %v3381_v61, 5  ;;  %v3397_v48 = vshll.u32 %v9076_v11, 16  ;;  %v3389_v29 = vrot.slane %v3387_v13, 5  ;;  %v3393_v36 = vrot.slane %v3391_v9, 4 }
 0x211   : > { %7526 = vmatprep.mubr.msk.bf16.mxu0 %vm1642_vm4, %v6726_v21  ;;  %v3371_v52 = vrot.slane %v3370_v44, 4  ;;  %v3402_v30 = vshrl.u32 %v3038_v41, 16  ;;  %v3366_v20 = vsel %vm8278_vm3, %v3361_v50, %v3365_v7  ;;  %v3405_v4 = vshll.u32 %v3038_v41, 16  ;;  %v9105_v21 = vld [vmem:[#allocation6 + $0x78] sm:$0xff]  }
 0x212   : > { %v3384_v0 = vor.u32 %v3383_v34, %v3380_v33  ;;  %v3394_v46 = vor.u32 %v3393_v36, %v3389_v29  ;;  %v3411_v45 = vshll.u32 %v9085_v59, 16  ;;  %v3415_v14 = vshrl.u32 %v9085_v59, 16  ;;  %v3734_v34 = vld [vmem:[#allocation2 + $0x30] sm:$0xe]  ;;  %v3735_v36 = vld [vmem:[#allocation2 + $0x3c] sm:$0xe] }
 0x213   : > { %v3376_v17 = vsel %vm8278_vm3, %v3371_v52, %v3375_v27  ;;  %v3404_v42 = vrot.slane %v3402_v30, 4  ;;  %v3407_v2 = vrot.slane %v3405_v4, 5  ;;  %v3399_v10 = vrot.slane %v3397_v48, 5  ;;  %v7828_v48 = vld [vmem:[#allocation2 + $0x30] sm:$0xff]   ;;  %v7830_v4 = vld [vmem:[#allocation2 + $0x18] sm:$0xff]  }
 0x214   : > { %v6727_v32 = vcombine.low %v3366_v20, %v3376_v17  ;;  %v3385_v28 = vrot.slane %v3384_v0, 4  ;;  %v3395_v7 = vrot.slane %v3394_v46, 4  ;;  %v3413_v6 = vrot.slane %v3411_v45, 5  ;;  %v3736_v45 = vld [vmem:[#allocation2 + $0x48] sm:$0xe] }
 0x215   : > { %7467 = vmatmul.mubr.msk.bf16.vlgmr.msra.gmra.mxu1 %vm1642_vm4, %v7825_v47  ;;  %v3408_v55 = vor.u32 %v3407_v2, %v3404_v42  ;;  %v3417_v39 = vrot.slane %v3415_v14, 4  ;;  %v3421_v61 = vshll.u32 %v9092_v22, 16  ;;  %v6751_v20 = vrot.slane %v3734_v34, 9  ;;  %v7832_v14 = vld [vmem:[#allocation2 + $0x48] sm:$0xff]  }
 0x216   : > { %7527 = vmatmul.mubr.msk.bf16.gmra.mxu0 %vm1642_vm4, %v6727_v32  ;;  %7535 = vmatpush3.bf16.msra.mxu1 %v8867_v31  ;;  %v3390_v27 = vsel %vm8278_vm3, %v3385_v28, %v3389_v29  ;;  %v3400_v41 = vsel %vm8278_vm3, %v3395_v7, %v3399_v10  ;;  %v7829_v29 = vld [vmem:[#allocation2 + $0x3c] sm:$0xff]   ;;  %v3818_v0 = vrot.slane %v8873_v38, 5  ;;  %v3821_v17 = vrot.slane %v8880_v40, 5  ;;  %v3737_v10 = vld [vmem:[#allocation2 + $0x54] sm:$0xe] }
 0x217   : > { %7470 = vmatprep.mubr.msk.bf16.mxu1 %vm1642_vm4, %v7826_v18  ;;  %7536 = vmatprep.subr.bf16.mxu1 %v7840_v51  ;;  %v6728_v44 = vcombine.low %v3390_v27, %v3400_v41  ;;  %v3409_v13 = vrot.slane %v3408_v55, 4  ;;  %v3418_v9 = vor.u32 %v3417_v39, %v3413_v6  ;;  %v3423_v33 = vrot.slane %v3421_v61, 5  ;;  %v7861_v39 = vld [vmem:[#allocation6 + $0x80] sm:$0xff]   ;;  %v7835_v61 = vld [vmem:[#allocation2 + $0x30] sm:$0xff]  }
 0x218   : > { %v3820_v47 = vrot.slane %v3818_v0, 4  ;;  %v6752_v46 = vrot.slane %v3735_v36, 9  ;;  %v3825_v42 = vrot.slane %v8897_v54, 5  ;;  %v3828_v28 = vrot.slane %v8903_v63, 5  ;;  %v7836_v36 = vld [vmem:[#allocation2 + $0x60] sm:$0xff]  }
 0x219   : > { %7530 = vmatprep.mubr.msk.bf16.mxu0 %vm1642_vm4, %v6728_v44  ;;  %v3414_v31 = vsel %vm8278_vm3, %v3409_v13, %v3413_v6  ;;  %v3419_v50 = vrot.slane %v3418_v9, 4  ;;  %v6753_v2 = vrot.slane %v3736_v45, 9  ;;  %v3832_v54 = vrot.slane %v8910_v49, 5  ;;  %v7834_v6 = vld [vmem:[#allocation2 + $0x54] sm:$0xff]   ;;  %v7833_v49 = vld [vmem:[#allocation2 + $0x24] sm:$0xff]  }
 0x21a   : > { %7537 = vmatpush3.bf16.msra.mxu1 %v7840_v51  ;;  %v9122_v51 = vsel %vm8315_vm10, %v6751_v20, %v3818_v0  ;;  %v9126_v38 = vsel %vm8315_vm10, %v3820_v47, %v3821_v17  ;;  %v3827_v32 = vrot.slane %v3825_v42, 4  ;;  %v9134_v18 = vsel %vm8315_vm10, %v6752_v46, %v3825_v42  ;;  %v7838_v20 = vld [vmem:[#allocation2 + $0x6c] sm:$0xff]   ;;  %v3740_v46 = vld [vmem:[#allocation2 + $0x78] sm:$0xe] }
 0x21b   : > { %7606 = vmatprep.subr.bf16.mxu1 %v9105_v21  ;;  %v3424_v52 = vsel %vm8278_vm3, %v3419_v50, %v3423_v33  ;;  %v3834_v27 = vrot.slane %v3832_v54, 4  ;;  %v3835_v55 = vrot.slane %v8912_v57, 5  ;;  %v9147_v41 = vsel %vm8315_vm10, %v6753_v2, %v3832_v54  ;;  %v9358_v42 = vld [vmem:[#allocation2 + $0x2c] sm:$0x1]  ;;  %v9362_v57 = vld [vmem:[#allocation2 + $0x38] sm:$0x1] }
 0x21c   : > { %v6729_v30 = vcombine.low %v3414_v31, %v3424_v52  ;;  %v9138_v7 = vsel %vm8315_vm10, %v3827_v32, %v3828_v28  ;;  %v6754_v13 = vrot.slane %v3737_v10, 9  ;;  %v3839_v9 = vrot.slane %v8934_v58, 5  ;;  %v3738_v31 = vld [vmem:[#allocation2 + $0x60] sm:$0xe] }
 0x21d   : > { %7471 = vmatmul.mubr.msk.bf16.gmra.mxu1 %vm1642_vm4, %v7828_v48  ;;  %v9151_v44 = vsel %vm8315_vm10, %v3834_v27, %v3835_v55  ;;  %v3842_v33 = vrot.slane %v8938_v24, 5  ;;  %v6755_v34 = vrot.slane %v3738_v31, 9  ;;  %v3846_v48 = vrot.slane %v8957_v19, 5  ;;  %v7837_v19 = vld [vmem:[#allocation2 + $0x3c] sm:$0xff]   ;;  %v7842_v31 = vld [vmem:[#allocation2 + $0x54] sm:$0xff]  }
 0x21e   : > { %7474 = vmatprep.mubr.msk.bf16.mxu1 %vm1642_vm4, %v7829_v29  ;;  %7531 = vmatmul.mubr.msk.bf16.gmra.mxu0 %vm1642_vm4, %v6729_v30  ;;  %v3841_v50 = vrot.slane %v3839_v9, 4  ;;  %v9163_v58 = vsel %vm8315_vm10, %v6754_v13, %v3839_v9  ;;  %v3739_v29 = vld [vmem:[#allocation2 + $0x6c] sm:$0xe]  ;;  %v3849_v24 = vrot.slane %v8964_v37, 5  ;;  %v3853_v17 = vrot.slane %v8973_v60, 5  ;;  %v7841_v55 = vld [vmem:[#allocation2 + $0x78] sm:$0xff]  }
 0x21f   : > { %7574 = vmatprep.mubr.msk.bf16.mxu0 %vm1642_vm4, %v7830_v4  ;;  %v3848_v30 = vrot.slane %v3846_v48, 4  ;;  %v9175_v0 = vsel %vm8315_vm10, %v6755_v34, %v3846_v48  ;;  %v6756_v47 = vrot.slane %v3739_v29, 9  ;;  %v7839_v37 = vld [vmem:[#allocation2 + $0x48] sm:$0xff]   ;;  %v3856_v32 = vrot.slane %v8979_v53, 5  ;;  %v3742_v9 = vld [vmem:[#allocation2 + $0x90] sm:$0xe] }
 0x220   : > { %v9167_v52 = vsel %vm8315_vm10, %v3841_v50, %v3842_v33  ;;  %v3855_v45 = vrot.slane %v3853_v17, 4  ;;  %v6757_v28 = vrot.slane %v3740_v46, 9  ;;  %v3860_v2 = vrot.slane %v8990_v1, 5  ;;  %v7844_v50 = vld [vmem:[#allocation2 + $0x60] sm:$0xff]  }
 0x221   : > { %v9179_v4 = vsel %vm8315_vm10, %v3848_v30, %v3849_v24  ;;  %v9191_v60 = vsel %vm8315_vm10, %v6756_v47, %v3853_v17  ;;  %v3863_v27 = vrot.slane %v8999_v25, 5  ;;  %v3867_v13 = vrot.slane %v9005_v35, 5  ;;  %v3743_v24 = vld [vmem:[#allocation2 + $0x9c] sm:$0xe] }
 0x222   : > { %v9195_v54 = vsel %vm8315_vm10, %v3855_v45, %v3856_v32  ;;  %v3862_v53 = vrot.slane %v3860_v2, 4  ;;  %v9204_v1 = vsel %vm8315_vm10, %v6757_v28, %v3860_v2  ;;  %v3870_v48 = vrot.slane %v9012_v23, 5  ;;  %v3744_v32 = vld [vmem:[#allocation2 + $0xa8] sm:$0xe]  ;;  %v7847_v28 = vld [vmem:[#allocation2 + $0x9c] sm:$0xff]  }
 0x223   : > { %v3869_v34 = vrot.slane %v3867_v13, 4  ;;  %v6759_v29 = vrot.slane %v3742_v9, 9  ;;  %v3874_v35 = vrot.slane %v9025_v3, 5  ;;  %v7845_v3 = vld [vmem:[#allocation2 + $0x90] sm:$0xff]   ;;  %v3881_v45 = vrot.slane %v9039_v12, 5 }
 0x224   : > { %v3745_v9 = vld [vmem:[#allocation2 + $0xb4] sm:$0xe] }
 0x225   : > { %7475 = vmatmul.mubr.msk.bf16.gmra.mxu1 %vm1642_vm4, %v7832_v14  ;;  %v3741_v14 = vld [vmem:[#allocation2 + $0x84] sm:$0xe]  ;;  %v9227_v30 = vsel %vm8315_vm10, %v3869_v34, %v3870_v48  ;;  %v3876_v23 = vrot.slane %v3874_v35, 4  ;;  %v9236_v17 = vsel %vm8315_vm10, %v6759_v29, %v3874_v35 }
 0x226   : > { %7478 = vmatprep.mubr.msk.bf16.mxu1 %vm1642_vm4, %v7834_v6  ;;  %7575 = vmatmul.mubr.msk.bf16.vlgmr.msra.gmra.mxu0 %vm1642_vm4, %v7833_v49  ;;  %v7843_v49 = vld [vmem:[#allocation2 + $0x84] sm:$0xff]  }
 0x227   : > { %7578 = vmatprep.mubr.msk.bf16.mxu0 %vm1642_vm4, %v7835_v61  ;;  %7643 = vmatpush3.bf16.msra.mxu0 %v8936_v15  ;;  %v6758_v61 = vrot.slane %v3741_v14, 9  ;;  %v3883_v14 = vrot.slane %v3881_v45, 4  ;;  %v7862_v6 = vld [vmem:[#allocation6 + $0x70] sm:$0xff]  }
 0x228   : > { %7644 = vmatprep.subr.bf16.mxu0 %v7861_v39 }
 0x229   : > { %v9197_v10 = vpop.f32.mrf.mxu0 }
 0x22a   : > { %10885 = vst [vmem:[#allocation12_spill] sm:$0xff] %v9197_v10 }
 0x22b   : > { %7645 = vmatpush3.bf16.msra.mxu0 %v7861_v39  ;;  %v9208_v39 = vsel %vm8315_vm10, %v3862_v53, %v3863_v27  ;;  %v9215_v33 = vpop.f32.mrf.mxu0  ;;  %v3884_v53 = vrot.slane %v9043_v5, 5  ;;  %v7848_v27 = vld [vmem:[#allocation2 + $0x78] sm:$0xff]   ;;  %v3891_v5 = vrot.slane %v9058_v62, 5  ;;  %v3895_v62 = vrot.slane %v9070_v16, 5 }
 0x22c   : > { %10886 = vst [vmem:[#allocation13_spill] sm:$0xff] %v9215_v33  ;;  %v3905_v16 = vrot.slane %v9092_v22, 5 }
 0x22d   : > { %7479 = vmatmul.mubr.msk.bf16.gmra.mxu1 %vm1642_vm4, %v7836_v36  ;;  %v9223_v36 = vsel %vm8315_vm10, %v6758_v61, %v3867_v13  ;;  %v9232_v47 = vpop.f32.mrf.mxu0  ;;  %v3888_v61 = vrot.slane %v9056_v8, 5  ;;  %v9258_v13 = vsel %vm8315_vm10, %v3883_v14, %v3884_v53  ;;  %v7893_v8 = vld [vmem:[#allocation2 + $0x10] sm:$0xf]  ;;  %v7850_v14 = vld [vmem:[#allocation2 + $0x84] sm:$0xff]  }
 0x22e   : > { %7482 = vmatprep.mubr.msk.bf16.mxu1 %vm1642_vm4, %v7838_v20  ;;  %7579 = vmatmul.mubr.msk.bf16.gmra.mxu0 %vm1642_vm4, %v7837_v19  ;;  %v3877_v19 = vrot.slane %v9032_v56, 5  ;;  %10887 = vst [vmem:[#allocation14_spill] sm:$0xff] %v9232_v47  ;;  %v7846_v56 = vld [vmem:[#allocation2 + $0x6c] sm:$0xff]   ;;  %v3797_v34 = vrot.slane %v7893_v8, 5  ;;  %v7894_v8 = vld [vmem:[#allocation2 + $0x14] sm:$0x1] }
 0x22f   : > { %7582 = vmatprep.mubr.msk.bf16.mxu0 %vm1642_vm4, %v7839_v37  ;;  %v6760_v37 = vrot.slane %v3743_v24, 9  ;;  %v6762_v24 = vrot.slane %v3745_v9, 9 }
 0x230   : > { %v9240_v46 = vsel %vm8315_vm10, %v3876_v23, %v3877_v19  ;;  %v3746_v23 = vld [vmem:[#allocation2 + $0xc0] sm:$0xe]  ;;  %v7849_v19 = vld [vmem:[#allocation2 + $0xa8] sm:$0xff]   ;;  %v3799_v53 = vrot.slane %v3797_v34, 4 }
 0x231   : > { %v9254_v12 = vsel %vm8315_vm10, %v6760_v37, %v3881_v45  ;;  %v7851_v37 = vld [vmem:[#allocation2 + $0xb4] sm:$0xff]   ;;  %v3731_v45 = vld [vmem:[#allocation2 + $0xc] sm:$0xe] }
 0x235   : > { %7483 = vmatmul.mubr.msk.bf16.gmra.mxu1 %vm1642_vm4, %v7841_v55  ;;  %v9248_v55 = vpop.f32.mrf.mxu0 }
 0x236   : > { %7486 = vmatprep.mubr.msk.bf16.mxu1 %vm1642_vm4, %v7843_v49  ;;  %7583 = vmatmul.mubr.msk.bf16.gmra.mxu0 %vm1642_vm4, %v7842_v31  ;;  %10888 = vst [vmem:[#allocation15_spill] sm:$0xff] %v9248_v55  ;;  %v6761_v49 = vrot.slane %v3744_v32, 9 }
 0x237   : > { %7586 = vmatprep.mubr.msk.bf16.mxu0 %vm1642_vm4, %v7844_v50  ;;  %v3890_v50 = vrot.slane %v3888_v61, 4 }
 0x238   : > { %v9268_v29 = vsel %vm8315_vm10, %v6761_v49, %v3888_v61  ;;  %v3902_v49 = vrot.slane %v9085_v59, 5  ;;  %v7852_v61 = vld [vmem:[#allocation2 + $0x90] sm:$0xff]   ;;  %v3800_v59 = vrot.slane %v7894_v8, 5 }
 0x239   : > { %v9272_v35 = vsel %vm8315_vm10, %v3890_v50, %v3891_v5  ;;  %v9288_v5 = vsel %vm8315_vm10, %v6762_v24, %v3895_v62  ;;  %v6748_v50 = vrot.slane %v3731_v45, 9 }
 0x23a   : > { %v3801_v24 = vsel %vm8315_vm10, %v3799_v53, %v3800_v59 }
 0x23b   : > { %v3798_v8 = vsel %vm8315_vm10, %v6748_v50, %v3797_v34  ;;  %v7898_v50 = vld [vmem:[#allocation2 + $0x2c] sm:$0x1] }
 0x23c   : > { %v6764_v53 = vcombine.low %v3798_v8, %v3801_v24  ;;  %v3814_v20 = vrot.slane %v7898_v50, 5  ;;  %v9321_v24 = vld [vmem:[#allocation2 + $0x1c] sm:$0xf] }
 0x23d   : > { %7487 = vmatmul.mubr.msk.bf16.gmra.mxu1 %vm1642_vm4, %v7845_v3 }
 0x23e   : > { %7490 = vmatprep.mubr.msk.bf16.mxu1 %vm1642_vm4, %v7847_v28  ;;  %7587 = vmatmul.mubr.msk.bf16.gmra.mxu0 %vm1642_vm4, %v7846_v56  ;;  %v3897_v28 = vrot.slane %v3895_v62, 4  ;;  %v3898_v56 = vrot.slane %v9076_v11, 5  ;;  %v7896_v62 = vld [vmem:[#allocation2 + $0x28] sm:$0xf] }
 0x23f   : > { %7590 = vmatprep.mubr.msk.bf16.mxu0 %vm1642_vm4, %v7848_v27  ;;  %v6763_v27 = vrot.slane %v3746_v23, 9  ;;  %v3904_v23 = vrot.slane %v3902_v49, 4 }
 0x240   : > { %v9292_v11 = vsel %vm8315_vm10, %v3897_v28, %v3898_v56  ;;  %v3811_v28 = vrot.slane %v7896_v62, 5  ;;  %v3733_v62 = vld [vmem:[#allocation2 + $0x24] sm:$0xe] }
 0x241   : > { %v9264_v48 = vpop.f32.mrf.mxu0  ;;  %v9304_v45 = vsel %vm8315_vm10, %v6763_v27, %v3902_v49  ;;  %v9308_v56 = vsel %vm8315_vm10, %v3904_v23, %v3905_v16  ;;  %v7854_v27 = vld [vmem:[#allocation2 + $0x9c] sm:$0xff]   ;;  %v7855_v16 = vld [vmem:[#allocation2 + $0xa8] sm:$0xff]   ;;  %v6750_v34 = vrot.slane %v3733_v62, 9 }
 0x242   : > { %10889 = vst [vmem:[#allocation16_spill] sm:$0xff] %v9264_v48  ;;  %10893 = vst [vmem:[#allocation20_spill] sm:$0xff] %v9304_v45  ;;  %v3813_v49 = vrot.slane %v3811_v28, 4  ;;  %v9335_v62 = vld [vmem:[#allocation2 + $0x28] sm:$0xf]  ;;  %v10919_v45 = vcombine.low %v9163_v58, %v9167_v52 }
 0x243   : > { %v9277_v32 = vpop.f32.mrf.mxu0  ;;  %10894 = vst [vmem:[#allocation21_spill] sm:$0xff] %v9308_v56  ;;  %v3812_v50 = vsel %vm8315_vm10, %v6750_v34, %v3811_v28  ;;  %v9349_v34 = vld [vmem:[#allocation2 + $0x34] sm:$0xf]  ;;  %v9373_v48 = vld [vmem:[#allocation2 + $0x4c] sm:$0xf] }
 0x244   : > { %10890 = vst [vmem:[#allocation17_spill] sm:$0xff] %v9277_v32  ;;  %v5402_v63 = vrot.slane %v9349_v34, 5  ;;  %v5398_v32 = vrot.slane %v9358_v42, 5 }
 0x245   : > { %7491 = vmatmul.mubr.msk.bf16.gmra.mxu1 %vm1642_vm4, %v7849_v19  ;;  %v9284_v9 = vpop.f32.mrf.mxu0  ;;  %v7895_v19 = vld [vmem:[#allocation2 + $0x1c] sm:$0xf] }
 0x246   : > { %7494 = vmatprep.mubr.msk.bf16.mxu1 %vm1642_vm4, %v7851_v37  ;;  %10891 = vst [vmem:[#allocation18_spill] sm:$0xff] %v9284_v9  ;;  %7591 = vmatmul.mubr.msk.bf16.gmra.mxu0 %vm1642_vm4, %v7850_v14  ;;  %v3804_v37 = vrot.slane %v7895_v19, 5  ;;  %v3732_v19 = vld [vmem:[#allocation2 + $0x18] sm:$0xe]  ;;  %v7897_v14 = vld [vmem:[#allocation2 + $0x20] sm:$0x1] }
 0x247   : > { %7594 = vmatprep.mubr.msk.bf16.mxu0 %vm1642_vm4, %v7852_v61  ;;  %v9298_v3 = vpop.f32.mrf.mxu0  ;;  %v7853_v61 = vld [vmem:[#allocation2 + $0xc0] sm:$0xff]   ;;  %v6749_v23 = vrot.slane %v3732_v19, 9  ;;  %v3807_v2 = vrot.slane %v7897_v14, 5  ;;  %v3815_v19 = vsel %vm8315_vm10, %v3813_v49, %v3814_v20  ;;  %v7857_v20 = vld [vmem:[#allocation2 + $0xb4] sm:$0xff]   ;;  %v5324_v9 = vld [vmem:[#allocation2 + $0x30] sm:$0xe] }
 0x248   : > { %10892 = vst [vmem:[#allocation19_spill] sm:$0xff] %v9298_v3  ;;  %v3806_v59 = vrot.slane %v3804_v37, 4  ;;  %v9316_v31 = vpop.f32.mrf.mxu1  ;;  %v9344_v49 = vld [vmem:[#allocation2 + $0x20] sm:$0x1]  ;;  %v5404_v10 = vrot.slane %v5402_v63, 4 }
 0x249   : > { %10896 = vst [vmem:[#allocation23_spill] sm:$0xff] %v9316_v31  ;;  %v3805_v14 = vsel %vm8315_vm10, %v6749_v23, %v3804_v37  ;;  %v5322_v37 = vld [vmem:[#allocation2 + $0x18] sm:$0xe]  ;;  %v5395_v23 = vrot.slane %v9335_v62, 5  ;;  %v9423_v31 = vld [vmem:[#allocation2 + $0x74] sm:$0x1] }
 0x24a   : > { %v9314_v22 = vpop.f32.mrf.mxu0  ;;  %v9328_v25 = vpop.f32.mrf.mxu1  ;;  %10914 = vst [vmem:[#allocation39_spill] sm:$0xff] %v9423_v31 }
 0x24b   : > { %10895 = vst [vmem:[#allocation22_spill] sm:$0xff] %v9314_v22  ;;  %10898 = vst [vmem:[#allocation25_spill] sm:$0xff] %v9328_v25  ;;  %v5397_v15 = vrot.slane %v5395_v23, 4  ;;  %v9421_v25 = vld [vmem:[#allocation2 + $0x68] sm:$0x1] }
 0x24c   : > { %v9323_v8 = vpop.f32.mrf.mxu0  ;;  %10913 = vst [vmem:[#allocation38_spill] sm:$0xff] %v9421_v25 }
 0x24d   : > { %7495 = vmatmul.mubr.msk.bf16.gmra.mxu1 %vm1642_vm4, %v7853_v61  ;;  %10897 = vst [vmem:[#allocation24_spill] sm:$0xff] %v9323_v8  ;;  %v3808_v61 = vsel %vm8315_vm10, %v3806_v59, %v3807_v2  ;;  %v6766_v2 = vcombine.low %v3812_v50, %v3815_v19  ;;  %v9341_v59 = vpop.f32.mrf.mxu1  ;;  %v5391_v50 = vrot.slane %v9344_v49, 5  ;;  %v9375_v8 = vld [vmem:[#allocation2 + $0x58] sm:$0xf]  ;;  %v5399_v33 = vsel %vm8315_vm10, %v5397_v15, %v5398_v32  ;;  %v5326_v32 = vld [vmem:[#allocation2 + $0x48] sm:$0xe] }
 0x24e   : > { %7538 = vmatprep.mubr.msk.bf16.mxu1 %vm1642_vm4, %v6764_v53  ;;  %7595 = vmatmul.mubr.msk.bf16.gmra.mxu0 %vm1642_vm4, %v7854_v27  ;;  %v5388_v53 = vrot.slane %v9321_v24, 5  ;;  %v6765_v27 = vcombine.low %v3805_v14, %v3808_v61  ;;  %10900 = vst [vmem:[#allocation27_spill] sm:$0xff] %v9341_v59  ;;  %v7858_v61 = vld [vmem:[#allocation2 + $0xc0] sm:$0xff]  }
 0x24f   : > { %7598 = vmatprep.mubr.msk.bf16.mxu0 %vm1642_vm4, %v7855_v16  ;;  %v9339_v16 = vpop.f32.mrf.mxu0  ;;  %v9351_v14 = vld [vmem:[#allocation2 + $0x40] sm:$0xf] }
 0x250   : > { %10899 = vst [vmem:[#allocation26_spill] sm:$0xff] %v9339_v16  ;;  %v5390_v28 = vrot.slane %v5388_v53, 4 }
 0x251   : > { %v9354_v19 = vpop.f32.mrf.mxu0 }
 0x252   : > { %10901 = vst [vmem:[#allocation28_spill] sm:$0xff] %v9354_v19  ;;  %v5392_v40 = vsel %vm8315_vm10, %v5390_v28, %v5391_v50  ;;  %v7860_v19 = vld [vmem:[#allocation2 + $0xcc] sm:$0xff]   ;;  %v9381_v28 = vld [vmem:[#allocation2 + $0x64] sm:$0xf] }
 0x253   : > { %10905 = vst [vmem:[#allocation32_spill] sm:$0xff] %v9381_v28  ;;  %v9383_v50 = vld [vmem:[#allocation2 + $0x70] sm:$0xf] }
 0x254   : > { %10906 = vst [vmem:[#allocation33_spill] sm:$0xff] %v9383_v50 }
 0x255   : > { %7539 = vmatmul.mubr.msk.bf16.vlgmr.msra.gmra.mxu1 %vm1642_vm4, %v6765_v27  ;;  %v6866_v27 = vrot.slane %v5322_v37, 9  ;;  %v5325_v37 = vld [vmem:[#allocation2 + $0x3c] sm:$0xe] }
 0x256   : > { %7607 = vmatpush3.bf16.msra.mxu1 %v9105_v21  ;;  %7542 = vmatprep.mubr.msk.bf16.mxu1 %vm1642_vm4, %v6766_v2  ;;  %v5323_v21 = vld [vmem:[#allocation2 + $0x24] sm:$0xe]  ;;  %v9360_v2 = vpop.f32.mrf.mxu1  ;;  %v6869_v15 = vrot.slane %v5325_v37, 9 }
 0x257   : > { %7599 = vmatmul.mubr.msk.bf16.gmra.mxu0 %vm1642_vm4, %v7857_v20  ;;  %7608 = vmatprep.subr.bf16.mxu1 %v7862_v6  ;;  %10902 = vst [vmem:[#allocation29_spill] sm:$0xff] %v9360_v2  ;;  %v5409_v20 = vrot.slane %v9351_v14, 5  ;;  %v5389_v55 = vsel %vm8315_vm10, %v6866_v27, %v5388_v53  ;;  %v6867_v22 = vrot.slane %v5323_v21, 9  ;;  %v10909_v53 = vcombine.low %v9134_v18, %v9138_v7 }
 0x258   : > { %7602 = vmatprep.mubr.msk.bf16.mxu0 %vm1642_vm4, %v7858_v61  ;;  %v9368_v61 = vld [vmem:[#allocation2 + $0x44] sm:$0x1]  ;;  %v6868_v27 = vrot.slane %v5324_v9, 9  ;;  %v5405_v21 = vrot.slane %v9362_v57, 5  ;;  %v5437_v18 = vrot.slane %v9383_v50, 5 }
 0x259   : > { %v5411_v2 = vrot.slane %v5409_v20, 4  ;;  %v5396_v7 = vsel %vm8315_vm10, %v6867_v22, %v5395_v23  ;;  %v9409_v9 = vld [vmem:[#allocation2 + $0x50] sm:$0x1]  ;;  %v6870_v23 = vrot.slane %v5326_v32, 9  ;;  %v9433_v50 = vld [vmem:[#allocation2 + $0x7c] sm:$0xf] }
 0x25a   : > { %7609 = vmatpush3.bf16.msra.mxu1 %v7862_v6  ;;  %v10907_v6 = vcombine.low %v9122_v51, %v9126_v38  ;;  %v5416_v51 = vrot.slane %v9373_v48, 5  ;;  %v6883_v37 = vcombine.low %v5396_v7, %v5399_v33  ;;  %v5403_v22 = vsel %vm8315_vm10, %v6868_v27, %v5402_v63  ;;  %v5329_v7 = vld [vmem:[#allocation2 + $0x6c] sm:$0xe]  ;;  %10916 = vst [vmem:[#allocation41_spill] sm:$0xff] %v9433_v50 }
 0x25b   : > { %v9371_v16 = vpop.f32.mrf.mxu0  ;;  %v9379_v47 = vpop.f32.mrf.mxu1  ;;  %v5419_v63 = vrot.slane %v9409_v9, 5  ;;  %v5444_v58 = vrot.slane %v9433_v50, 5 }
 0x25c   : > { %10903 = vst [vmem:[#allocation30_spill] sm:$0xff] %v9371_v16  ;;  %10904 = vst [vmem:[#allocation31_spill] sm:$0xff] %v9379_v47  ;;  %v6882_v16 = vcombine.low %v5389_v55, %v5392_v40  ;;  %v5423_v40 = vrot.slane %v9375_v8, 5  ;;  %v5412_v55 = vrot.slane %v9368_v61, 5 }
 0x25d   : > { %7543 = vmatmul.mubr.msk.bf16.gmra.mxu1 %vm1642_vm4, %v10907_v6  ;;  %v9391_v59 = vpop.f32.mrf.mxu0  ;;  %v9399_v38 = vpop.f32.mrf.mxu1  ;;  %v5430_v6 = vrot.slane %v9381_v28, 5  ;;  %v6873_v28 = vrot.slane %v5329_v7, 9  ;;  %v9465_v7 = vld [vmem:[#allocation2 + $0x80] sm:$0x1] }
 0x25e   : > { %10908 = vst [vmem:[#allocation34_spill] sm:$0xff] %v9391_v59  ;;  %7546 = vmatprep.mubr.msk.bf16.mxu1 %vm1642_vm4, %v10909_v53  ;;  %10910 = vst [vmem:[#allocation35_spill] sm:$0xff] %v9399_v38  ;;  %v9413_v59 = vld [vmem:[#allocation2 + $0x5c] sm:$0x1]  ;;  %v5406_v38 = vsel %vm8315_vm10, %v5404_v10, %v5405_v21  ;;  %v9419_v47 = vsel %vm8315_vm10, %v5411_v2, %v5412_v55  ;;  %v5425_v33 = vrot.slane %v5423_v40, 4  ;;  %v5439_v55 = vrot.slane %v5437_v18, 4 }
 0x25f   : > { %7603 = vmatmul.mubr.msk.bf16.gmra.mxu0 %vm1642_vm4, %v7860_v19  ;;  %v9411_v53 = vpop.f32.mrf.mxu0  ;;  %10912 = vst [vmem:[#allocation37_spill] sm:$0xff] %v9413_v59  ;;  %v5327_v19 = vld [vmem:[#allocation2 + $0x54] sm:$0xe]  ;;  %v9427_v3 = vpop.f32.mrf.mxu1  ;;  %v9431_v10 = vsel %vm8315_vm10, %v6869_v15, %v5409_v20  ;;  %v5432_v21 = vrot.slane %v5430_v6, 4  ;;  %v6884_v56 = vcombine.low %v5403_v22, %v5406_v38  ;;  %v5426_v32 = vrot.slane %v9413_v59, 5  ;;  %10921 = vst [vmem:[#allocation44_spill] sm:$0xff] %v9465_v7 }
 0x260   : > { %7646 = vmatprep.mubr.msk.bf16.mxu0 %vm1642_vm4, %v6882_v16  ;;  %10911 = vst [vmem:[#allocation36_spill] sm:$0xff] %v9411_v53  ;;  %v5328_v16 = vld [vmem:[#allocation2 + $0x60] sm:$0xe]  ;;  %v5418_v53 = vrot.slane %v5416_v51, 4  ;;  %10915 = vst [vmem:[#allocation40_spill] sm:$0xff] %v9427_v3  ;;  %v6871_v2 = vrot.slane %v5327_v19, 9  ;;  %v10918_v20 = vcombine.low %v9147_v41, %v9151_v44 }
 0x261   : > { %v9438_v27 = vpop.f32.mrf.mxu0  ;;  %v5330_v3 = vld [vmem:[#allocation2 + $0x78] sm:$0xe]  ;;  %v6872_v15 = vrot.slane %v5328_v16, 9  ;;  %v5433_v19 = vrot.slane %v9421_v25, 5  ;;  %v5440_v38 = vrot.slane %v9423_v31, 5  ;;  %v9459_v44 = vpop.f32.mrf.mxu1  ;;  %v9463_v16 = vsel %vm8315_vm10, %v5425_v33, %v5426_v32 }
 0x262   : > { %10917 = vst [vmem:[#allocation42_spill] sm:$0xff] %v9438_v27  ;;  %v4584_v22 = vld [vmem:[#allocation2 + $0x18] sm:$0xf]  ;;  %v9453_v27 = vsel %vm8315_vm10, %v6870_v23, %v5416_v51  ;;  %v9457_v41 = vsel %vm8315_vm10, %v5418_v53, %v5419_v63  ;;  %10920 = vst [vmem:[#allocation43_spill] sm:$0xff] %v9459_v44  ;;  %v9471_v52 = vsel %vm8315_vm10, %v6871_v2, %v5423_v40  ;;  %v6874_v53 = vrot.slane %v5330_v3, 9 }
 0x263   : > { %v9479_v51 = vsel %vm8315_vm10, %v5439_v55, %v5440_v38  ;;  %v9481_v23 = vld [vmem:[#allocation2 + $0x88] sm:$0xf]  ;;  %v9483_v33 = vld [vmem:[#allocation2 + $0x94] sm:$0xf]  ;;  %v9488_v63 = vld [vmem:[#allocation2 + $0xa0] sm:$0xf]  ;;  %v6886_v55 = vcombine.low %v9453_v27, %v9457_v41 }
 0x264   : > { %10922 = vst [vmem:[#allocation45_spill] sm:$0xff] %v9481_v23  ;;  %10923 = vst [vmem:[#allocation46_spill] sm:$0xff] %v9483_v33  ;;  %v4633_v40 = vshrl.u32 %v4584_v22, 16  ;;  %v4636_v2 = vshll.u32 %v4584_v22, 16  ;;  %v4646_v32 = vshrl.u32 %v9321_v24, 16  ;;  %v5446_v3 = vrot.slane %v5444_v58, 4 }
 0x265   : > { %7547 = vmatmul.mubr.msk.bf16.gmra.mxu1 %vm1642_vm4, %v10918_v20  ;;  %10925 = vst [vmem:[#allocation48_spill] sm:$0xff] %v9488_v63  ;;  %v9498_v20 = vsel %vm8315_vm10, %v6872_v15, %v5430_v6  ;;  %v5331_v38 = vld [vmem:[#allocation2 + $0x84] sm:$0xe]  ;;  %v5447_v6 = vrot.slane %v9465_v7, 5  ;;  %v9515_v15 = vld [vmem:[#allocation2 + $0x98] sm:$0x1] }
 0x266   : > { %7550 = vmatprep.mubr.msk.bf16.mxu1 %vm1642_vm4, %v10919_v45  ;;  %v9475_v45 = vsel %vm8315_vm10, %v5432_v21, %v5433_v19  ;;  %v4642_v21 = vshll.u32 %v9321_v24, 16  ;;  %v9504_v19 = vld [vmem:[#allocation2 + $0x8c] sm:$0x1]  ;;  %10929 = vst [vmem:[#allocation52_spill] sm:$0xff] %v9515_v15  ;;  %v5458_v44 = vrot.slane %v9483_v33, 5  ;;  %v5465_v24 = vrot.slane %v9488_v63, 5 }
 0x267   : > { %7647 = vmatmul.mubr.msk.bf16.vlgmr.msra.gmra.mxu0 %vm1642_vm4, %v6883_v37  ;;  %10926 = vst [vmem:[#allocation49_spill] sm:$0xff] %v9504_v19  ;;  %v5332_v41 = vld [vmem:[#allocation2 + $0x90] sm:$0xe]  ;;  %v4635_v31 = vrot.slane %v4633_v40, 4  ;;  %v4638_v7 = vrot.slane %v4636_v2, 5  ;;  %v4648_v25 = vrot.slane %v4646_v32, 4  ;;  %v10934_v40 = vcombine.low %v9191_v60, %v9195_v54 }
 0x268   : > { %7650 = vmatprep.mubr.msk.bf16.mxu0 %vm1642_vm4, %v6884_v56  ;;  %v9486_v37 = vpop.f32.mrf.mxu0  ;;  %v9502_v56 = vsel %vm8315_vm10, %v6873_v28, %v5437_v18  ;;  %v4587_v28 = vld [vmem:[#allocation2 + $0x24] sm:$0xf]  ;;  %v9519_v18 = vsel %vm8315_vm10, %v6874_v53, %v5444_v58  ;;  %v9528_v50 = vrot.slane %v4642_v21, 5  ;;  %v10932_v58 = vcombine.low %v9175_v0, %v9179_v4  ;;  %v5333_v33 = vld [vmem:[#allocation2 + $0x9c] sm:$0xe] }
 0x269   : > { %10924 = vst [vmem:[#allocation47_spill] sm:$0xff] %v9486_v37  ;;  %v4660_v63 = vshll.u32 %v4587_v28, 16  ;;  %v4666_v59 = vshll.u32 %v9335_v62, 16  ;;  %v9546_v0 = vsel %vm8315_vm10, %v5446_v3, %v5447_v6  ;;  %v6875_v4 = vrot.slane %v5331_v38, 9 }
 0x26a   : > { %v9506_v22 = vpop.f32.mrf.mxu1  ;;  %v9510_v27 = vpop.f32.mrf.mxu0  ;;  %v5454_v21 = vrot.slane %v9504_v19, 5  ;;  %v6876_v60 = vrot.slane %v5332_v41, 9  ;;  %v5460_v54 = vrot.slane %v5458_v44, 4  ;;  %v6877_v3 = vrot.slane %v5333_v33, 9 }
 0x26b   : > { %10927 = vst [vmem:[#allocation50_spill] sm:$0xff] %v9506_v22  ;;  %10928 = vst [vmem:[#allocation51_spill] sm:$0xff] %v9510_v27  ;;  %v5451_v22 = vrot.slane %v9481_v23, 5  ;;  %v9524_v27 = vld [vmem:[#allocation2 + $0xac] sm:$0xf]  ;;  %v4657_v23 = vshrl.u32 %v4587_v28, 16  ;;  %v10936_v28 = vcombine.low %v9431_v10, %v9419_v47  ;;  %v4639_v6 = vor.u32 %v4638_v7, %v4635_v31 }
 0x26c   : > { %10930 = vst [vmem:[#allocation53_spill] sm:$0xff] %v9524_v27  ;;  %v9526_v37 = vpop.f32.mrf.mxu1  ;;  %v9534_v53 = vpop.f32.mrf.mxu0  ;;  %v5472_v32 = vrot.slane %v9524_v27, 5  ;;  %v5467_v38 = vrot.slane %v5465_v24, 4  ;;  %v9563_v10 = vld [vmem:[#allocation2 + $0xb0] sm:$0x1]  ;;  %v9565_v19 = vrot.slane %v4666_v59, 5 }
 0x26d   : > { %10931 = vst [vmem:[#allocation54_spill] sm:$0xff] %v9526_v37  ;;  %7551 = vmatmul.mubr.msk.bf16.gmra.mxu1 %vm1642_vm4, %v10932_v58  ;;  %10933 = vst [vmem:[#allocation55_spill] sm:$0xff] %v9534_v53  ;;  %v4670_v37 = vshrl.u32 %v9335_v62, 16  ;;  %v5453_v62 = vrot.slane %v5451_v22, 4  ;;  %v5461_v58 = vrot.slane %v9515_v15, 5  ;;  %v4659_v41 = vrot.slane %v4657_v23, 4 }
 0x26e   : > { %7554 = vmatprep.mubr.msk.bf16.mxu1 %vm1642_vm4, %v10934_v40  ;;  %v9542_v2 = vpop.f32.mrf.mxu1  ;;  %v9555_v40 = vld [vmem:[#allocation2 + $0xa4] sm:$0x1]  ;;  %v5334_v53 = vld [vmem:[#allocation2 + $0xa8] sm:$0xe]  ;;  %v9561_v47 = vpop.f32.mrf.mxu0  ;;  %v4652_v31 = vshll.u32 %v9344_v49, 16  ;;  %v9573_v7 = vsel %vm8315_vm10, %v6875_v4, %v5451_v22  ;;  %v9587_v49 = vrot.slane %v4639_v6, 4  ;;  %v10938_v4 = vcombine.low %v9204_v1, %v9208_v39 }
 0x26f   : > { %10935 = vst [vmem:[#allocation56_spill] sm:$0xff] %v9542_v2  ;;  %7651 = vmatmul.mubr.msk.bf16.gmra.mxu0 %vm1642_vm4, %v10936_v28  ;;  %v4649_v2 = vor.u32 %v4648_v25, %v9528_v50  ;;  %v4662_v28 = vrot.slane %v4660_v63, 5  ;;  %v4672_v15 = vrot.slane %v4670_v37, 4  ;;  %v5468_v33 = vrot.slane %v9555_v40, 5  ;;  %v4590_v37 = vld [vmem:[#allocation2 + $0x30] sm:$0xf] }
 0x270   : > { %7654 = vmatprep.mubr.msk.bf16.mxu0 %vm1642_vm4, %v6886_v55  ;;  %v9559_v27 = vpop.f32.mrf.mxu1  ;;  %v5474_v25 = vrot.slane %v5472_v32, 4  ;;  %v9581_v59 = vsel %vm8315_vm10, %v5460_v54, %v5461_v58  ;;  %v6878_v23 = vrot.slane %v5334_v53, 9  ;;  %v5475_v22 = vrot.slane %v9563_v10, 5 }
 0x271   : > { %10937 = vst [vmem:[#allocation57_spill] sm:$0xff] %v9559_v27  ;;  %v9577_v27 = vsel %vm8315_vm10, %v5453_v62, %v5454_v21  ;;  %v9585_v63 = vsel %vm8315_vm10, %v5467_v38, %v5468_v33  ;;  %v9589_v55 = vrot.slane %v4649_v2, 4  ;;  %v9602_v53 = vsel %vm8315_vm10, %v6876_v60, %v5458_v44  ;;  %v9609_v38 = vld [vmem:[#allocation2 + $0xb4] sm:$0xe]  ;;  %v9621_v60 = vld [vmem:[#allocation2 + $0xb8] sm:$0xf] }
 0x272   : > { %v9606_v54 = vsel %vm8315_vm10, %v6877_v3, %v5465_v24  ;;  %v4663_v2 = vor.u32 %v4662_v28, %v4659_v41  ;;  %v4673_v58 = vor.u32 %v4672_v15, %v9565_v19  ;;  %v10940_v1 = vcombine.low %v9223_v36, %v9227_v30 }
 0x273   : > { %v9615_v39 = vrot.slane %v4652_v31, 5  ;;  %v9619_v44 = vsel %vm8315_vm10, %v5474_v25, %v5475_v22  ;;  %v4681_v24 = vshrl.u32 %v4590_v37, 16  ;;  %v4684_v3 = vshll.u32 %v4590_v37, 16  ;;  %v4596_v37 = vld [vmem:[#allocation2 + $0x48] sm:$0xf] }
 0x274   : > { %v10941_v15 = vcombine.low %v9471_v52, %v9463_v16  ;;  %v9639_v33 = vsel %vm8315_vm10, %v6878_v23, %v5472_v32  ;;  %v10943_v16 = vcombine.low %v9498_v20, %v9475_v45  ;;  %v4645_v52 = vsel %vm8278_vm3, %v9587_v49, %v9528_v50  ;;  %v4593_v23 = vld [vmem:[#allocation2 + $0x3c] sm:$0xf] }
 0x275   : > { %7555 = vmatmul.mubr.msk.bf16.gmra.mxu1 %vm1642_vm4, %v10938_v4  ;;  %v9596_v21 = vpop.f32.mrf.mxu1  ;;  %v9598_v62 = vpop.f32.mrf.mxu0  ;;  %v4655_v31 = vsel %vm8278_vm3, %v9589_v55, %v9615_v39  ;;  %v4676_v25 = vshll.u32 %v9358_v42, 16  ;;  %v6879_v32 = vrot.slane %v9609_v38, 9  ;;  %v4664_v4 = vrot.slane %v4663_v2, 4  ;;  %v9661_v49 = vld [vmem:[#allocation2 + $0xbc] sm:$0x1] }
 0x276   : > { %10939 = vst [vmem:[#allocation58_spill] sm:$0xff] %v9596_v21  ;;  %7558 = vmatprep.mubr.msk.bf16.mxu1 %vm1642_vm4, %v10940_v1  ;;  %v4674_v50 = vrot.slane %v4673_v58, 4  ;;  %10945 = vst [vmem:[#allocation61_spill] sm:$0xff] %v9661_v49  ;;  %v5479_v1 = vrot.slane %v9621_v60, 5  ;;  %v4683_v55 = vrot.slane %v4681_v24, 4  ;;  %v4686_v39 = vrot.slane %v4684_v3, 5 }
 0x277   : > { %7655 = vmatmul.mubr.msk.bf16.gmra.mxu0 %vm1642_vm4, %v10941_v15  ;;  %v9627_v6 = vpop.f32.mrf.mxu1  ;;  %v9629_v36 = vpop.f32.mrf.mxu0  ;;  %v4690_v42 = vshll.u32 %v9349_v34, 16  ;;  %v4694_v38 = vshrl.u32 %v9349_v34, 16  ;;  %v4705_v15 = vshrl.u32 %v4593_v23, 16  ;;  %v4714_v28 = vshll.u32 %v9351_v14, 16  ;;  %v9690_v21 = vld [vmem:[#allocation2 + $0xc4] sm:$0xf] }
 0x278   : > { %10942 = vst [vmem:[#allocation59_spill] sm:$0xff] %v9627_v6  ;;  %7658 = vmatprep.mubr.msk.bf16.mxu0 %vm1642_vm4, %v10943_v16  ;;  %v4708_v16 = vshll.u32 %v4593_v23, 16  ;;  %v4718_v41 = vshrl.u32 %v9351_v14, 16  ;;  %v4678_v30 = vrot.slane %v4676_v25, 5  ;;  %v5482_v2 = vrot.slane %v9661_v49, 5 }
 0x279   : > { %v9655_v22 = vpop.f32.mrf.mxu1  ;;  %v9657_v45 = vpop.f32.mrf.mxu0  ;;  %v4729_v58 = vshrl.u32 %v4596_v37, 16  ;;  %v4732_v20 = vshll.u32 %v4596_v37, 16  ;;  %v4669_v34 = vsel %vm8278_vm3, %v4664_v4, %v9565_v19  ;;  %v5481_v23 = vrot.slane %v5479_v1, 4  ;;  %v4599_v6 = vld [vmem:[#allocation2 + $0x54] sm:$0xf] }
 0x27a   : > { %10944 = vst [vmem:[#allocation60_spill] sm:$0xff] %v9655_v22  ;;  %v10946_v22 = vcombine.low %v9236_v17, %v9240_v46  ;;  %v4738_v14 = vshll.u32 %v9373_v48, 16  ;;  %v4742_v25 = vshrl.u32 %v9373_v48, 16  ;;  %v10948_v37 = vcombine.low %v9254_v12, %v9258_v13  ;;  %v5336_v48 = vld [vmem:[#allocation2 + $0xc0] sm:$0xe] }
 0x27b   : > { %v9673_v24 = vpop.f32.mrf.mxu1  ;;  %v9675_v3 = vpop.f32.mrf.mxu0  ;;  %v4679_v17 = vsel %vm8278_vm3, %v4674_v50, %v4678_v30  ;;  %v4687_v46 = vor.u32 %v4686_v39, %v4683_v55  ;;  %v10949_v19 = vcombine.low %v9502_v56, %v9479_v51  ;;  %v4707_v4 = vrot.slane %v4705_v15, 4 }
 0x27c   : > { %10947 = vst [vmem:[#allocation62_spill] sm:$0xff] %v9673_v24  ;;  %v4696_v24 = vrot.slane %v4694_v38, 4  ;;  %v4710_v49 = vrot.slane %v4708_v16, 5  ;;  %v9696_v12 = vrot.slane %v4714_v28, 5  ;;  %v4720_v13 = vrot.slane %v4718_v41, 4 }
 0x27d   : > { %7559 = vmatmul.mubr.msk.bf16.gmra.mxu1 %vm1642_vm4, %v10946_v22  ;;  %v9688_v22 = vrot.slane %v4690_v42, 5  ;;  %v10950_v30 = vcombine.low %v9519_v18, %v9546_v0  ;;  %v4731_v50 = vrot.slane %v4729_v58, 4  ;;  %v4734_v55 = vrot.slane %v4732_v20, 5 }
 0x27e   : > { %7562 = vmatprep.mubr.msk.bf16.mxu1 %vm1642_vm4, %v10948_v37  ;;  %v4753_v39 = vshrl.u32 %v4599_v6, 16  ;;  %v4756_v42 = vshll.u32 %v4599_v6, 16  ;;  %v4700_v56 = vshll.u32 %v9362_v57, 16  ;;  %v5486_v15 = vrot.slane %v9690_v21, 5 }
 0x27f   : > { %7659 = vmatmul.mubr.msk.bf16.gmra.mxu0 %vm1642_vm4, %v10949_v19  ;;  %v9708_v28 = vrot.slane %v4738_v14, 5  ;;  %v4744_v41 = vrot.slane %v4742_v25, 4  ;;  %v9710_v16 = vcombine.low %v4645_v52, %v4655_v31  ;;  %v9714_v18 = vsel %vm8315_vm10, %v5481_v23, %v5482_v2  ;;  %v9729_v52 = vld [vmem:[#allocation2 + $0xc8] sm:$0x1] }
 0x280   : > { %7662 = vmatprep.mubr.msk.bf16.mxu0 %vm1642_vm4, %v10950_v30  ;;  %v4697_v0 = vor.u32 %v4696_v24, %v9688_v22  ;;  %v6880_v6 = vrot.slane %v5336_v48, 9  ;;  %v9721_v37 = vcombine.low %v4669_v34, %v4679_v17  ;;  %v9725_v57 = vsel %vm8315_vm10, %v6879_v32, %v5479_v1  ;;  %v4602_v30 = vld [vmem:[#allocation2 + $0x60] sm:$0xf] }
 0x281   : > { %v9702_v38 = vpop.f32.mrf.mxu1  ;;  %v9704_v51 = vpop.f32.mrf.mxu0  ;;  %v9727_v14 = vrot.slane %v4687_v46, 4  ;;  %v4711_v31 = vor.u32 %v4710_v49, %v4707_v4  ;;  %v4721_v2 = vor.u32 %v4720_v13, %v9696_v12  ;;  %v4735_v23 = vor.u32 %v4734_v55, %v4731_v50 }
 0x282   : > { %v4755_v24 = vrot.slane %v4753_v39, 4  ;;  %v4758_v25 = vrot.slane %v4756_v42, 5  ;;  %v10951_v19 = vcombine.low %v9268_v29, %v9272_v35  ;;  %v4702_v1 = vrot.slane %v4700_v56, 5 }
 0x283   : > { %v9717_v20 = vpop.f32.mrf.mxu1  ;;  %v9719_v58 = vpop.f32.mrf.mxu0  ;;  %v5488_v46 = vrot.slane %v5486_v15, 4  ;;  %v4745_v49 = vor.u32 %v4744_v41, %v9708_v28  ;;  %v10952_v48 = vcombine.low %v9288_v5, %v9292_v11  ;;  %v4698_v4 = vrot.slane %v4697_v0, 4 }
 0x284   : > { %v9749_v29 = vsel %vm8315_vm10, %v6880_v6, %v5486_v15  ;;  %v5489_v35 = vrot.slane %v9729_v52, 5  ;;  %v4724_v13 = vshll.u32 %v9368_v61, 16  ;;  %v10953_v50 = vcombine.low %v9573_v7, %v9577_v27  ;;  %v10956_v6 = vld [vmem:[#allocation32_spill] sm:$0xff] }
 0x285   : > { %7563 = vmatmul.mubr.msk.bf16.gmra.mxu1 %vm1642_vm4, %v10951_v19  ;;  %v9736_v34 = vpop.f32.mrf.mxu1  ;;  %v9738_v17 = vpop.f32.mrf.mxu0  ;;  %v4693_v5 = vsel %vm8278_vm3, %v9727_v14, %v9688_v22  ;;  %v4748_v11 = vshll.u32 %v9409_v9, 16  ;;  %v4762_v55 = vshll.u32 %v9375_v8, 16  ;;  %v4766_v39 = vshrl.u32 %v9375_v8, 16  ;;  %v10957_v19 = vld [vmem:[#allocation37_spill] sm:$0xff] }
 0x286   : > { %7566 = vmatprep.mubr.msk.bf16.mxu1 %vm1642_vm4, %v10952_v48  ;;  %v10954_v61 = vcombine.low %v9602_v53, %v9581_v59  ;;  %v4712_v42 = vrot.slane %v4711_v31, 4  ;;  %v4722_v27 = vrot.slane %v4721_v2, 4  ;;  %v4736_v7 = vrot.slane %v4735_v23, 4  ;;  %v4605_v2 = vld [vmem:[#allocation2 + $0x6c] sm:$0xf] }
 0x287   : > { %7663 = vmatmul.mubr.msk.bf16.gmra.mxu0 %vm1642_vm4, %v10953_v50  ;;  %v4759_v56 = vor.u32 %v4758_v25, %v4755_v24  ;;  %v9768_v15 = vpop.f32.mrf.mxu1  ;;  %v9770_v41 = vpop.f32.mrf.mxu0  ;;  %v9774_v9 = vsel %vm8315_vm10, %v5488_v46, %v5489_v35  ;;  %v4746_v22 = vrot.slane %v4745_v49, 4  ;;  %v4777_v0 = vshrl.u32 %v4602_v30, 16  ;;  %v10960_v50 = vld [vmem:[#allocation21_spill] sm:$0xff] }
 0x288   : > { %7666 = vmatprep.mubr.msk.bf16.mxu0 %vm1642_vm4, %v10954_v61  ;;  %10955 = vst [vmem:[#allocation63_spill] sm:$0xff] %v9770_v41  ;;  %v4780_v8 = vshll.u32 %v4602_v30, 16  ;;  %v4703_v59 = vsel %vm8278_vm3, %v4698_v4, %v4702_v1  ;;  %v4726_v53 = vrot.slane %v4724_v13, 5  ;;  %v4786_v14 = vshll.u32 %v10956_v6, 16  ;;  %v10959_v30 = vld [vmem:[#allocation20_spill] sm:$0xff] }
 0x289   : > { %v4790_v31 = vshrl.u32 %v10956_v6, 16  ;;  %v4750_v23 = vrot.slane %v4748_v11, 5  ;;  %v9780_v24 = vrot.slane %v4762_v55, 5  ;;  %v4768_v25 = vrot.slane %v4766_v39, 4 }
 0x28a   : > { %v4772_v48 = vshll.u32 %v10957_v19, 16  ;;  %v4717_v46 = vsel %vm8278_vm3, %v4712_v42, %v9696_v12  ;;  %v4727_v49 = vsel %vm8278_vm3, %v4722_v27, %v4726_v53  ;;  %v4741_v1 = vsel %vm8278_vm3, %v4736_v7, %v9708_v28  ;;  %v9803_v42 = vld [vmem:[#allocation2 + $0xd0] sm:$0xf] }
 0x28b   : > { %v9791_v4 = vrot.slane %v4759_v56, 4  ;;  %v10961_v11 = vcombine.low %v10959_v30, %v10960_v50  ;;  %v4751_v12 = vsel %vm8278_vm3, %v4746_v22, %v4750_v23  ;;  %v4779_v55 = vrot.slane %v4777_v0, 4 }
 0x28c   : > { %v4782_v39 = vrot.slane %v4780_v8, 5  ;;  %v4801_v61 = vshrl.u32 %v4605_v2, 16  ;;  %v6896_v28 = vcombine.low %v9749_v29, %v9774_v9  ;;  %v9809_v27 = vrot.slane %v4786_v14, 5  ;;  %v4608_v29 = vld [vmem:[#allocation2 + $0x78] sm:$0xf] }
 0x28d   : > { %v9793_v35 = vpop.f32.mrf.mxu1  ;;  %v9795_v13 = vpop.f32.mrf.mxu0  ;;  %7567 = vmatmul.mubr.msk.bf16.gmra.mxu1 %vm1642_vm4, %v10961_v11  ;;  %v4792_v7 = vrot.slane %v4790_v31, 4  ;;  %v4804_v56 = vshll.u32 %v4605_v2, 16  ;;  %v10962_v53 = vcombine.low %v9606_v54, %v9585_v63  ;;  %v6834_v8 = vcombine.low %v4693_v5, %v4703_v59  ;;  %v10965_v5 = vld [vmem:[#allocation38_spill] sm:$0xff]  ;;  %v4611_v14 = vld [vmem:[#allocation2 + $0x84] sm:$0xf]  ;;  %v10970_v54 = vld [vmem:[#allocation41_spill] sm:$0xff] }
 0x28e   : > { %10958 = vst [vmem:[#allocation32_spill] sm:$0xff] %v9793_v35  ;;  %7610 = vmatprep.mubr.msk.bf16.mxu1 %vm1642_vm4, %v9710_v16  ;;  %v9819_v6 = vcombine.low %v4717_v46, %v4727_v49  ;;  %v4769_v16 = vor.u32 %v4768_v25, %v9780_v24  ;;  %v9822_v23 = vrot.slane %v4772_v48, 5  ;;  %v10964_v9 = vcombine.low %v9639_v33, %v9619_v44  ;;  %v9835_v31 = vld [vmem:[#allocation2 + $0xd4] sm:$0x1] }
 0x28f   : > { %7667 = vmatmul.mubr.msk.bf16.gmra.mxu0 %vm1642_vm4, %v10962_v53  ;;  %v9815_v22 = vpop.f32.mrf.mxu1  ;;  %v9817_v0 = vpop.f32.mrf.mxu0  ;;  %v9828_v63 = vcombine.low %v4741_v1, %v4751_v12  ;;  %v4796_v59 = vshll.u32 %v10965_v5, 16  ;;  %v5493_v2 = vrot.slane %v9803_v42, 5  ;;  %v4783_v44 = vor.u32 %v4782_v39, %v4779_v55  ;;  %v10967_v48 = vld [vmem:[#allocation33_spill] sm:$0xff]  ;;  %v5337_v1 = vld [vmem:[#allocation2 + $0xcc] sm:$0xe] }
 0x290   : > { %10963 = vst [vmem:[#allocation37_spill] sm:$0xff] %v9815_v22  ;;  %7670 = vmatprep.mubr.msk.bf16.mxu0 %vm1642_vm4, %v10964_v9  ;;  %v4803_v33 = vrot.slane %v4801_v61, 4  ;;  %v4810_v46 = vshll.u32 %v10967_v48, 16  ;;  %v4814_v49 = vshrl.u32 %v10967_v48, 16  ;;  %v4793_v30 = vor.u32 %v4792_v7, %v9809_v27 }
 0x291   : > { %v9838_v25 = vpop.f32.mrf.mxu1  ;;  %v9840_v19 = vpop.f32.mrf.mxu0  ;;  %v4806_v50 = vrot.slane %v4804_v56, 5  ;;  %v4825_v11 = vshrl.u32 %v4608_v29, 16  ;;  %v4828_v12 = vshll.u32 %v4608_v29, 16  ;;  %v9849_v5 = vrot.slane %v4769_v16, 4 }
 0x292   : > { %10966 = vst [vmem:[#allocation20_spill] sm:$0xff] %v9838_v25  ;;  %v4834_v32 = vshll.u32 %v10970_v54, 16  ;;  %v4838_v55 = vshrl.u32 %v10970_v54, 16  ;;  %v4849_v39 = vshrl.u32 %v4611_v14, 16  ;;  %v4852_v61 = vshll.u32 %v4611_v14, 16 }
 0x293   : > { %v9845_v53 = vpop.f32.mrf.mxu1  ;;  %v9847_v9 = vpop.f32.mrf.mxu0  ;;  %v6881_v41 = vrot.slane %v5337_v1, 9  ;;  %v5495_v48 = vrot.slane %v5493_v2, 4  ;;  %v5496_v25 = vrot.slane %v9835_v31, 5  ;;  %v9860_v29 = vrot.slane %v4783_v44, 4 }
 0x294   : > { %10968 = vst [vmem:[#allocation21_spill] sm:$0xff] %v9845_v53  ;;  %10969 = vst [vmem:[#allocation38_spill] sm:$0xff] %v9847_v9  ;;  %v9862_v16 = vrot.slane %v4796_v59, 5  ;;  %v9864_v9 = vrot.slane %v4810_v46, 5  ;;  %v4816_v54 = vrot.slane %v4814_v49, 4  ;;  %v9867_v14 = vrot.slane %v4793_v30, 4 }
 0x295   : > { %v9854_v7 = vpop.f32.mrf.mxu1  ;;  %v9856_v56 = vpop.f32.mrf.mxu0  ;;  %7611 = vmatmul.mubr.msk.bf16.vlgmr.msra.gmra.mxu1 %vm1642_vm4, %v9721_v37  ;;  %v4807_v1 = vor.u32 %v4806_v50, %v4803_v33  ;;  %v4827_v53 = vrot.slane %v4825_v11, 4  ;;  %v4830_v22 = vrot.slane %v4828_v12, 5  ;;  %v10972_v35 = vcombine.low %v9725_v57, %v9714_v18  ;;  %v10974_v49 = vld [vmem:[#allocation45_spill] sm:$0xff]  ;;  %v10976_v12 = vld [vmem:[#allocation39_spill] sm:$0xff] }
 0x296   : > { %10971 = vst [vmem:[#allocation33_spill] sm:$0xff] %v9854_v7  ;;  %7614 = vmatprep.mubr.msk.bf16.mxu1 %vm1642_vm4, %v6834_v8  ;;  %v4614_v7 = vld [vmem:[#allocation2 + $0x90] sm:$0xf]  ;;  %v9877_v44 = vrot.slane %v4834_v32, 5  ;;  %v4840_v46 = vrot.slane %v4838_v55, 4  ;;  %v4858_v8 = vshll.u32 %v10974_v49, 16  ;;  %v5494_v18 = vsel %vm8315_vm10, %v6881_v41, %v5493_v2 }
 0x297   : > { %7671 = vmatmul.mubr.msk.bf16.gmra.mxu0 %vm1642_vm4, %v10972_v35  ;;  %v9873_v37 = vpop.f32.mrf.mxu1  ;;  %v9875_v59 = vpop.f32.mrf.mxu0  ;;  %v4862_v30 = vshrl.u32 %v10974_v49, 16  ;;  %v4851_v33 = vrot.slane %v4849_v39, 4  ;;  %v4854_v50 = vrot.slane %v4852_v61, 5  ;;  %v5497_v57 = vsel %vm8315_vm10, %v5495_v48, %v5496_v25  ;;  %v10977_v2 = vld [vmem:[#allocation46_spill] sm:$0xff] }
 0x298   : > { %10973 = vst [vmem:[#allocation41_spill] sm:$0xff] %v9873_v37  ;;  %7674 = vmatprep.mubr.msk.bf16.mxu0 %vm1642_vm4, %v6896_v28  ;;  %v4775_v32 = vsel %vm8278_vm3, %v9849_v5, %v9822_v23  ;;  %v4820_v55 = vshll.u32 %v10976_v12, 16  ;;  %v4873_v28 = vshrl.u32 %v4614_v7, 16  ;;  %v4876_v39 = vshll.u32 %v4614_v7, 16  ;;  %v4617_v48 = vld [vmem:[#allocation2 + $0x9c] sm:$0xf] }
 0x299   : > { %v9886_v35 = vpop.f32.mrf.mxu1  ;;  %v9888_v11 = vpop.f32.mrf.mxu0  ;;  %v4789_v41 = vsel %vm8278_vm3, %v9860_v29, %v9809_v27  ;;  %v4817_v26 = vor.u32 %v4816_v54, %v9864_v9  ;;  %v4882_v25 = vshll.u32 %v10977_v2, 16  ;;  %v4886_v61 = vshrl.u32 %v10977_v2, 16 }
 0x29a   : > { %10975 = vst [vmem:[#allocation45_spill] sm:$0xff] %v9886_v35  ;;  %v4831_v23 = vor.u32 %v4830_v22, %v4827_v53  ;;  %v9906_v5 = vrot.slane %v4858_v8, 5  ;;  %v4864_v7 = vrot.slane %v4862_v30, 4  ;;  %v6897_v12 = vcombine.low %v5494_v18, %v5497_v57 }
 0x29b   : > { %v9902_v49 = vpop.f32.mrf.mxu1  ;;  %v9904_v35 = vpop.f32.mrf.mxu0  ;;  %v4799_v27 = vsel %vm8278_vm3, %v9867_v14, %v9862_v16  ;;  %v9912_v29 = vrot.slane %v4807_v1, 4  ;;  %v4841_v54 = vor.u32 %v4840_v46, %v9877_v44  ;;  %v4855_v2 = vor.u32 %v4854_v50, %v4851_v33  ;;  %v10980_v14 = vld [vmem:[#allocation44_spill] sm:$0xff] }
 0x29c   : > { %10978 = vst [vmem:[#allocation39_spill] sm:$0xff] %v9902_v49  ;;  %v4875_v22 = vrot.slane %v4873_v28, 4  ;;  %v4878_v53 = vrot.slane %v4876_v39, 5  ;;  %v4897_v8 = vshrl.u32 %v4617_v48, 16  ;;  %v4900_v30 = vshll.u32 %v4617_v48, 16  ;;  %v10982_v28 = vld [vmem:[#allocation49_spill] sm:$0xff] }
 0x29d   : > { %v9915_v37 = vpop.f32.mrf.mxu1  ;;  %v9917_v49 = vpop.f32.mrf.mxu0  ;;  %7615 = vmatmul.mubr.msk.bf16.gmra.mxu1 %vm1642_vm4, %v9819_v6  ;;  %v9923_v16 = vrot.slane %v4817_v26, 4  ;;  %v4844_v1 = vshll.u32 %v10980_v14, 16  ;;  %v9926_v46 = vrot.slane %v4882_v25, 5  ;;  %v4888_v33 = vrot.slane %v4886_v61, 4 }
 0x29e   : > { %10979 = vst [vmem:[#allocation46_spill] sm:$0xff] %v9915_v37  ;;  %7618 = vmatprep.mubr.msk.bf16.mxu1 %vm1642_vm4, %v9828_v63  ;;  %v9932_v57 = vrot.slane %v4831_v23, 4  ;;  %v4865_v6 = vor.u32 %v4864_v7, %v9906_v5  ;;  %v4868_v39 = vshll.u32 %v10982_v28, 16  ;;  %v10983_v63 = vsel %vm8278_vm3, %v9791_v4, %v9780_v24 }
 0x29f   : > { %v9928_v50 = vpop.f32.mrf.mxu1  ;;  %v9930_v18 = vpop.f32.mrf.mxu0  ;;  %7675 = vmatmul.mubr.msk.bf16.gmra.mxu0 %vm1642_vm4, %v6897_v12  ;;  %v6837_v26 = vcombine.low %v10983_v63, %v4775_v32  ;;  %v4822_v25 = vrot.slane %v4820_v55, 5  ;;  %v4842_v61 = vrot.slane %v4841_v54, 4  ;;  %v9942_v48 = vrot.slane %v4855_v2, 4  ;;  %v4620_v55 = vld [vmem:[#allocation2 + $0xa8] sm:$0xf] }
 0x2a0   : > { %10981 = vst [vmem:[#allocation44_spill] sm:$0xff] %v9928_v50  ;;  %v6838_v50 = vcombine.low %v4789_v41, %v4799_v27  ;;  %v4879_v7 = vor.u32 %v4878_v53, %v4875_v22  ;;  %v4899_v37 = vrot.slane %v4897_v8, 4  ;;  %v4902_v28 = vrot.slane %v4900_v30, 5  ;;  %v10986_v53 = vld [vmem:[#allocation52_spill] sm:$0xff] }
 0x2a1   : > { %v9944_v14 = vpop.f32.mrf.mxu1  ;;  %v9946_v23 = vpop.f32.mrf.mxu0  ;;  %v4813_v12 = vsel %vm8278_vm3, %v9912_v29, %v9864_v9  ;;  %v4823_v24 = vsel %vm8278_vm3, %v9923_v16, %v4822_v25  ;;  %v4846_v4 = vrot.slane %v4844_v1, 5  ;;  %v4889_v32 = vor.u32 %v4888_v33, %v9926_v46  ;;  %v10987_v29 = vld [vmem:[#allocation19_spill] sm:$0xff]  ;;  %v10988_v1 = vld [vmem:[#allocation48_spill] sm:$0xff] }
 0x2a2   : > { %10984 = vst [vmem:[#allocation49_spill] sm:$0xff] %v9944_v14  ;;  %v4837_v41 = vsel %vm8278_vm3, %v9932_v57, %v9877_v44  ;;  %v4866_v27 = vrot.slane %v4865_v6, 4  ;;  %v4870_v22 = vrot.slane %v4868_v39, 5  ;;  %v4892_v9 = vshll.u32 %v10986_v53, 16 }
 0x2a3   : > { %v2045_v54 = vpop.f32.mrf.mxu1  ;;  %v9956_v2 = vpop.f32.mrf.mxu0  ;;  %v4847_v30 = vsel %vm8278_vm3, %v4842_v61, %v4846_v4  ;;  %v4861_v16 = vsel %vm8278_vm3, %v9942_v48, %v9906_v5  ;;  %v4906_v33 = vshll.u32 %v10988_v1, 16  ;;  %v4880_v44 = vrot.slane %v4879_v7, 4 }
 0x2a4   : > { %10985 = vst [vmem:[#allocation64_spill] sm:$0xff] %v9956_v2  ;;  %v2046_v8 = vadd.f32 %v2045_v54, %v10987_v29  ;;  %v4903_v57 = vor.u32 %v4902_v28, %v4899_v37  ;;  %v4910_v6 = vshrl.u32 %v10988_v1, 16  ;;  %v4921_v39 = vshrl.u32 %v4620_v55, 16  ;;  %v10990_v54 = vld [vmem:[#allocation23_spill] sm:$0xff]  ;;  %v10991_v29 = vld [vmem:[#allocation42_spill] sm:$0xff]  ;;  %v10994_v37 = vld [vmem:[#allocation53_spill] sm:$0xff] }
 0x2a5   : > { %v7404_v63 = vpop.f32.mrf.mxu1  ;;  %v9971_v25 = vpop.f32.mrf.mxu0  ;;  %7619 = vmatmul.mubr.msk.bf16.gmra.mxu1 %vm1642_vm4, %v6837_v26  ;;  %v4890_v61 = vrot.slane %v4889_v32, 4  ;;  %v4924_v4 = vshll.u32 %v4620_v55, 16  ;;  %v4871_v26 = vsel %vm8278_vm3, %v4866_v27, %v4870_v22  ;;  %v4894_v7 = vrot.slane %v4892_v9, 5  ;;  %v10995_v32 = vld [vmem:[#allocation25_spill] sm:$0xff] }
 0x2a6   : > { %10989 = vst [vmem:[#allocation52_spill] sm:$0xff] %v9971_v25  ;;  %v2067_v53 = vadd.f32 %v7404_v63, %v10990_v54  ;;  %7622 = vmatprep.mubr.msk.bf16.mxu1 %vm1642_vm4, %v6838_v50  ;;  %v9978_v5 = vadd.f32 %v10991_v29, %v2046_v8  ;;  %v4930_v28 = vshll.u32 %v10994_v37, 16  ;;  %v4934_v1 = vshrl.u32 %v10994_v37, 16  ;;  %v7863_v50 = vld [vmem:[%s10830_s3 + $0x8] sm:$0xff]   ;;  %v10996_v54 = vld [vmem:[#allocation47_spill] sm:$0xff] }
 0x2a7   : > { %v2058_v48 = vpop.f32.mrf.mxu1  ;;  %v9980_v14 = vpop.f32.mrf.mxu0  ;;  %v9990_v63 = vrot.slane %v4906_v33, 5  ;;  %v4916_v8 = vshll.u32 %v9555_v40, 16  ;;  %v4885_v22 = vsel %vm8278_vm3, %v4880_v44, %v9926_v46  ;;  %v10001_v9 = vrot.slane %v4903_v57, 4  ;;  %7678 = vmatprep.subr.bf16.mxu1 %v7863_v50 }
 0x2a8   : > { %10992 = vst [vmem:[#allocation19_spill] sm:$0xff] %v9978_v5  ;;  %10993 = vst [vmem:[#allocation48_spill] sm:$0xff] %v9980_v14  ;;  %v2059_v55 = vadd.f32 %v2058_v48, %v10995_v32  ;;  %v9994_v29 = vadd.f32 %v10996_v54, %v2067_v53  ;;  %v4912_v37 = vrot.slane %v4910_v6, 4  ;;  %v4923_v14 = vrot.slane %v4921_v39, 4  ;;  %v10999_v48 = vld [vmem:[#allocation27_spill] sm:$0xff]  ;;  %7679 = vmatpush3.bf16.msra.mxu1 %v7863_v50  ;;  %v11002_v39 = vld [vmem:[#allocation29_spill] sm:$0xff] }
 0x2a9   : > { %v7405_v5 = vpop.f32.mrf.mxu1  ;;  %v9996_v27 = vpop.f32.mrf.mxu0  ;;  %v4895_v40 = vsel %vm8278_vm3, %v4890_v61, %v4894_v7  ;;  %v4926_v32 = vrot.slane %v4924_v4, 5  ;;  %v11000_v53 = vld [vmem:[#allocation51_spill] sm:$0xff]  ;;  %v6839_v25 = vcombine.low %v4813_v12, %v4823_v24  ;;  %v6840_v46 = vcombine.low %v4837_v41, %v4847_v30  ;;  %v4623_v6 = vld [vmem:[#allocation2 + $0xb4] sm:$0xf] }
 0x2aa   : > { %10997 = vst [vmem:[#allocation23_spill] sm:$0xff] %v9994_v29  ;;  %10998 = vst [vmem:[#allocation42_spill] sm:$0xff] %v9996_v27  ;;  %v2070_v33 = vadd.f32 %v7405_v5, %v10999_v48  ;;  %v10007_v54 = vadd.f32 %v11000_v53, %v2059_v55  ;;  %v10011_v44 = vrot.slane %v4930_v28, 5  ;;  %v4936_v57 = vrot.slane %v4934_v1, 4  ;;  %v11003_v61 = vld [vmem:[#allocation55_spill] sm:$0xff] }
 0x2ab   : > { %v2061_v29 = vpop.f32.mrf.mxu1  ;;  %v10009_v27 = vpop.f32.mrf.mxu0  ;;  %v6841_v5 = vcombine.low %v4861_v16, %v4871_v26  ;;  %v10014_v48 = vrot.slane %v4916_v8, 5  ;;  %v6842_v50 = vcombine.low %v4885_v22, %v4895_v40  ;;  %v4913_v24 = vor.u32 %v4912_v37, %v9990_v63  ;;  %v4626_v30 = vld [vmem:[#allocation2 + $0xc0] sm:$0xf] }
 0x2ac   : > { %11001 = vst [vmem:[#allocation53_spill] sm:$0xff] %v10007_v54  ;;  %v2062_v2 = vadd.f32 %v2061_v29, %v11002_v39  ;;  %v10017_v4 = vadd.f32 %v11003_v61, %v2070_v33  ;;  %v4940_v41 = vshll.u32 %v9563_v10, 16  ;;  %v11005_v16 = vld [vmem:[#allocation31_spill] sm:$0xff]  ;;  %v4927_v28 = vor.u32 %v4926_v32, %v4923_v14 }
 0x2ad   : > { %v7408_v7 = vpop.f32.mrf.mxu1  ;;  %v10019_v55 = vpop.f32.mrf.mxu0  ;;  %7623 = vmatmul.mubr.msk.bf16.gmra.mxu1 %vm1642_vm4, %v6839_v25  ;;  %v4945_v1 = vshrl.u32 %v4623_v6, 16  ;;  %v4937_v22 = vor.u32 %v4936_v57, %v10011_v44  ;;  %v4948_v33 = vshll.u32 %v4623_v6, 16  ;;  %v4954_v37 = vshll.u32 %v9621_v60, 16  ;;  %v11007_v40 = vld [vmem:[#allocation35_spill] sm:$0xff]  ;;  %v11009_v6 = vld [vmem:[#allocation40_spill] sm:$0xff] }
 0x2ae   : > { %11004 = vst [vmem:[#allocation25_spill] sm:$0xff] %v10017_v4  ;;  %v2083_v26 = vadd.f32 %v7408_v7, %v11005_v16  ;;  %7626 = vmatprep.mubr.msk.bf16.mxu1 %vm1642_vm4, %v6840_v46  ;;  %v10031_v8 = vadd.f32 %v9561_v47, %v2062_v2  ;;  %v4958_v10 = vshrl.u32 %v9621_v60, 16  ;;  %v4969_v39 = vshrl.u32 %v4626_v30, 16 }
 0x2af   : > { %v2074_v25 = vpop.f32.mrf.mxu1  ;;  %v10033_v29 = vpop.f32.mrf.mxu0  ;;  %v4972_v61 = vshll.u32 %v4626_v30, 16  ;;  %v4914_v2 = vrot.slane %v4913_v24, 4  ;;  %v4942_v46 = vrot.slane %v4940_v41, 5  ;;  %v4978_v7 = vshll.u32 %v9690_v21, 16  ;;  %v11010_v41 = vld [vmem:[#allocation43_spill] sm:$0xff] }
 0x2b0   : > { %11006 = vst [vmem:[#allocation47_spill] sm:$0xff] %v10031_v8  ;;  %v2075_v53 = vadd.f32 %v2074_v25, %v11007_v40  ;;  %v10040_v14 = vadd.f32 %v9598_v62, %v2083_v26  ;;  %v4982_v57 = vshrl.u32 %v9690_v21, 16  ;;  %v4928_v12 = vrot.slane %v4927_v28, 4  ;;  %v4629_v8 = vld [vmem:[#allocation2 + $0xcc] sm:$0xf] }
 0x2b1   : > { %v7409_v32 = vpop.f32.mrf.mxu1  ;;  %v10042_v47 = vpop.f32.mrf.mxu0  ;;  %v4947_v60 = vrot.slane %v4945_v1, 4  ;;  %v4938_v26 = vrot.slane %v4937_v22, 4  ;;  %v4950_v40 = vrot.slane %v4948_v33, 5  ;;  %v4960_v24 = vrot.slane %v4958_v10, 4 }
 0x2b2   : > { %11008 = vst [vmem:[#allocation27_spill] sm:$0xff] %v10040_v14  ;;  %v2086_v16 = vadd.f32 %v7409_v32, %v11009_v6  ;;  %v10048_v25 = vadd.f32 %v9629_v36, %v2075_v53  ;;  %v10052_v14 = vrot.slane %v4954_v37, 5  ;;  %v4971_v54 = vrot.slane %v4969_v39, 4  ;;  %v11011_v37 = vld [vmem:[#allocation50_spill] sm:$0xff] }
 0x2b3   : > { %v2077_v30 = vpop.f32.mrf.mxu1  ;;  %v10050_v62 = vpop.f32.mrf.mxu0  ;;  %v4974_v21 = vrot.slane %v4972_v61, 5  ;;  %v10061_v36 = vrot.slane %v4978_v7, 5  ;;  %v4984_v53 = vrot.slane %v4982_v57, 4  ;;  %v4993_v22 = vshrl.u32 %v4629_v8, 16 }
 0x2b4   : > { %v2078_v4 = vadd.f32 %v2077_v30, %v11010_v41  ;;  %v10056_v32 = vadd.f32 %v9657_v45, %v2086_v16  ;;  %v4996_v33 = vshll.u32 %v4629_v8, 16  ;;  %v5002_v10 = vshll.u32 %v9803_v42, 16  ;;  %v11013_v30 = vld [vmem:[#allocation54_spill] sm:$0xff] }
 0x2b5   : > { %v7412_v28 = vpop.f32.mrf.mxu1  ;;  %v10058_v1 = vpop.f32.mrf.mxu0  ;;  %7627 = vmatmul.mubr.msk.bf16.gmra.mxu1 %vm1642_vm4, %v6841_v5  ;;  %v5006_v39 = vshrl.u32 %v9803_v42, 16  ;;  %v4919_v5 = vsel %vm8278_vm3, %v4914_v2, %v10014_v48  ;;  %v4933_v8 = vsel %vm8278_vm3, %v4928_v12, %v10011_v44  ;;  %v4951_v7 = vor.u32 %v4950_v40, %v4947_v60  ;;  %v11014_v60 = vld [vmem:[#allocation56_spill] sm:$0xff] }
 0x2b6   : > { %v2099_v6 = vadd.f32 %v7412_v28, %v11011_v37  ;;  %7630 = vmatprep.mubr.msk.bf16.mxu1 %vm1642_vm4, %v6842_v50  ;;  %v10068_v45 = vadd.f32 %v9675_v3, %v2078_v4  ;;  %v11012_v50 = vld [vmem:[#allocation61_spill] sm:$0xff]  ;;  %v4943_v3 = vsel %vm8278_vm3, %v4938_v26, %v4942_v46  ;;  %v4961_v42 = vor.u32 %v4960_v24, %v10052_v14 }
 0x2b7   : > { %v2090_v61 = vpop.f32.mrf.mxu1  ;;  %v10070_v16 = vpop.f32.mrf.mxu0  ;;  %v4964_v57 = vshll.u32 %v11012_v50, 16  ;;  %v4975_v48 = vor.u32 %v4974_v21, %v4971_v54  ;;  %v4985_v2 = vor.u32 %v4984_v53, %v10061_v36  ;;  %v4995_v44 = vrot.slane %v4993_v22, 4 }
 0x2b8   : > { %v2091_v41 = vadd.f32 %v2090_v61, %v11013_v30  ;;  %v10084_v4 = vadd.f32 %v9704_v51, %v2099_v6  ;;  %v4998_v12 = vrot.slane %v4996_v33, 5  ;;  %v5004_v50 = vrot.slane %v5002_v10, 5 }
 0x2b9   : > { %v7413_v28 = vpop.f32.mrf.mxu1  ;;  %v10086_v37 = vpop.f32.mrf.mxu0  ;;  %v5008_v61 = vrot.slane %v5006_v39, 4  ;;  %v11015_v51 = vsel %vm8278_vm3, %v10001_v9, %v9990_v63  ;;  %v4988_v24 = vshll.u32 %v9729_v52, 16  ;;  %v6844_v21 = vcombine.low %v4933_v8, %v4943_v3  ;;  %v11017_v3 = vld [vmem:[#allocation59_spill] sm:$0xff] }
 0x2ba   : > { %v2102_v40 = vadd.f32 %v7413_v28, %v11014_v60  ;;  %v10091_v30 = vadd.f32 %v9719_v58, %v2091_v41  ;;  %v6843_v54 = vcombine.low %v11015_v51, %v4919_v5  ;;  %v4952_v53 = vrot.slane %v4951_v7, 4  ;;  %v11016_v28 = vld [vmem:[#allocation58_spill] sm:$0xff] }
 0x2bb   : > { %v10093_v46 = vpop.f32.mrf.mxu1  ;;  %v10095_v26 = vpop.f32.mrf.mxu0  ;;  %v4962_v22 = vrot.slane %v4961_v42, 4  ;;  %v4976_v10 = vrot.slane %v4975_v48, 4  ;;  %v4986_v39 = vrot.slane %v4985_v2, 4  ;;  %v5012_v41 = vshll.u32 %v9835_v31, 16 }
 0x2bc   : > { %v10104_v33 = vadd.f32 %v9738_v17, %v2102_v40  ;;  %v4966_v52 = vrot.slane %v4964_v57, 5  ;;  %v4999_v9 = vor.u32 %v4998_v12, %v4995_v44  ;;  %v5009_v5 = vor.u32 %v5008_v61, %v5004_v50  ;;  %v11018_v61 = vld [vmem:[#allocation60_spill] sm:$0xff] }
 0x2bd   : > { %v7416_v58 = vpop.f32.mrf.mxu1  ;;  %v10106_v6 = vpop.f32.mrf.mxu0  ;;  %7631 = vmatmul.mubr.msk.bf16.gmra.mxu1 %vm1642_vm4, %v6843_v54  ;;  %v4990_v17 = vrot.slane %v4988_v24, 5  ;;  %v4957_v48 = vsel %vm8278_vm3, %v4952_v53, %v10052_v14  ;;  %v4981_v44 = vsel %vm8278_vm3, %v4976_v10, %v10061_v36  ;;  %v5014_v40 = vrot.slane %v5012_v41, 5 }
 0x2be   : > { %v2115_v63 = vadd.f32 %v7416_v58, %v11016_v28  ;;  %7634 = vmatprep.mubr.msk.bf16.mxu1 %vm1642_vm4, %v6844_v21  ;;  %v4967_v31 = vsel %vm8278_vm3, %v4962_v22, %v4966_v52  ;;  %v5000_v14 = vrot.slane %v4999_v9, 4  ;;  %v5010_v54 = vrot.slane %v5009_v5, 4 }
 0x2bf   : > { %v2106_v8 = vpop.f32.mrf.mxu1  ;;  %v10112_v7 = vpop.f32.mrf.mxu0  ;;  %v4991_v12 = vsel %vm8278_vm3, %v4986_v39, %v4990_v17  ;;  %v6845_v53 = vcombine.low %v4957_v48, %v4967_v31  ;;  %v11019_v48 = vld [vmem:[#allocation32_spill] sm:$0xff] }
 0x2c0   : > { %v2107_v42 = vadd.f32 %v2106_v8, %v11017_v3  ;;  %v10121_v2 = vadd.f32 %v9795_v13, %v2115_v63  ;;  %v6846_v22 = vcombine.low %v4981_v44, %v4991_v12  ;;  %v5015_v41 = vsel %vm8278_vm3, %v5010_v54, %v5014_v40  ;;  %v11020_v44 = vld [vmem:[#allocation12_spill] sm:$0xff]  ;;  %v11021_v12 = vld [vmem:[#allocation33_spill] sm:$0xff] }
 0x2c1   : > { %v7417_v60 = vpop.f32.mrf.mxu1  ;;  %v10123_v57 = vpop.f32.mrf.mxu0  ;;  %v2035_v40 = vadd.f32 %v11021_v12, %v11020_v44  ;;  %v11023_v54 = vld [vmem:[#allocation13_spill] sm:$0xff]  ;;  %v11033_v12 = vld [vmem:[#allocation24_spill] sm:$0xff] }
 0x2c2   : > { %v2118_v51 = vadd.f32 %v7417_v60, %v11018_v61  ;;  %v10132_v24 = vadd.f32 %v9817_v0, %v2107_v42  ;;  %v5005_v0 = vsel %vm8278_vm3, %v5000_v14, %v5004_v50  ;;  %v11022_v61 = vld [vmem:[#allocation37_spill] sm:$0xff] }
 0x2c3   : > { %v10134_v13 = vpop.f32.mrf.mxu1  ;;  %v10136_v21 = vpop.f32.mrf.mxu0  ;;  %v6847_v8 = vcombine.low %v5005_v0, %v5015_v41 }
 0x2c4   : > { %v10139_v58 = vadd.f32 %v9840_v19, %v2118_v51  ;;  %v7864_v19 = vld [vmem:[%s10830_s3] sm:$0xff]  }
 0x2c5   : > { %v7420_v36 = vpop.f32.mrf.mxu1  ;;  %v10141_v10 = vpop.f32.mrf.mxu0  ;;  %7635 = vmatmul.mubr.msk.bf16.gmra.mxu1 %vm1642_vm4, %v6845_v53  ;;  %7680 = vmatprep.subr.bf16.mxu1 %v7864_v19  ;;  %v11024_v53 = vld [vmem:[#allocation41_spill] sm:$0xff] }
 0x2c6   : > { %v2131_v39 = vadd.f32 %v7420_v36, %v9702_v38  ;;  %7638 = vmatprep.mubr.msk.bf16.mxu1 %vm1642_vm4, %v6846_v22  ;;  %7681 = vmatpush3.bf16.msra.mxu1 %v7864_v19  ;;  %v2027_v22 = vadd.f32 %v11024_v53, %v11023_v54  ;;  %v11025_v36 = vld [vmem:[#allocation20_spill] sm:$0xff]  ;;  %v11027_v19 = vld [vmem:[#allocation45_spill] sm:$0xff] }
 0x2c7   : > { %v2122_v28 = vpop.f32.mrf.mxu1  ;;  %v10150_v63 = vpop.f32.mrf.mxu0  ;;  %v11036_v53 = vld [vmem:[#allocation16_spill] sm:$0xff] }
 0x2c8   : > { %v2123_v52 = vadd.f32 %v2122_v28, %v9717_v20  ;;  %v10157_v9 = vadd.f32 %v9856_v56, %v2131_v39  ;;  %v11026_v28 = vld [vmem:[#allocation14_spill] sm:$0xff] }
 0x2c9   : > { %v7421_v38 = vpop.f32.mrf.mxu1  ;;  %v10159_v5 = vpop.f32.mrf.mxu0 }
 0x2ca   : > { %v2134_v43 = vadd.f32 %v7421_v38, %v9736_v34  ;;  %v10163_v50 = vadd.f32 %v9875_v59, %v2123_v52  ;;  %v2038_v52 = vadd.f32 %v11027_v19, %v11026_v28  ;;  %v11028_v38 = vld [vmem:[#allocation21_spill] sm:$0xff]  ;;  %v11039_v19 = vld [vmem:[#allocation52_spill] sm:$0xff] }
 0x2cb   : > { %v2125_v17 = vpop.f32.mrf.mxu1  ;;  %v10165_v3 = vpop.f32.mrf.mxu0 }
 0x2cc   : > { %v2126_v42 = vadd.f32 %v2125_v17, %v9768_v15  ;;  %v10169_v20 = vadd.f32 %v9888_v11, %v2134_v43 }
 0x2cd   : > { %v7424_v56 = vpop.f32.mrf.mxu1  ;;  %7639 = vmatmul.mubr.msk.bf16.gmra.mxu1 %vm1642_vm4, %v6847_v8 }
 0x2ce   : > { %v2147_v31 = vadd.f32 %v7424_v56, %v11019_v48  ;;  %v10173_v60 = vpop.f32.mrf.mxu0  ;;  %v10176_v34 = vadd.f32 %v9904_v35, %v2126_v42  ;;  %v11031_v48 = vld [vmem:[#allocation15_spill] sm:$0xff] }
 0x2cf   : > { %v2138_v59 = vpop.f32.mrf.mxu1 }
 0x2d0   : > { %v2139_v51 = vadd.f32 %v2138_v59, %v11022_v61  ;;  %v10181_v15 = vpop.f32.mrf.mxu0  ;;  %v10184_v11 = vadd.f32 %v9917_v49, %v2147_v31  ;;  %v11029_v49 = vld [vmem:[#allocation22_spill] sm:$0xff]  ;;  %v11032_v31 = vld [vmem:[#allocation39_spill] sm:$0xff]  ;;  %v2590_v61 = vadd.f32 %v11033_v12, %v2027_v22 }
 0x2d1   : > { %v7425_v14 = vpop.f32.mrf.mxu1  ;;  %v2592_v17 = vadd.f32 %v11029_v49, %v2035_v40  ;;  %v2030_v59 = vadd.f32 %v11032_v31, %v11031_v48 }
 0x2d2   : > { %v2150_v39 = vadd.f32 %v7425_v14, %v11025_v36  ;;  %v10189_v0 = vpop.f32.mrf.mxu0  ;;  %v10192_v35 = vadd.f32 %v9930_v18, %v2139_v51  ;;  %v11034_v51 = vld [vmem:[#allocation64_spill] sm:$0xff]  ;;  %v11037_v36 = vld [vmem:[#allocation46_spill] sm:$0xff] }
 0x2d3   : > { %v2141_v41 = vpop.f32.mrf.mxu1 }
 0x2d4   : > { %v2142_v8 = vadd.f32 %v2141_v41, %v11028_v38  ;;  %v10197_v43 = vpop.f32.mrf.mxu0  ;;  %v10201_v42 = vadd.f32 %v9946_v23, %v2150_v39  ;;  %v2051_v41 = vadd.f32 %v11037_v36, %v11036_v53  ;;  %v11038_v23 = vld [vmem:[#allocation26_spill] sm:$0xff]  ;;  %v11046_v53 = vld [vmem:[#allocation49_spill] sm:$0xff] }
 0x2d5   : > { %v7468_v56 = vpop.f32.mrf.mxu1  ;;  %v2593_v39 = vadd.f32 %v11038_v23, %v2038_v52 }
 0x2d6   : > { %11030 = vst [vmem:[#allocation51_spill] sm:$0xff] %v10201_v42  ;;  %v2963_v44 = vadd.f32 %v7468_v56, %v2592_v17  ;;  %v10205_v18 = vpop.f32.mrf.mxu0  ;;  %v10209_v14 = vadd.f32 %v11034_v51, %v2142_v8  ;;  %v11041_v17 = vld [vmem:[#allocation17_spill] sm:$0xff]  ;;  %v11042_v56 = vld [vmem:[#allocation44_spill] sm:$0xff] }
 0x2d7   : > { %v2834_v54 = vpop.f32.mrf.mxu1  ;;  %v2043_v48 = vadd.f32 %v11042_v56, %v11041_v17  ;;  %v11043_v8 = vld [vmem:[#allocation28_spill] sm:$0xff]  ;;  %v11049_v17 = vld [vmem:[#allocation34_spill] sm:$0xff] }
 0x2d8   : > { %11035 = vst [vmem:[#allocation29_spill] sm:$0xff] %v10209_v14  ;;  %v2961_v40 = vadd.f32 %v2834_v54, %v2590_v61  ;;  %v10213_v28 = vpop.f32.mrf.mxu0  ;;  %v10217_v38 = vadd.f32 %v11039_v19, %v2963_v44  ;;  %v2591_v12 = vadd.f32 %v11043_v8, %v2030_v59  ;;  %v11044_v51 = vld [vmem:[#allocation48_spill] sm:$0xff]  ;;  %v11045_v54 = vld [vmem:[#allocation18_spill] sm:$0xff] }
 0x2d9   : > { %v7469_v49 = vpop.f32.mrf.mxu1  ;;  %v2054_v36 = vadd.f32 %v11046_v53, %v11045_v54  ;;  %v11047_v44 = vld [vmem:[#allocation30_spill] sm:$0xff]  ;;  %v2594_v56 = vadd.f32 %v11049_v17, %v2043_v48  ;;  %v11050_v54 = vld [vmem:[#allocation36_spill] sm:$0xff] }
 0x2da   : > { %11040 = vst [vmem:[#allocation55_spill] sm:$0xff] %v10217_v38  ;;  %v2964_v22 = vadd.f32 %v7469_v49, %v2593_v39  ;;  %v10221_v31 = vpop.f32.mrf.mxu0  ;;  %v10225_v14 = vadd.f32 %v11044_v51, %v2961_v40  ;;  %v2596_v19 = vadd.f32 %v11047_v44, %v2051_v41  ;;  %v11048_v38 = vld [vmem:[#allocation42_spill] sm:$0xff] }
 0x2db   : > { %v2837_v61 = vpop.f32.mrf.mxu1 }
 0x2dc   : > { %v2962_v52 = vadd.f32 %v2837_v61, %v2591_v12  ;;  %v10229_v23 = vpop.f32.mrf.mxu0  ;;  %v10233_v42 = vadd.f32 %v11048_v38, %v2964_v22  ;;  %v2597_v12 = vadd.f32 %v11050_v54, %v2054_v36 }
 0x2dd   : > { %v7472_v39 = vpop.f32.mrf.mxu1 }
 0x2de   : > { %v2967_v49 = vadd.f32 %v7472_v39, %v2596_v19  ;;  %v10237_v59 = vadd.f32 %v10009_v27, %v2962_v52  ;;  %v10239_v40 = vpop.f32.mrf.mxu0  ;;  %v11051_v52 = vld [vmem:[#allocation19_spill] sm:$0xff] }
 0x2df   : > { %v2850_v8 = vpop.f32.mrf.mxu1 }
 0x2e0   : > { %v2965_v51 = vadd.f32 %v2850_v8, %v2594_v56  ;;  %v10243_v61 = vadd.f32 %v10019_v55, %v2967_v49  ;;  %v10245_v41 = vpop.f32.mrf.mxu0  ;;  %v11052_v55 = vld [vmem:[#allocation23_spill] sm:$0xff]  ;;  %v11054_v8 = vld [vmem:[#allocation53_spill] sm:$0xff] }
 0x2e1   : > { %v7473_v38 = vpop.f32.mrf.mxu1 }
 0x2e2   : > { %v2968_v22 = vadd.f32 %v7473_v38, %v2597_v12  ;;  %v10248_v53 = vadd.f32 %v10033_v29, %v2965_v51  ;;  %v10250_v48 = vpop.f32.mrf.mxu0  ;;  %v11055_v38 = vld [vmem:[#allocation25_spill] sm:$0xff] }
 0x2e3   : > { %v2853_v27 = vpop.f32.mrf.mxu1 }
 0x2e4   : > { %v2966_v44 = vadd.f32 %v2853_v27, %v11051_v52  ;;  %v10254_v19 = vadd.f32 %v10042_v47, %v2968_v22  ;;  %v10256_v39 = vpop.f32.mrf.mxu0 }
 0x2e5   : > { %v7476_v36 = vpop.f32.mrf.mxu1 }
 0x2e6   : > { %v2971_v49 = vadd.f32 %v7476_v36, %v11052_v55  ;;  %v10260_v17 = vadd.f32 %v10050_v62, %v2966_v44  ;;  %v10262_v56 = vpop.f32.mrf.mxu0  ;;  %v11056_v44 = vld [vmem:[#allocation47_spill] sm:$0xff] }
 0x2e7   : > { %v2866_v29 = vpop.f32.mrf.mxu1 }
 0x2e8   : > { %11053 = vst [vmem:[#allocation31_spill] sm:$0xff] %v10260_v17  ;;  %v2969_v51 = vadd.f32 %v2866_v29, %v11054_v8  ;;  %v10266_v54 = vadd.f32 %v10058_v1, %v2971_v49  ;;  %v10268_v12 = vpop.f32.mrf.mxu0  ;;  %v11057_v49 = vld [vmem:[#allocation27_spill] sm:$0xff] }
 0x2e9   : > { %v7477_v47 = vpop.f32.mrf.mxu1 }
 0x2ea   : > { %v2972_v22 = vadd.f32 %v7477_v47, %v11055_v38  ;;  %v10272_v27 = vadd.f32 %v10070_v16, %v2969_v51  ;;  %v10274_v52 = vpop.f32.mrf.mxu0 }
 0x2eb   : > { %v2869_v62 = vpop.f32.mrf.mxu1 }
 0x2ec   : > { %v2970_v36 = vadd.f32 %v2869_v62, %v11056_v44  ;;  %v10278_v55 = vadd.f32 %v10086_v37, %v2972_v22  ;;  %v10280_v29 = vpop.f32.mrf.mxu0 }
 0x2ed   : > { %v7480_v1 = vpop.f32.mrf.mxu1 }
 0x2ee   : > { %v2975_v8 = vadd.f32 %v7480_v1, %v11057_v49  ;;  %v10284_v17 = vadd.f32 %v10095_v26, %v2970_v36  ;;  %v10286_v47 = vpop.f32.mrf.mxu0 }
 0x2ef   : > { %v2882_v16 = vpop.f32.mrf.mxu1 }
 0x2f0   : > { %11058 = vst [vmem:[#allocation35_spill] sm:$0xff] %v10284_v17  ;;  %v2973_v51 = vadd.f32 %v2882_v16, %v10048_v25  ;;  %v10290_v38 = vadd.f32 %v10106_v6, %v2975_v8  ;;  %v10292_v62 = vpop.f32.mrf.mxu0  ;;  %v11060_v8 = vld [vmem:[#allocation57_spill] sm:$0xff] }
 0x2f1   : > { %v7481_v37 = vpop.f32.mrf.mxu1  ;;  %v2094_v16 = vadd.f32 %v10093_v46, %v11060_v8 }
 0x2f2   : > { %v2976_v22 = vadd.f32 %v7481_v37, %v10056_v32  ;;  %v10296_v44 = vadd.f32 %v10112_v7, %v2973_v51  ;;  %v10298_v1 = vpop.f32.mrf.mxu0 }
 0x2f3   : > { %v2885_v26 = vpop.f32.mrf.mxu1 }
 0x2f4   : > { %v2974_v36 = vadd.f32 %v2885_v26, %v10068_v45  ;;  %v10302_v49 = vadd.f32 %v10123_v57, %v2976_v22  ;;  %v10304_v25 = vpop.f32.mrf.mxu0 }
 0x2f5   : > { %11059 = vst [vmem:[#allocation40_spill] sm:$0xff] %v10304_v25  ;;  %v7484_v6 = vpop.f32.mrf.mxu1  ;;  %v11062_v25 = vld [vmem:[#allocation63_spill] sm:$0xff] }
 0x2f6   : > { %v2979_v17 = vadd.f32 %v7484_v6, %v10084_v4  ;;  %v10310_v32 = vadd.f32 %v10136_v21, %v2974_v36  ;;  %v10312_v7 = vpop.f32.mrf.mxu0  ;;  %v2607_v46 = vadd.f32 %v11062_v25, %v2094_v16 }
 0x2f7   : > { %v2898_v51 = vpop.f32.mrf.mxu1 }
 0x2f8   : > { %11061 = vst [vmem:[#allocation43_spill] sm:$0xff] %v10310_v32  ;;  %v2977_v37 = vadd.f32 %v2898_v51, %v10091_v30  ;;  %v10316_v45 = vadd.f32 %v10141_v10, %v2979_v17  ;;  %v10318_v57 = vpop.f32.mrf.mxu0  ;;  %v11064_v17 = vld [vmem:[#allocation62_spill] sm:$0xff] }
 0x2f9   : > { %v7485_v22 = vpop.f32.mrf.mxu1  ;;  %v2110_v51 = vadd.f32 %v10134_v13, %v11064_v17 }
 0x2fa   : > { %v2980_v26 = vadd.f32 %v7485_v22, %v10104_v33  ;;  %v10323_v4 = vadd.f32 %v10150_v63, %v2977_v37  ;;  %v10325_v21 = vpop.f32.mrf.mxu0 }
 0x2fb   : > { %v2901_v36 = vpop.f32.mrf.mxu1 }
 0x2fc   : > { %v2978_v6 = vadd.f32 %v2901_v36, %v2607_v46  ;;  %v10328_v8 = vadd.f32 %v10159_v5, %v2980_v26  ;;  %v10330_v30 = vpop.f32.mrf.mxu0  ;;  %v11066_v36 = vld [vmem:[#allocation38_spill] sm:$0xff] }
 0x2fd   : > { %11063 = vst [vmem:[#allocation50_spill] sm:$0xff] %v10330_v30  ;;  %v7488_v10 = vpop.f32.mrf.mxu1  ;;  %v2611_v13 = vadd.f32 %v11066_v36, %v2110_v51 }
 0x2fe   : > { %v2983_v33 = vadd.f32 %v7488_v10, %v10121_v2  ;;  %v10336_v25 = vadd.f32 %v10165_v3, %v2978_v6  ;;  %v10338_v63 = vpop.f32.mrf.mxu0 }
 0x2ff   : > { %v2914_v16 = vpop.f32.mrf.mxu1 }
 0x300   : > { %11065 = vst [vmem:[#allocation61_spill] sm:$0xff] %v10336_v25  ;;  %v2981_v37 = vadd.f32 %v2914_v16, %v10132_v24  ;;  %v10342_v22 = vadd.f32 %v10173_v60, %v2983_v33  ;;  %v10344_v5 = vpop.f32.mrf.mxu0 }
 0x301   : > { %v7489_v26 = vpop.f32.mrf.mxu1 }
 0x302   : > { %v2984_v46 = vadd.f32 %v7489_v26, %v10139_v58  ;;  %v10349_v2 = vadd.f32 %v10181_v15, %v2981_v37  ;;  %v10351_v3 = vpop.f32.mrf.mxu0 }
 0x303   : > { %v2917_v6 = vpop.f32.mrf.mxu1 }
 0x304   : > { %v2982_v10 = vadd.f32 %v2917_v6, %v2611_v13  ;;  %v10354_v17 = vadd.f32 %v10189_v0, %v2984_v46  ;;  %v10356_v24 = vpop.f32.mrf.mxu0 }
 0x305   : > { %11067 = vst [vmem:[#allocation54_spill] sm:$0xff] %v10356_v24  ;;  %v7492_v60 = vpop.f32.mrf.mxu1 }
 0x306   : > { %v2987_v33 = vadd.f32 %v7492_v60, %v10157_v9  ;;  %v10360_v16 = vadd.f32 %v10197_v43, %v2982_v10  ;;  %v10362_v58 = vpop.f32.mrf.mxu0 }
 0x307   : > { %v2930_v51 = vpop.f32.mrf.mxu1 }
 0x308   : > { %11068 = vst [vmem:[#allocation56_spill] sm:$0xff] %v10360_v16  ;;  %v2985_v15 = vadd.f32 %v2930_v51, %v10163_v50  ;;  %v10366_v37 = vadd.f32 %v10205_v18, %v2987_v33  ;;  %v10368_v26 = vpop.f32.mrf.mxu0 }
 0x309   : > { %v7493_v0 = vpop.f32.mrf.mxu1 }
 0x30a   : > { %v2988_v46 = vadd.f32 %v7493_v0, %v10169_v20  ;;  %v10372_v36 = vadd.f32 %v10213_v28, %v2985_v15  ;;  %v10374_v9 = vpop.f32.mrf.mxu0  ;;  %v11071_v15 = vld [vmem:[#allocation51_spill] sm:$0xff] }
 0x30b   : > { %v2933_v43 = vpop.f32.mrf.mxu1 }
 0x30c   : > { %v2986_v13 = vadd.f32 %v2933_v43, %v10176_v34  ;;  %v10378_v6 = vadd.f32 %v10221_v31, %v2988_v46  ;;  %v10380_v50 = vpop.f32.mrf.mxu0  ;;  %v11072_v43 = vld [vmem:[#allocation29_spill] sm:$0xff] }
 0x30d   : > { %11069 = vst [vmem:[#allocation58_spill] sm:$0xff] %v10380_v50  ;;  %v7496_v18 = vpop.f32.mrf.mxu1 }
 0x30e   : > { %v2991_v10 = vadd.f32 %v7496_v18, %v10184_v11  ;;  %v10384_v60 = vadd.f32 %v10229_v23, %v2986_v13  ;;  %v10386_v20 = vpop.f32.mrf.mxu0 }
 0x30f   : > { %v2946_v28 = vpop.f32.mrf.mxu1 }
 0x310   : > { %11070 = vst [vmem:[#allocation59_spill] sm:$0xff] %v10384_v60  ;;  %v2989_v33 = vadd.f32 %v2946_v28, %v10192_v35  ;;  %v10390_v51 = vadd.f32 %v10239_v40, %v2991_v10  ;;  %v10392_v34 = vpop.f32.mrf.mxu0  ;;  %v11074_v10 = vld [vmem:[#allocation55_spill] sm:$0xff] }
 0x311   : > { %v7497_v31 = vpop.f32.mrf.mxu1 }
 0x312   : > { %v2992_v0 = vadd.f32 %v7497_v31, %v11071_v15  ;;  %v10396_v46 = vadd.f32 %v10245_v41, %v2989_v33  ;;  %v10398_v11 = vpop.f32.mrf.mxu0 }
 0x313   : > { %v2949_v23 = vpop.f32.mrf.mxu1 }
 0x314   : > { %v2990_v13 = vadd.f32 %v2949_v23, %v11072_v43  ;;  %v10402_v18 = vadd.f32 %v10250_v48, %v2992_v0  ;;  %v10404_v35 = vpop.f32.mrf.mxu0 }
 0x315   : > { %11073 = vst [vmem:[#allocation60_spill] sm:$0xff] %v10404_v35  ;;  %v7540_v40 = vpop.f32.mrf.mxu1 }
 0x316   : > { %v4183_v28 = vadd.f32 %v7540_v40, %v11074_v10  ;;  %v10408_v60 = vadd.f32 %v10256_v39, %v2990_v13 }
 0x317   : > { %v10410_v31 = vpop.f32.mrf.mxu0  ;;  %v4054_v41 = vpop.f32.mrf.mxu1 }
 0x318   : > { %11075 = vst [vmem:[#allocation32_spill] sm:$0xff] %v10408_v60  ;;  %v4181_v33 = vadd.f32 %v4054_v41, %v10225_v14  ;;  %v10414_v15 = vadd.f32 %v10262_v56, %v4183_v28 }
 0x319   : > { %v10416_v23 = vpop.f32.mrf.mxu0  ;;  %v10418_v48 = vpop.f32.mrf.mxu1 }
 0x31a   : > { %v10421_v0 = vadd.f32 %v10268_v12, %v4181_v33 }
 0x31b   : > { %v10423_v43 = vpop.f32.mrf.mxu0  ;;  %v10425_v40 = vpop.f32.mrf.mxu1 }
 0x31d   : > { %v10427_v39 = vpop.f32.mrf.mxu0  ;;  %v7544_v13 = vpop.f32.mrf.mxu1 }
 0x31e   : > { %11076 = vst [vmem:[#allocation12_spill] sm:$0xff] %v10427_v39  ;;  %v4187_v10 = vadd.f32 %v7544_v13, %v10243_v61 }
 0x31f   : > { %v10430_v14 = vpop.f32.mrf.mxu0  ;;  %v4070_v56 = vpop.f32.mrf.mxu1 }
 0x320   : > { %v4185_v28 = vadd.f32 %v4070_v56, %v10248_v53  ;;  %v10434_v41 = vadd.f32 %v10286_v47, %v4187_v10 }
 0x321   : > { %v10436_v60 = vpop.f32.mrf.mxu0  ;;  %v10438_v12 = vpop.f32.mrf.mxu1 }
 0x322   : > { %v10441_v33 = vadd.f32 %v10292_v62, %v4185_v28 }
 0x323   : > { %v10443_v35 = vpop.f32.mrf.mxu0  ;;  %v10445_v39 = vpop.f32.mrf.mxu1 }
 0x325   : > { %v10447_v61 = vpop.f32.mrf.mxu0  ;;  %v7548_v13 = vpop.f32.mrf.mxu1 }
 0x326   : > { %11077 = vst [vmem:[#allocation33_spill] sm:$0xff] %v10447_v61  ;;  %v4191_v16 = vadd.f32 %v7548_v13, %v10266_v54 }
 0x327   : > { %v10450_v53 = vpop.f32.mrf.mxu0  ;;  %v4086_v47 = vpop.f32.mrf.mxu1 }
 0x328   : > { %v4189_v10 = vadd.f32 %v4086_v47, %v10272_v27  ;;  %v10454_v56 = vadd.f32 %v10312_v7, %v4191_v16 }
 0x329   : > { %v10456_v50 = vpop.f32.mrf.mxu0  ;;  %v7549_v62 = vpop.f32.mrf.mxu1 }
 0x32a   : > { %v4192_v28 = vadd.f32 %v7549_v62, %v10278_v55  ;;  %v10460_v25 = vadd.f32 %v10318_v57, %v4189_v10 }
 0x32b   : > { %v10462_v61 = vpop.f32.mrf.mxu0  ;;  %v10464_v24 = vpop.f32.mrf.mxu1 }
 0x32c   : > { %v10467_v54 = vadd.f32 %v10325_v21, %v4192_v28 }
 0x32d   : > { %v10469_v13 = vpop.f32.mrf.mxu0  ;;  %v7552_v27 = vpop.f32.mrf.mxu1 }
 0x32e   : > { %v4195_v7 = vadd.f32 %v7552_v27, %v10290_v38 }
 0x32f   : > { %v10472_v16 = vpop.f32.mrf.mxu0  ;;  %v4102_v47 = vpop.f32.mrf.mxu1 }
 0x330   : > { %v4193_v55 = vadd.f32 %v4102_v47, %v10296_v44  ;;  %v10476_v57 = vadd.f32 %v10338_v63, %v4195_v7 }
 0x331   : > { %v10478_v10 = vpop.f32.mrf.mxu0  ;;  %v7553_v62 = vpop.f32.mrf.mxu1 }
 0x332   : > { %v4196_v32 = vadd.f32 %v7553_v62, %v10302_v49  ;;  %v10482_v21 = vadd.f32 %v10344_v5, %v4193_v55 }
 0x333   : > { %v10484_v28 = vpop.f32.mrf.mxu0  ;;  %v10486_v30 = vpop.f32.mrf.mxu1 }
 0x334   : > { %11078 = vst [vmem:[#allocation37_spill] sm:$0xff] %v10482_v21  ;;  %v10489_v38 = vadd.f32 %v10351_v3, %v4196_v32 }
 0x335   : > { %v7556_v27 = vpop.f32.mrf.mxu1  ;;  %v10492_v63 = vpop.f32.mrf.mxu0 }
 0x336   : > { %v4199_v44 = vadd.f32 %v7556_v27, %v10316_v45 }
 0x337   : > { %v4118_v7 = vpop.f32.mrf.mxu1  ;;  %v10502_v21 = vpop.f32.mrf.mxu0 }
 0x338   : > { %v4197_v47 = vadd.f32 %v4118_v7, %v10323_v4  ;;  %v10496_v49 = vadd.f32 %v10362_v58, %v4199_v44 }
 0x339   : > { %v7557_v5 = vpop.f32.mrf.mxu1  ;;  %v10510_v4 = vpop.f32.mrf.mxu0 }
 0x33a   : > { %v4200_v55 = vadd.f32 %v7557_v5, %v10328_v8  ;;  %v10500_v62 = vadd.f32 %v10368_v26, %v4197_v47 }
 0x33b   : > { %v10504_v32 = vpop.f32.mrf.mxu1  ;;  %v10520_v5 = vpop.f32.mrf.mxu0 }
 0x33c   : > { %v10507_v45 = vadd.f32 %v10374_v9, %v4200_v55 }
 0x33d   : > { %v7560_v3 = vpop.f32.mrf.mxu1 }
 0x33e   : > { %v4203_v27 = vadd.f32 %v7560_v3, %v10342_v22 }
 0x33f   : > { %v4134_v58 = vpop.f32.mrf.mxu1 }
 0x340   : > { %v4201_v44 = vadd.f32 %v4134_v58, %v10349_v2  ;;  %v10514_v8 = vadd.f32 %v10386_v20, %v4203_v27  ;;  %v10528_v2 = vpop.f32.mrf.mxu0 }
 0x341   : > { %v7561_v26 = vpop.f32.mrf.mxu1 }
 0x342   : > { %v4204_v7 = vadd.f32 %v7561_v26, %v10354_v17  ;;  %v10518_v47 = vadd.f32 %v10392_v34, %v4201_v44  ;;  %v10538_v26 = vpop.f32.mrf.mxu0 }
 0x343   : > { %v10522_v9 = vpop.f32.mrf.mxu1 }
 0x344   : > { %v10525_v22 = vadd.f32 %v10398_v11, %v4204_v7 }
 0x345   : > { %v7564_v55 = vpop.f32.mrf.mxu1 }
 0x346   : > { %v4207_v3 = vadd.f32 %v7564_v55, %v10366_v37 }
 0x347   : > { %v4150_v20 = vpop.f32.mrf.mxu1 }
 0x348   : > { %v4205_v27 = vadd.f32 %v4150_v20, %v10372_v36  ;;  %v10532_v17 = vadd.f32 %v10410_v31, %v4207_v3  ;;  %v10546_v36 = vpop.f32.mrf.mxu0 }
 0x349   : > { %v7565_v34 = vpop.f32.mrf.mxu1 }
 0x34a   : > { %v4208_v58 = vadd.f32 %v7565_v34, %v10378_v6  ;;  %v10536_v44 = vadd.f32 %v10416_v23, %v4205_v27  ;;  %v10556_v34 = vpop.f32.mrf.mxu0 }
 0x34b   : > { %v10540_v11 = vpop.f32.mrf.mxu1 }
 0x34c   : > { %v10543_v37 = vadd.f32 %v10423_v43, %v4208_v58 }
 0x34d   : > { %v7568_v7 = vpop.f32.mrf.mxu1 }
 0x34e   : > { %v4211_v55 = vadd.f32 %v7568_v7, %v10390_v51  ;;  %v4184_v51 = vadd.f32 %v10418_v48, %v10233_v42  ;;  %v10576_v42 = vld [vmem:[%s10832_s5] ss:$0 sm:$0xff] }
 0x34f   : > { %v4166_v31 = vpop.f32.mrf.mxu1 }
 0x350   : > { %v4209_v3 = vadd.f32 %v4166_v31, %v10396_v46  ;;  %v10550_v6 = vadd.f32 %v10430_v14, %v4211_v55  ;;  %v4182_v14 = vadd.f32 %v10425_v40, %v10237_v59 }
 0x351   : > { %v7569_v23 = vpop.f32.mrf.mxu1 }
 0x352   : > { %v4212_v20 = vadd.f32 %v7569_v23, %v10402_v18  ;;  %v10554_v27 = vadd.f32 %v10436_v60, %v4209_v3  ;;  %v10568_v18 = vpop.f32.mrf.mxu0  ;;  %v4555_v3 = vadd.f32 %v10274_v52, %v4184_v51  ;;  %v4188_v52 = vadd.f32 %v10438_v12, %v10254_v19  ;;  %v11079_v51 = vld [vmem:[#allocation31_spill] sm:$0xff] }
 0x353   : > { %v10558_v43 = vpop.f32.mrf.mxu1 }
 0x354   : > { %v10563_v58 = vadd.f32 %v10443_v35, %v4212_v20  ;;  %v10580_v40 = vpop.f32.mrf.mxu0  ;;  %v4559_v12 = vadd.f32 %v10298_v1, %v4188_v52 }
 0x355   : > { %v7612_v46 = vpop.f32.mrf.mxu1 }
 0x356   : > { %v5292_v7 = vadd.f32 %v7612_v46, %v10414_v15  ;;  %v4553_v15 = vadd.f32 %v10280_v29, %v4182_v14  ;;  %v4186_v46 = vadd.f32 %v10445_v39, %v11079_v51 }
 0x357   : > { %v5163_v60 = vpop.f32.mrf.mxu1 }
 0x358   : > { %v5774_v55 = vadd.f32 %v10450_v53, %v5292_v7  ;;  %v5290_v31 = vadd.f32 %v5163_v60, %v10421_v0 }
 0x359   : > { %v7613_v35 = vpop.f32.mrf.mxu1 }
 0x35a   : > { %v5772_v48 = vadd.f32 %v10456_v50, %v5290_v31  ;;  %v5293_v59 = vadd.f32 %v7613_v35, %v4555_v3  ;;  %v5813_v53 = vadd.f32 %v10576_v42, %v5774_v55  ;;  %v10592_v31 = vpop.f32.mrf.mxu0 }
 0x35b   : > { %v5166_v23 = vpop.f32.mrf.mxu1 }
 0x35c   : > { %v5775_v0 = vadd.f32 %v10462_v61, %v5293_v59  ;;  %v5291_v20 = vadd.f32 %v5166_v23, %v4553_v15  ;;  %v5811_v50 = vadd.f32 %v10576_v42, %v5772_v48  ;;  %v5845_v61 = vmax.f32 %v5813_v53, 0.0  ;;  %v11080_v59 = vld [vmem:[#allocation40_spill] sm:$0xff] }
 0x35d   : > { %v7616_v7 = vpop.f32.mrf.mxu1  ;;  %v4557_v15 = vadd.f32 %v11080_v59, %v4186_v46 }
 0x35e   : > { %v5814_v60 = vadd.f32 %v10576_v42, %v5775_v0  ;;  %v5773_v29 = vadd.f32 %v10469_v13, %v5291_v20  ;;  %v5296_v14 = vadd.f32 %v7616_v7, %v10434_v41  ;;  %v5843_v23 = vmax.f32 %v5811_v50, 0.0  ;;  %v10600_v20 = vpop.f32.mrf.mxu0 }
 0x35f   : > { %v5179_v55 = vpop.f32.mrf.mxu1 }
 0x360   : > { %v5846_v3 = vmax.f32 %v5814_v60, 0.0  ;;  %v5812_v35 = vadd.f32 %v10576_v42, %v5773_v29  ;;  %v5294_v19 = vadd.f32 %v5179_v55, %v10441_v33  ;;  %v5778_v39 = vadd.f32 %v10472_v16, %v5296_v14  ;;  %v10610_v14 = vpop.f32.mrf.mxu0 }
 0x361   : > { %v7617_v48 = vpop.f32.mrf.mxu1 }
 0x362   : > { %v5876_v13 = vpack.c.bf16 %v5846_v3, %v5845_v61  ;;  %v5844_v0 = vmax.f32 %v5812_v35, 0.0  ;;  %v5776_v41 = vadd.f32 %v10478_v10, %v5294_v19  ;;  %v5297_v53 = vadd.f32 %v7617_v48, %v4559_v12  ;;  %v11081_v10 = vld [vmem:[#allocation35_spill] sm:$0xff]  ;;  %v10618_v48 = vpop.f32.mrf.mxu0 }
 0x363   : > { %v5182_v51 = vpop.f32.mrf.mxu1  ;;  %v5817_v33 = vadd.f32 %v10576_v42, %v5778_v39  ;;  %v4190_v50 = vadd.f32 %v10464_v24, %v11081_v10 }
 0x364   : > { %v5875_v7 = vpack.c.bf16 %v5844_v0, %v5843_v23  ;;  %v5295_v60 = vadd.f32 %v5182_v51, %v4557_v15  ;;  %v5779_v16 = vadd.f32 %v10484_v28, %v5297_v53  ;;  %v5815_v1 = vadd.f32 %v10576_v42, %v5776_v41  ;;  %v11082_v23 = vld [vmem:[#allocation50_spill] sm:$0xff] }
 0x365   : > { %v7620_v29 = vpop.f32.mrf.mxu1  ;;  %v5849_v35 = vmax.f32 %v5817_v33, 0.0 }
 0x366   : > { %v5777_v52 = vadd.f32 %v10492_v63, %v5295_v60  ;;  %v5300_v46 = vadd.f32 %v7620_v29, %v10454_v56  ;;  %7682 = vmatprep.mubr.msk.bf16.mxu1 %vm1642_vm4, %v5875_v7  ;;  %v5818_v55 = vadd.f32 %v10576_v42, %v5779_v16  ;;  %v5847_v39 = vmax.f32 %v5815_v1, 0.0  ;;  %v11083_v7 = vld [vmem:[#allocation43_spill] sm:$0xff] }
 0x367   : > { %v5195_v61 = vpop.f32.mrf.mxu1  ;;  %7683 = vmatmul.mubr.msk.bf16.vlgmr.msra.gmra.mxu1 %vm1642_vm4, %v5876_v13  ;;  %v4561_v13 = vadd.f32 %v11082_v23, %v4190_v50  ;;  %v4194_v60 = vadd.f32 %v10486_v30, %v11083_v7  ;;  %v11084_v30 = vld [vmem:[#allocation37_spill] sm:$0xff] }
 0x368   : > { %v5816_v28 = vadd.f32 %v10576_v42, %v5777_v52  ;;  %v5782_v3 = vadd.f32 %v10502_v21, %v5300_v46  ;;  %v5298_v63 = vadd.f32 %v5195_v61, %v10460_v25  ;;  %v5850_v56 = vmax.f32 %v5818_v55, 0.0 }
 0x369   : > { %v7621_v19 = vpop.f32.mrf.mxu1 }
 0x36a   : > { %v5848_v12 = vmax.f32 %v5816_v28, 0.0  ;;  %v5301_v24 = vadd.f32 %v7621_v19, %v10467_v54  ;;  %v5878_v59 = vpack.c.bf16 %v5850_v56, %v5849_v35  ;;  %v5780_v15 = vadd.f32 %v10510_v4, %v5298_v63  ;;  %v10629_v4 = vpop.f32.mrf.mxu0 }
 0x36b   : > { %v5198_v0 = vpop.f32.mrf.mxu1  ;;  %v5821_v21 = vadd.f32 %v10576_v42, %v5782_v3  ;;  %v11085_v3 = vld [vmem:[#allocation54_spill] sm:$0xff] }
 0x36c   : > { %v5877_v41 = vpack.c.bf16 %v5848_v12, %v5847_v39  ;;  %v5783_v25 = vadd.f32 %v10520_v5, %v5301_v24  ;;  %v5299_v53 = vadd.f32 %v5198_v0, %v4561_v13  ;;  %v5819_v16 = vadd.f32 %v10576_v42, %v5780_v15  ;;  %v11086_v24 = vld [vmem:[#allocation61_spill] sm:$0xff] }
 0x36d   : > { %v7624_v51 = vpop.f32.mrf.mxu1  ;;  %v5853_v5 = vmax.f32 %v5821_v21, 0.0  ;;  %v4565_v63 = vadd.f32 %v11085_v3, %v4194_v60  ;;  %v11087_v60 = vld [vmem:[#allocation58_spill] sm:$0xff] }
 0x36e   : > { %v5822_v54 = vadd.f32 %v10576_v42, %v5783_v25  ;;  %v5304_v33 = vadd.f32 %v7624_v51, %v10476_v57  ;;  %7686 = vmatprep.mubr.msk.bf16.mxu1 %vm1642_vm4, %v5877_v41  ;;  %v5781_v29 = vadd.f32 %v10528_v2, %v5299_v53  ;;  %v7669_v2 = vpop.f32.mrf.mxu0  ;;  %v5851_v35 = vmax.f32 %v5819_v16, 0.0 }
 0x36f   : > { %v5211_v1 = vpop.f32.mrf.mxu1  ;;  %7687 = vmatmul.mubr.msk.bf16.gmra.mxu1 %vm1642_vm4, %v5878_v59  ;;  %v4198_v59 = vadd.f32 %v10504_v32, %v11086_v24  ;;  %v11089_v24 = vld [vmem:[#allocation60_spill] sm:$0xff] }
 0x370   : > { %v5854_v52 = vmax.f32 %v5822_v54, 0.0  ;;  %v5786_v46 = vadd.f32 %v10538_v26, %v5304_v33  ;;  %v5302_v10 = vadd.f32 %v5211_v1, %v11084_v30  ;;  %v5820_v50 = vadd.f32 %v10576_v42, %v5781_v29  ;;  %v5728_v41 = vpop.f32.mrf.mxu0 }
 0x371   : > { %v7625_v57 = vpop.f32.mrf.mxu1  ;;  %v4569_v54 = vadd.f32 %v11087_v60, %v4198_v59 }
 0x372   : > { %v5880_v55 = vpack.c.bf16 %v5854_v52, %v5853_v5  ;;  %v5784_v61 = vadd.f32 %v10546_v36, %v5302_v10  ;;  %v5305_v28 = vadd.f32 %v7625_v57, %v10489_v38  ;;  %v5852_v56 = vmax.f32 %v5820_v50, 0.0  ;;  %v7672_v29 = vpop.f32.mrf.mxu0 }
 0x373   : > { %v5214_v19 = vpop.f32.mrf.mxu1  ;;  %v5825_v39 = vadd.f32 %v10576_v42, %v5786_v46 }
 0x374   : > { %v5787_v26 = vadd.f32 %v10556_v34, %v5305_v28  ;;  %v5303_v12 = vadd.f32 %v5214_v19, %v4565_v63  ;;  %v5879_v15 = vpack.c.bf16 %v5852_v56, %v5851_v35  ;;  %v5823_v36 = vadd.f32 %v10576_v42, %v5784_v61 }
 0x375   : > { %v7628_v23 = vpop.f32.mrf.mxu1  ;;  %v5857_v25 = vmax.f32 %v5825_v39, 0.0 }
 0x376   : > { %v5826_v38 = vadd.f32 %v10576_v42, %v5787_v26  ;;  %v5785_v13 = vadd.f32 %v10568_v18, %v5303_v12  ;;  %v5308_v0 = vadd.f32 %v7628_v23, %v10496_v49  ;;  %7690 = vmatprep.mubr.msk.bf16.mxu1 %vm1642_vm4, %v5879_v15  ;;  %v5855_v18 = vmax.f32 %v5823_v36, 0.0 }
 0x377   : > { %v5227_v21 = vpop.f32.mrf.mxu1  ;;  %7691 = vmatmul.mubr.msk.bf16.gmra.mxu1 %vm1642_vm4, %v5880_v55 }
 0x378   : > { %v5858_v34 = vmax.f32 %v5826_v38, 0.0  ;;  %v5824_v53 = vadd.f32 %v10576_v42, %v5785_v13  ;;  %v5306_v32 = vadd.f32 %v5227_v21, %v10500_v62  ;;  %v5790_v51 = vadd.f32 %v10580_v40, %v5308_v0  ;;  %v11090_v13 = vld [vmem:[#allocation59_spill] sm:$0xff] }
 0x379   : > { %v7629_v7 = vpop.f32.mrf.mxu1  ;;  %v4206_v0 = vadd.f32 %v10540_v11, %v11090_v13 }
 0x37a   : > { %v5882_v33 = vpack.c.bf16 %v5858_v34, %v5857_v25  ;;  %v5856_v49 = vmax.f32 %v5824_v53, 0.0  ;;  %v5788_v16 = vadd.f32 %v10592_v31, %v5306_v32  ;;  %v5309_v1 = vadd.f32 %v7629_v7, %v10507_v45  ;;  %v11088_v31 = vld [vmem:[#allocation56_spill] sm:$0xff]  ;;  %v5741_v45 = vpop.f32.mrf.mxu0 }
 0x37b   : > { %v5230_v5 = vpop.f32.mrf.mxu1  ;;  %v5829_v62 = vadd.f32 %v10576_v42, %v5790_v51  ;;  %v4202_v55 = vadd.f32 %v10522_v9, %v11088_v31 }
 0x37c   : > { %v5881_v52 = vpack.c.bf16 %v5856_v49, %v5855_v18  ;;  %v5307_v46 = vadd.f32 %v5230_v5, %v4569_v54  ;;  %v5791_v30 = vadd.f32 %v10600_v20, %v5309_v1  ;;  %v5827_v40 = vadd.f32 %v10576_v42, %v5788_v16  ;;  %v7673_v9 = vpop.f32.mrf.mxu0  ;;  %v11091_v49 = vld [vmem:[#allocation12_spill] sm:$0xff] }
 0x37d   : > { %v7632_v10 = vpop.f32.mrf.mxu1  ;;  %v4573_v59 = vadd.f32 %v11089_v24, %v4202_v55  ;;  %v4577_v16 = vadd.f32 %v11091_v49, %v4206_v0 }
 0x37e   : > { %v5789_v50 = vadd.f32 %v10610_v14, %v5307_v46  ;;  %v5312_v57 = vadd.f32 %v7632_v10, %v10514_v8  ;;  %7694 = vmatprep.mubr.msk.bf16.mxu1 %vm1642_vm4, %v5881_v52  ;;  %v5830_v61 = vadd.f32 %v10576_v42, %v5791_v30  ;;  %v5861_v14 = vmax.f32 %v5829_v62, 0.0  ;;  %v5744_v25 = vpop.f32.mrf.mxu0 }
 0x37f   : > { %v5243_v28 = vpop.f32.mrf.mxu1  ;;  %7695 = vmatmul.mubr.msk.bf16.gmra.mxu1 %vm1642_vm4, %v5882_v33  ;;  %v5859_v56 = vmax.f32 %v5827_v40, 0.0 }
 0x380   : > { %v5828_v3 = vadd.f32 %v10576_v42, %v5789_v50  ;;  %v5794_v20 = vadd.f32 %v10618_v48, %v5312_v57  ;;  %v5310_v63 = vadd.f32 %v5243_v28, %v10518_v47  ;;  %v5862_v35 = vmax.f32 %v5830_v61, 0.0  ;;  %v7676_v54 = vpop.f32.mrf.mxu0 }
 0x381   : > { %v7633_v8 = vpop.f32.mrf.mxu1 }
 0x382   : > { %v5860_v19 = vmax.f32 %v5828_v3, 0.0  ;;  %v5313_v39 = vadd.f32 %v7633_v8, %v10525_v22  ;;  %v5884_v26 = vpack.c.bf16 %v5862_v35, %v5861_v14  ;;  %v5792_v12 = vadd.f32 %v10629_v4, %v5310_v63  ;;  %v5757_v10 = vpop.f32.mrf.mxu0  ;;  %v11093_v14 = vld [vmem:[#allocation33_spill] sm:$0xff] }
 0x383   : > { %v5246_v15 = vpop.f32.mrf.mxu1  ;;  %v5833_v48 = vadd.f32 %v10576_v42, %v5794_v20 }
 0x384   : > { %v5883_v23 = vpack.c.bf16 %v5860_v19, %v5859_v56  ;;  %v5795_v47 = vadd.f32 %v7669_v2, %v5313_v39  ;;  %v5311_v36 = vadd.f32 %v5246_v15, %v4573_v59  ;;  %v5831_v4 = vadd.f32 %v10576_v42, %v5792_v12  ;;  %v7677_v20 = vpop.f32.mrf.mxu0 }
 0x385   : > { %v7636_v38 = vpop.f32.mrf.mxu1  ;;  %v5865_v32 = vmax.f32 %v5833_v48, 0.0 }
 0x386   : > { %v5834_v21 = vadd.f32 %v10576_v42, %v5795_v47  ;;  %v5316_v22 = vadd.f32 %v7636_v38, %v10532_v17  ;;  %7698 = vmatprep.mubr.msk.bf16.mxu1 %vm1642_vm4, %v5883_v23  ;;  %v5793_v34 = vadd.f32 %v5728_v41, %v5311_v36  ;;  %v5863_v1 = vmax.f32 %v5831_v4, 0.0  ;;  %v5760_v59 = vpop.f32.mrf.mxu0  ;;  %v7899_v4 = vld [vmem:[%s8215_s15 + $0x8] sm:$0xff]  }
 0x387   : > { %v5259_v53 = vpop.f32.mrf.mxu1  ;;  %7699 = vmatmul.mubr.msk.bf16.gmra.mxu1 %vm1642_vm4, %v5884_v26 }
 0x388   : > { %v5866_v51 = vmax.f32 %v5834_v21, 0.0  ;;  %v5798_v7 = vadd.f32 %v7672_v29, %v5316_v22  ;;  %v5314_v2 = vadd.f32 %v5259_v53, %v10536_v44  ;;  %v5832_v11 = vadd.f32 %v10576_v42, %v5793_v34  ;;  %v11092_v44 = vld [vmem:[#allocation32_spill] sm:$0xff]  ;;  %v10707_v22 = vld [vmem:[%s10833_s6] ss:$0 sm:$0xff] }
 0x389   : > { %v7637_v60 = vpop.f32.mrf.mxu1  ;;  %v4210_v62 = vadd.f32 %v10558_v43, %v11092_v44  ;;  %v6125_v34 = vunpack.c.l.bf16 %v7899_v4 }
 0x38a   : > { %v5886_v18 = vpack.c.bf16 %v5866_v51, %v5865_v32  ;;  %v5796_v17 = vadd.f32 %v5741_v45, %v5314_v2  ;;  %v5317_v33 = vadd.f32 %v7637_v60, %v10543_v37  ;;  %v5864_v41 = vmax.f32 %v5832_v11, 0.0  ;;  %v7900_v32 = vld [vmem:[%s8215_s15] sm:$0xff]  }
 0x38b   : > { %v5262_v5 = vpop.f32.mrf.mxu1  ;;  %v5837_v52 = vadd.f32 %v10576_v42, %v5798_v7  ;;  %v4581_v35 = vadd.f32 %v11093_v14, %v4210_v62  ;;  %v6123_v51 = vunpack.c.l.bf16 %v7900_v32  ;;  %v6126_v2 = vunpack.c.h.bf16 %v7899_v4 }
 0x38c   : > { %v5799_v29 = vadd.f32 %v7673_v9, %v5317_v33  ;;  %v5315_v46 = vadd.f32 %v5262_v5, %v4577_v16  ;;  %v5885_v30 = vpack.c.bf16 %v5864_v41, %v5863_v1  ;;  %v5835_v50 = vadd.f32 %v10576_v42, %v5796_v17  ;;  %v7901_v41 = vld [vmem:[%s8215_s15 + $0x18] sm:$0xff]  }
 0x38d   : > { %v7640_v40 = vpop.f32.mrf.mxu1  ;;  %v5869_v45 = vmax.f32 %v5837_v52, 0.0  ;;  %v6124_v60 = vunpack.c.h.bf16 %v7900_v32  ;;  %v6129_v5 = vunpack.c.l.bf16 %v7901_v41 }
 0x38e   : > { %v5838_v57 = vadd.f32 %v10576_v42, %v5799_v29  ;;  %v5797_v37 = vadd.f32 %v5744_v25, %v5315_v46  ;;  %v5320_v31 = vadd.f32 %v7640_v40, %v10550_v6  ;;  %7702 = vmatprep.mubr.msk.bf16.mxu1 %vm1642_vm4, %v5885_v30  ;;  %v5867_v8 = vmax.f32 %v5835_v50, 0.0  ;;  %v7902_v30 = vld [vmem:[%s8215_s15 + $0x10] sm:$0xff]  }
 0x38f   : > { %v5275_v55 = vpop.f32.mrf.mxu1  ;;  %7703 = vmatmul.mubr.msk.bf16.gmra.mxu1 %vm1642_vm4, %v5886_v18  ;;  %v6130_v40 = vunpack.c.h.bf16 %v7901_v41 }
 0x390   : > { %v5870_v61 = vmax.f32 %v5838_v57, 0.0  ;;  %v5836_v28 = vadd.f32 %v10576_v42, %v5797_v37  ;;  %v5318_v3 = vadd.f32 %v5275_v55, %v10554_v27  ;;  %v5802_v43 = vadd.f32 %v7676_v54, %v5320_v31 }
 0x391   : > { %v7641_v63 = vpop.f32.mrf.mxu1 }
 0x392   : > { %v5888_v56 = vpack.c.bf16 %v5870_v61, %v5869_v45  ;;  %v5868_v19 = vmax.f32 %v5836_v28, 0.0  ;;  %v5800_v6 = vadd.f32 %v5757_v10, %v5318_v3  ;;  %v5321_v39 = vadd.f32 %v7641_v63, %v10563_v58 }
 0x393   : > { %v5278_v9 = vpop.f32.mrf.mxu1  ;;  %v5841_v24 = vadd.f32 %v10576_v42, %v5802_v43  ;;  %v6127_v10 = vunpack.c.l.bf16 %v7902_v30  ;;  %v6128_v3 = vunpack.c.h.bf16 %v7902_v30 }
 0x394   : > { %v5887_v26 = vpack.c.bf16 %v5868_v19, %v5867_v8  ;;  %v5319_v12 = vadd.f32 %v5278_v9, %v4581_v35  ;;  %v5803_v27 = vadd.f32 %v7677_v20, %v5321_v39  ;;  %v5839_v15 = vadd.f32 %v10576_v42, %v5800_v6  ;;  %v7903_v39 = vld [vmem:[%s8215_s15 + $0x28] sm:$0xff]  }
 0x395   : > { %v5873_v58 = vmax.f32 %v5841_v24, 0.0  ;;  %v6133_v9 = vunpack.c.l.bf16 %v7903_v39 }
 0x396   : > { %v5801_v23 = vadd.f32 %v5760_v59, %v5319_v12  ;;  %7706 = vmatprep.mubr.msk.bf16.mxu1 %vm1642_vm4, %v5887_v26  ;;  %v5842_v48 = vadd.f32 %v10576_v42, %v5803_v27  ;;  %v5871_v38 = vmax.f32 %v5839_v15, 0.0  ;;  %v7904_v15 = vld [vmem:[%s8215_s15 + $0x20] sm:$0xff]  }
 0x397   : > { %7707 = vmatmul.mubr.msk.bf16.gmra.mxu1 %vm1642_vm4, %v5888_v56 }
 0x398   : > { %v5840_v47 = vadd.f32 %v10576_v42, %v5801_v23  ;;  %v5874_v36 = vmax.f32 %v5842_v48, 0.0  ;;  %v6131_v23 = vunpack.c.l.bf16 %v7904_v15  ;;  %v6134_v48 = vunpack.c.h.bf16 %v7903_v39 }
 0x39a   : > { %v5872_v13 = vmax.f32 %v5840_v47, 0.0  ;;  %v5890_v0 = vpack.c.bf16 %v5874_v36, %v5873_v58 }
 0x39c   : > { %v5889_v21 = vpack.c.bf16 %v5872_v13, %v5871_v38  ;;  %v6132_v13 = vunpack.c.h.bf16 %v7904_v15 }
 0x39e   : > { %7710 = vmatprep.mubr.msk.bf16.mxu1 %vm1642_vm4, %v5889_v21 }
 0x39f   : > { %7711 = vmatmul.mubr.msk.bf16.gmra.mxu1 %vm1642_vm4, %v5890_v0 }
 0x427   : > { %v7684_v25 = vpop.f32.mrf.mxu1 }
 0x428   : > { %v6005_v42 = vadd.f32 %v7684_v25, %v10707_v22 }
 0x429   : > { %v5996_v53 = vpop.f32.mrf.mxu1 }
 0x42a   : > { %v5997_v7 = vadd.f32 %v10707_v22, %v5996_v53  ;;  %v6157_v54 = vadd.f32 %v6125_v34, %v6005_v42  ;;  %v7905_v34 = vld [vmem:[%s8215_s15 + $0x38] sm:$0xff]  }
 0x42b   : > { %v7685_v11 = vpop.f32.mrf.mxu1  ;;  %v6137_v53 = vunpack.c.l.bf16 %v7905_v34 }
 0x42c   : > { %v6008_v18 = vadd.f32 %v7685_v11, %v10707_v22  ;;  %v6155_v33 = vadd.f32 %v6123_v51, %v5997_v7  ;;  %v6189_v52 = vmax.f32 %v6157_v54, 0.0 }
 0x42d   : > { %v5999_v17 = vpop.f32.mrf.mxu1 }
 0x42e   : > { %v6158_v49 = vadd.f32 %v6126_v2, %v6008_v18  ;;  %v6000_v16 = vadd.f32 %v10707_v22, %v5999_v17  ;;  %v6187_v50 = vmax.f32 %v6155_v33, 0.0  ;;  %v6138_v18 = vunpack.c.h.bf16 %v7905_v34 }
 0x42f   : > { %v7688_v1 = vpop.f32.mrf.mxu1 }
 0x430   : > { %v6190_v29 = vmax.f32 %v6158_v49, 0.0  ;;  %v6156_v46 = vadd.f32 %v6124_v60, %v6000_v16  ;;  %v6021_v44 = vadd.f32 %v7688_v1, %v10707_v22  ;;  %v7906_v60 = vld [vmem:[%s8215_s15 + $0x30] sm:$0xff]  }
 0x431   : > { %v6012_v62 = vpop.f32.mrf.mxu1  ;;  %v6135_v54 = vunpack.c.l.bf16 %v7906_v60 }
 0x432   : > { %v7015_v57 = vpack.c.bf16 %v6190_v29, %v6189_v52  ;;  %v6188_v37 = vmax.f32 %v6156_v46, 0.0  ;;  %v6013_v31 = vadd.f32 %v10707_v22, %v6012_v62  ;;  %v6161_v61 = vadd.f32 %v6129_v5, %v6021_v44 }
 0x433   : > { %v7689_v55 = vpop.f32.mrf.mxu1  ;;  %v6136_v29 = vunpack.c.h.bf16 %v7906_v60 }
 0x434   : > { %7087 = vst [vmem:[%s10721_s14 + $0x8] sm:$0xff] %v7015_v57   ;;  %v7010_v45 = vpack.c.bf16 %v6188_v37, %v6187_v50  ;;  %v6024_v28 = vadd.f32 %v7689_v55, %v10707_v22  ;;  %v6159_v20 = vadd.f32 %v6127_v10, %v6013_v31  ;;  %v6193_v35 = vmax.f32 %v6161_v61, 0.0  ;;  %v7908_v61 = vld [vmem:[%s8215_s15 + $0x40] sm:$0xff]  }
 0x435   : > { %v6015_v43 = vpop.f32.mrf.mxu1 }
 0x436   : > { %7011 = vst [vmem:[%s10721_s14] sm:$0xff] %v7010_v45   ;;  %v6162_v63 = vadd.f32 %v6130_v40, %v6024_v28  ;;  %v6016_v14 = vadd.f32 %v10707_v22, %v6015_v43  ;;  %v6191_v26 = vmax.f32 %v6159_v20, 0.0  ;;  %v7907_v40 = vld [vmem:[%s8215_s15 + $0x48] sm:$0xff]   ;;  %v6139_v28 = vunpack.c.l.bf16 %v7908_v61 }
 0x437   : > { %v7692_v19 = vpop.f32.mrf.mxu1  ;;  %v6141_v50 = vunpack.c.l.bf16 %v7907_v40 }
 0x438   : > { %v6194_v8 = vmax.f32 %v6162_v63, 0.0  ;;  %v6160_v56 = vadd.f32 %v6128_v3, %v6016_v14  ;;  %v6037_v6 = vadd.f32 %v7692_v19, %v10707_v22  ;;  %v6142_v3 = vunpack.c.h.bf16 %v7907_v40 }
 0x439   : > { %v6028_v59 = vpop.f32.mrf.mxu1 }
 0x43a   : > { %v7025_v12 = vpack.c.bf16 %v6194_v8, %v6193_v35  ;;  %v6192_v24 = vmax.f32 %v6160_v56, 0.0  ;;  %v6029_v27 = vadd.f32 %v10707_v22, %v6028_v59  ;;  %v6165_v36 = vadd.f32 %v6133_v9, %v6037_v6  ;;  %v7909_v59 = vld [vmem:[%s8215_s15 + $0x58] sm:$0xff]  }
 0x43b   : > { %v7693_v58 = vpop.f32.mrf.mxu1  ;;  %v6140_v6 = vunpack.c.h.bf16 %v7908_v61 }
 0x43c   : > { %7089 = vst [vmem:[%s10721_s14 + $0x18] sm:$0xff] %v7025_v12   ;;  %v7020_v47 = vpack.c.bf16 %v6192_v24, %v6191_v26  ;;  %v6040_v38 = vadd.f32 %v7693_v58, %v10707_v22  ;;  %v6163_v21 = vadd.f32 %v6131_v23, %v6029_v27  ;;  %v6197_v32 = vmax.f32 %v6165_v36, 0.0  ;;  %v7910_v36 = vld [vmem:[%s8215_s15 + $0x50] sm:$0xff]  }
 0x43d   : > { %v6031_v0 = vpop.f32.mrf.mxu1  ;;  %v6145_v27 = vunpack.c.l.bf16 %v7909_v59 }
 0x43e   : > { %7088 = vst [vmem:[%s10721_s14 + $0x10] sm:$0xff] %v7020_v47   ;;  %v6166_v25 = vadd.f32 %v6134_v48, %v6040_v38  ;;  %v6032_v42 = vadd.f32 %v10707_v22, %v6031_v0  ;;  %v6195_v17 = vmax.f32 %v6163_v21, 0.0  ;;  %v6143_v38 = vunpack.c.l.bf16 %v7910_v36 }
 0x43f   : > { %v7696_v4 = vpop.f32.mrf.mxu1 }
 0x440   : > { %v6198_v51 = vmax.f32 %v6166_v25, 0.0  ;;  %v6164_v7 = vadd.f32 %v6132_v13, %v6032_v42  ;;  %v6053_v2 = vadd.f32 %v7696_v4, %v10707_v22  ;;  %v6146_v13 = vunpack.c.h.bf16 %v7909_v59 }
 0x441   : > { %v6044_v11 = vpop.f32.mrf.mxu1 }
 0x442   : > { %v7035_v33 = vpack.c.bf16 %v6198_v51, %v6197_v32  ;;  %v6196_v49 = vmax.f32 %v6164_v7, 0.0  ;;  %v6045_v16 = vadd.f32 %v10707_v22, %v6044_v11  ;;  %v6169_v5 = vadd.f32 %v6137_v53, %v6053_v2 }
 0x443   : > { %v7697_v1 = vpop.f32.mrf.mxu1  ;;  %v6144_v51 = vunpack.c.h.bf16 %v7910_v36 }
 0x444   : > { %7091 = vst [vmem:[%s10721_s14 + $0x28] sm:$0xff] %v7035_v33   ;;  %v7030_v41 = vpack.c.bf16 %v6196_v49, %v6195_v17  ;;  %v6056_v52 = vadd.f32 %v7697_v1, %v10707_v22  ;;  %v6167_v44 = vadd.f32 %v6135_v54, %v6045_v16  ;;  %v6201_v57 = vmax.f32 %v6169_v5, 0.0  ;;  %v7912_v5 = vld [vmem:[%s8215_s15 + $0x60] sm:$0xff]  }
 0x445   : > { %v6047_v46 = vpop.f32.mrf.mxu1 }
 0x446   : > { %7090 = vst [vmem:[%s10721_s14 + $0x20] sm:$0xff] %v7030_v41   ;;  %v6170_v62 = vadd.f32 %v6138_v18, %v6056_v52  ;;  %v6048_v30 = vadd.f32 %v10707_v22, %v6047_v46  ;;  %v6199_v43 = vmax.f32 %v6167_v44, 0.0  ;;  %v7911_v18 = vld [vmem:[%s8215_s15 + $0x68] sm:$0xff]   ;;  %v6147_v52 = vunpack.c.l.bf16 %v7912_v5 }
 0x447   : > { %v7700_v10 = vpop.f32.mrf.mxu1  ;;  %v6149_v17 = vunpack.c.l.bf16 %v7911_v18 }
 0x448   : > { %v6202_v37 = vmax.f32 %v6170_v62, 0.0  ;;  %v6168_v31 = vadd.f32 %v6136_v29, %v6048_v30  ;;  %v6069_v55 = vadd.f32 %v7700_v10, %v10707_v22  ;;  %v6150_v29 = vunpack.c.h.bf16 %v7911_v18 }
 0x449   : > { %v6060_v45 = vpop.f32.mrf.mxu1 }
 0x44a   : > { %v7045_v20 = vpack.c.bf16 %v6202_v37, %v6201_v57  ;;  %v6200_v63 = vmax.f32 %v6168_v31, 0.0  ;;  %v6061_v14 = vadd.f32 %v10707_v22, %v6060_v45  ;;  %v6173_v56 = vadd.f32 %v6141_v50, %v6069_v55 }
 0x44b   : > { %v7701_v35 = vpop.f32.mrf.mxu1  ;;  %v6148_v37 = vunpack.c.h.bf16 %v7912_v5 }
 0x44c   : > { %7093 = vst [vmem:[%s10721_s14 + $0x38] sm:$0xff] %v7045_v20   ;;  %v7040_v8 = vpack.c.bf16 %v6200_v63, %v6199_v43  ;;  %v6072_v19 = vadd.f32 %v7701_v35, %v10707_v22  ;;  %v6171_v9 = vadd.f32 %v6139_v28, %v6061_v14  ;;  %v6205_v15 = vmax.f32 %v6173_v56, 0.0  ;;  %v7914_v56 = vld [vmem:[%s8215_s15 + $0x70] sm:$0xff]  }
 0x44d   : > { %v6063_v39 = vpop.f32.mrf.mxu1 }
 0x44e   : > { %7092 = vst [vmem:[%s10721_s14 + $0x30] sm:$0xff] %v7040_v8   ;;  %v6174_v26 = vadd.f32 %v6142_v3, %v6072_v19  ;;  %v6064_v12 = vadd.f32 %v10707_v22, %v6063_v39  ;;  %v6203_v0 = vmax.f32 %v6171_v9, 0.0  ;;  %v7913_v3 = vld [vmem:[%s8215_s15 + $0x78] sm:$0xff]   ;;  %v6151_v19 = vunpack.c.l.bf16 %v7914_v56  ;;  %s6393_s15 = sshll.u32 %s10721_s14, 4  ;;  %s10782_s15 = int_to_ptr.vmem [resolvable:$true] %s6393_s15 }
 0x44f   : > { %v7704_v24 = vpop.f32.mrf.mxu1  ;;  %v6153_v43 = vunpack.c.l.bf16 %v7913_v3  ;;  %s7969_s23 = scalar_lea.vmem %s10782_s15, 2048  ;;  %p7976_p10 = scmp.lt.s32.totalorder %s10782_s15, %s7974_s29 }
 0x450   : > { %v6206_v23 = vmax.f32 %v6174_v26, 0.0  ;;  %v6172_v48 = vadd.f32 %v6140_v6, %v6064_v12  ;;  %v6085_v47 = vadd.f32 %v7704_v24, %v10707_v22  ;;  %v6154_v6 = vunpack.c.h.bf16 %v7913_v3  ;;  %p7970_p3 = scmp.ne.s32.totalorder %s10782_s15, %s7969_s23  ;;  %p7977_p12 = scmp.lt.s32.totalorder %s7975_s17, %s7969_s23 }
 0x451   : > { %v6076_v58 = vpop.f32.mrf.mxu1 }
 0x452   : > { %v7055_v21 = vpack.c.bf16 %v6206_v23, %v6205_v15  ;;  %v6204_v25 = vmax.f32 %v6172_v48, 0.0  ;;  %v6077_v42 = vadd.f32 %v10707_v22, %v6076_v58  ;;  %v6177_v53 = vadd.f32 %v6145_v27, %v6085_v47  ;;  %p7971_p7 = pnand %p7970_p3, %p11094_p11  ;;  %p7978_p13 = por %p7977_p12, %p7976_p10 }
 0x453   : > { %v7705_v4 = vpop.f32.mrf.mxu1  ;;  %v6152_v23 = vunpack.c.h.bf16 %v7914_v56 }
 0x454   : > { %7095 = vst [vmem:[%s10721_s14 + $0x48] sm:$0xff] %v7055_v21   ;;  %v7050_v34 = vpack.c.bf16 %v6204_v25, %v6203_v0  ;;  %v6088_v32 = vadd.f32 %v7705_v4, %v10707_v22  ;;  %v6175_v2 = vadd.f32 %v6143_v38, %v6077_v42  ;;  %v6209_v33 = vmax.f32 %v6177_v53, 0.0  ;;  %p7972_p9 = pneg %p7971_p7 }
 0x455   : > { %v6079_v7 = vpop.f32.mrf.mxu1 }
 0x456   : > { %7094 = vst [vmem:[%s10721_s14 + $0x40] sm:$0xff] %v7050_v34   ;;  %v6178_v11 = vadd.f32 %v6146_v13, %v6088_v32  ;;  %v6080_v60 = vadd.f32 %v10707_v22, %v6079_v7  ;;  %v6207_v46 = vmax.f32 %v6175_v2, 0.0  ;;  %p7979_p0 = pnand %p7978_p13, %p7972_p9 }
 0x457   : > { %v7708_v54 = vpop.f32.mrf.mxu1 }
 0x458   : > { %v6210_v49 = vmax.f32 %v6178_v11, 0.0  ;;  %v6176_v16 = vadd.f32 %v6144_v51, %v6080_v60  ;;  %v6101_v1 = vadd.f32 %v7708_v54, %v10707_v22 }
 0x459   : > { %v6092_v41 = vpop.f32.mrf.mxu1 }
 0x45a   : > { %v7065_v44 = vpack.c.bf16 %v6210_v49, %v6209_v33  ;;  %v6208_v62 = vmax.f32 %v6176_v16, 0.0  ;;  %v6093_v30 = vadd.f32 %v10707_v22, %v6092_v41  ;;  %v6181_v50 = vadd.f32 %v6149_v17, %v6101_v1 }
 0x45b   : > { %v7709_v10 = vpop.f32.mrf.mxu1 }
 0x45c   : > { %7097 = vst [vmem:[%s10721_s14 + $0x58] sm:$0xff] %v7065_v44   ;;  %v7060_v40 = vpack.c.bf16 %v6208_v62, %v6207_v46  ;;  %v6104_v57 = vadd.f32 %v7709_v10, %v10707_v22  ;;  %v6179_v55 = vadd.f32 %v6147_v52, %v6093_v30  ;;  %v6213_v20 = vmax.f32 %v6181_v50, 0.0 }
 0x45d   : > { %v6095_v31 = vpop.f32.mrf.mxu1 }
 0x45e   : > { %7096 = vst [vmem:[%s10721_s14 + $0x50] sm:$0xff] %v7060_v40   ;;  %v6182_v45 = vadd.f32 %v6150_v29, %v6104_v57  ;;  %v6096_v61 = vadd.f32 %v10707_v22, %v6095_v31  ;;  %v6211_v39 = vmax.f32 %v6179_v55, 0.0 }
 0x45f   : > { %v7712_v28 = vpop.f32.mrf.mxu1 }
 0x460   : > { %v6214_v63 = vmax.f32 %v6182_v45, 0.0  ;;  %v6180_v14 = vadd.f32 %v6148_v37, %v6096_v61  ;;  %v6117_v35 = vadd.f32 %v7712_v28, %v10707_v22 }
 0x461   : > { %v6108_v8 = vpop.f32.mrf.mxu1 }
 0x462   : > { %v7075_v9 = vpack.c.bf16 %v6214_v63, %v6213_v20  ;;  %v6212_v26 = vmax.f32 %v6180_v14, 0.0  ;;  %v6109_v12 = vadd.f32 %v10707_v22, %v6108_v8  ;;  %v6185_v27 = vadd.f32 %v6153_v43, %v6117_v35 }
 0x463   : > { %v7713_v24 = vpop.f32.mrf.mxu1 }
 0x464   : > { %7099 = vst [vmem:[%s10721_s14 + $0x68] sm:$0xff] %v7075_v9   ;;  %v7070_v59 = vpack.c.bf16 %v6212_v26, %v6211_v39  ;;  %v6120_v15 = vadd.f32 %v7713_v24, %v10707_v22  ;;  %v6183_v47 = vadd.f32 %v6151_v19, %v6109_v12  ;;  %v6217_v38 = vmax.f32 %v6185_v27, 0.0 }
 0x465   : > { %v6111_v48 = vpop.f32.mrf.mxu1 }
 0x466   : > { %7098 = vst [vmem:[%s10721_s14 + $0x60] sm:$0xff] %v7070_v59   ;;  %v6186_v58 = vadd.f32 %v6154_v6, %v6120_v15  ;;  %v6112_v36 = vadd.f32 %v10707_v22, %v6111_v48  ;;  %v6215_v21 = vmax.f32 %v6183_v47, 0.0 }
 0x468   : > { %v6218_v13 = vmax.f32 %v6186_v58, 0.0  ;;  %v6184_v0 = vadd.f32 %v6152_v23, %v6112_v36 }
 0x46a   : > { %v7085_v25 = vpack.c.bf16 %v6218_v13, %v6217_v38  ;;  %v6216_v42 = vmax.f32 %v6184_v0, 0.0 }
 0x46c   : > { %7101 = vst [vmem:[%s10721_s14 + $0x78] sm:$0xff] %v7085_v25   ;;  %v7080_v22 = vpack.c.bf16 %v6216_v42, %v6215_v21 }
 0x46e   : > { %7100 = vst [vmem:[%s10721_s14 + $0x70] sm:$0xff] %v7080_v22  }
 0x46f   : > { %7982 = shalt.err (!%p7979_p0)
}
 0x470   : > { %s7983_s12 = scalar_lea.hbm %s10780_s16, 2048  ;;  %s7987_s19 = scalar_lea.hbm %s10834_s7, 4096 }
 0x471   : > { %p7984_p5 = scmp.ne.s32.totalorder %s10780_s16, %s7983_s12  ;;  %p7988_p4 = scmp.lt.s32.totalorder %s10780_s16, %s10834_s7 }
 0x472   : > { %p7989_p6 = scmp.lt.s32.totalorder %s7987_s19, %s7983_s12 }
 0x473   : > { %p7985_p2 = pnand %p7984_p5, %p11094_p11 }
 0x474   : > { %p7990_p8 = por %p7989_p6, %p7988_p4 }
 0x475   : > { %p7986_p1 = pneg %p7985_p2 }
 0x477   : > { %p7991_p3 = pnand %p7990_p8, %p7986_p1 }
 0x479   : > { %7994 = shalt.err (!%p7991_p3)
}
 0x47a   : > { %s8045_s20 = smov 64   ;;  %s8046_s30 = smov 4  }
 0x47b   : > { %7724 = dma.vmem_to_hbm [thread:$0]  (%p11094_p11), %s10782_s15, 2048, %s10780_s16, %s6380_s11, %s8045_s20, %s8045_s20, %s8046_s30  }
 0x47c PF: > { %s6408_s23 = sand.u32 1, %s8025_s24   ;;  %p11095_p7 = scmp.ne.s32.totalorder %s10866_s8, 0 }
 0x47d   : > { %p11096_p9 = scmp.ge.s32.totalorder %s8037_s27, 2  ;;  %s6409_s28 = scalar_lea.sflag [#allocation5], %s6408_s23 }
 0x47f   : > { %p7735_p10 = pnand %p11096_p9, %p11095_p7 }
 0x481   : > { %p7736_p12 = pneg %p7735_p10 }
 0x483   : > { %8020 = dma.done.wait (%p7736_p12), %s6409_s28, 2048  }
 0x484   : > { %8022 = vsyncadd (%p7736_p12), %s6409_s28, 4294965248  ;;  %p21_p13 = scmp.ge.s32.totalorder %s8141_s13, 4   ;;  %s11097_s24 = smov %s8029_s25 }
 0x485   : > { %s11098_s25 = smov %s8033_s26  ;;  %s11099_s26 = smov %s8161_s21 }
 0x486   : > { %s11100_s27 = smov %s8141_s13  ;;  %23 = sbr.rel (!%p21_p13) target bundleno = 8 (0x8), region = 107 }
 0x48b   :  { %6414 = vsyncpa [#allocation4], 1 }
 0x48c   :  { %6416 = vsyncpa [#allocation4 + $0x1], 1 }
 0x48d   :  { %6417 = vsyncpa [#allocation7], 1 }
 0x48e   :  { %6418 = vsyncpa [#allocation5], 1 }
 0x48f   :  { %6420 = vsyncpa [#allocation5 + $0x1], 1 }

</bundles_post_ra>
